<compile_context>
chip_gen: v6e
topology: v6e:2x2x1
jax: 0.10.0
libtpu: 0.0.40
codegen_flags: <defaults>
</compile_context>

<pallas_src>
import functools

import numpy as np
import jax
import jax.numpy as jnp
from jax.experimental import pallas as pl
from jax.experimental.pallas import tpu as pltpu

# ---------------- static model configuration ----------------------------------------------------
NUM_NODES = 16            # W
HISTORY_WINDOW = 5        # T (must be 5: ones(5,n,n) + GCN weight (5,in,out))
NODE_EMBED = 32           # E
OUT_DIM_GCN = 8           # O
PRED_WINDOW = 4           # P
KERNEL_SIZE_DECOMP = 3    # series_decomp moving-average kernel (odd)
NUM_CHANNELS_GRAPH = (16, 16)   # TCN_adj1 channels; level 0 has a 1x1 downsample (32 != 16)
KERNEL_SIZE_GRAPH = 3
NODEVEC_DIM = 10
DROPOUT = 0.0             # inference: dropout == identity

_W, _T, _E, _O, _P = NUM_NODES, HISTORY_WINDOW, NODE_EMBED, OUT_DIM_GCN, PRED_WINDOW
_K = KERNEL_SIZE_GRAPH
_C1, _C2 = NUM_CHANNELS_GRAPH

# ---------------- packed-parameter layout (rows are 8-aligned for clean sublane loads) -----------
PACK_COLS = 128
PACK_ENTRIES = [
    ('fc_I_w', 3, _E), ('fc_I_b', 1, _E),
    ('fc_I_res_w', _E, _E), ('fc_I_res_b', 1, _E),
    ('fc_I_trend_w', _E, _E), ('fc_I_trend_b', 1, _E),
    ('nodevec1', _W, NODEVEC_DIM),
    ('t0_c1_w', _K * _E, _C1), ('t0_c1_b', 1, _C1),
    ('t0_c2_w', _K * _C1, _C1), ('t0_c2_b', 1, _C1),
    ('t0_ds_w', _E, _C1), ('t0_ds_b', 1, _C1),
    ('t1_c1_w', _K * _C1, _C2), ('t1_c1_b', 1, _C2),
    ('t1_c2_w', _K * _C2, _C2), ('t1_c2_b', 1, _C2),
    ('fused_heads_w', _T * _E, 2 + _P),     # gcn1_w[t] @ [intra|result][t-block], stacked over t
    ('heads_b', 1, 2 + _P),                 # [intra_b(2) | result_b(P)]
]
PACK_LAYOUT = {}
_off = 0
for _name, _r, _c in PACK_ENTRIES:
    PACK_LAYOUT[_name] = (_off, _r, _c)
    _off = ((_off + _r + 7) // 8) * 8
PACK_ROWS = _off


# ------------------------------------- Pallas kernel --------------------------------------------
def bdstgnn_kernel(x_ref, aux_ref, pk_ref, out_ref):
    W, T, E, P = NUM_NODES, HISTORY_WINDOW, NODE_EMBED, PRED_WINDOW
    K = KERNEL_SIZE_GRAPH
    C1, C2 = NUM_CHANNELS_GRAPH
    f32 = jnp.float32

    def getp(name):
        off, r, c = PACK_LAYOUT[name]
        return pk_ref[off:off + r, :c]

    def softmax_last(a):
        m = jnp.max(a, axis=-1, keepdims=True)
        e = jnp.exp(a - m)
        return e * pl.reciprocal(jnp.sum(e, axis=-1, keepdims=True), approx=True)

    def causal_conv(h3, wname, bname, dilation, cin, cout):
        # h3: (T, W, cin) time-major; weight_norm(Conv1d) + Chomp1d == causal dilated conv.
        # Per-tap accumulated matmuls (MXU has large slack at these shapes); no lane concat.
        woff = PACK_LAYOUT[wname][0]
        acc = jnp.zeros((T * W, cout), f32)
        for k in range(K):
            s = (K - 1 - k) * dilation                 # left time-shift for this tap
            if s >= T:
                continue
            wk = pk_ref[woff + k * cin: woff + (k + 1) * cin, :cout]     # (cin, cout)
            if s == 0:
                tap = h3
            else:
                tap = jnp.concatenate(
                    [jnp.zeros((s, W, cin), f32), h3[:T - s]], axis=0)   # leading-axis pad
            acc = acc + jnp.dot(tap.reshape(T * W, cin), wk, preferred_element_type=f32)
        return (acc + getp(bname)).reshape(T, W, cout)

    # ---------------- fc_I -----------------------------------------------------------------------
    x2 = x_ref[...].reshape(T * W, 3)                                # (80, 3)
    I_emd2 = jnp.dot(x2, getp('fc_I_w'), preferred_element_type=f32) + getp('fc_I_b')
    I_emd = I_emd2.reshape(T, W, E)                                  # (T, W, E)

    # ---------------- series_decomp (moving avg k=3, replicate padding), time-major --------------
    prev = jnp.concatenate([I_emd[0:1], I_emd[:T - 1]], axis=0)
    nxt = jnp.concatenate([I_emd[1:], I_emd[T - 1:]], axis=0)
    I_trend = (prev + I_emd + nxt) * (1.0 / float(KERNEL_SIZE_DECOMP))
    I_res = I_emd - I_trend

    # ---------------- fc_I_res + fc_I_trend -------------------------------------------------------
    I_tem2 = (jnp.dot(I_res.reshape(T * W, E), getp('fc_I_res_w'),
                      preferred_element_type=f32) + getp('fc_I_res_b')
              + jnp.dot(I_trend.reshape(T * W, E), getp('fc_I_trend_w'),
                        preferred_element_type=f32) + getp('fc_I_trend_b'))
    I_tem = I_tem2.reshape(T, W, E)                                  # (T, W, E)

    # ---------------- static adjacency: softmax(relu(nodevec @ nodevec.T), dim=1) ----------------
    nv = getp('nodevec1')                                            # (W, 10)
    sta = jnp.einsum('ik,jk->ij', nv, nv, preferred_element_type=f32)
    sta = softmax_last(jnp.maximum(sta, 0.0))                        # (W, W)

    # ---------------- dynamic embedding via TCN_adj1 (2 TemporalBlocks) --------------------------
    # level 0: dilation 1, 1x1 downsample residual (E != C1); dropout == identity
    o = jnp.maximum(causal_conv(I_emd, 't0_c1_w', 't0_c1_b', 1, E, C1), 0.0)
    o = jnp.maximum(causal_conv(o, 't0_c2_w', 't0_c2_b', 1, C1, C1), 0.0)
    res0 = (jnp.dot(I_emd.reshape(T * W, E), getp('t0_ds_w'),
                    preferred_element_type=f32) + getp('t0_ds_b')).reshape(T, W, C1)
    h = jnp.maximum(o + res0, 0.0)
    # level 1: dilation 2, identity residual (C1 == C2)
    o = jnp.maximum(causal_conv(h, 't1_c1_w', 't1_c1_b', 2, C1, C2), 0.0)
    o = jnp.maximum(causal_conv(o, 't1_c2_w', 't1_c2_b', 2, C2, C2), 0.0)
    emb = jnp.maximum(o + h, 0.0)                                    # (T, W, C2)

    # ---------------- adjacency fusion (batched over T) ------------------------------------------
    # Contraction on the trailing (lane) axis of both operands (same pattern as flash 'bqd,bkd').
    dyn = jnp.einsum('twc,tvc->twv', emb, emb, preferred_element_type=f32)  # (T, W, W)
    dyn = softmax_last(jnp.maximum(dyn, 0.0))
    fus = softmax_last(jnp.maximum(dyn + sta[None, :, :], 0.0))      # all_adj_norm

    # einsum('tnw,wtd->wtd'): scale data by column sums of adj[t]
    colsum = jnp.sum(fus, axis=1)                                    # (T, W)
    support = I_tem * colsum[:, :, None]                             # (T, W, E)

    # ---------------- fused GCN + heads -----------------------------------------------------------
    # heads = sum_t support[t] @ (gcn_w[t] @ heads_w[t*O:(t+1)*O]) + heads_b   (W, 2+P)
    fh_off = PACK_LAYOUT['fused_heads_w'][0]
    nout = 2 + P
    hacc = jnp.zeros((W, nout), f32)
    for t in range(T):
        wt = pk_ref[fh_off + t * E: fh_off + (t + 1) * E, :nout]     # (E, 2+P), 8-aligned rows
        hacc = hacc + jnp.dot(support[t], wt, preferred_element_type=f32)
    heads = hacc + getp('heads_b')

    beta = jax.nn.sigmoid(heads[:, 0:1])                             # (W, 1)
    gama = jax.nn.sigmoid(heads[:, 1:2])                             # (W, 1)

    # ---------------- physical SIR rollout (hoisted reciprocals, single combined store) ----------
    aux = aux_ref[...]                                               # (W, 6): I, R, S, N, imin, imax
    Icur = aux[:, 0:1]
    Rcur = aux[:, 1:2]
    Scur = aux[:, 2:3]
    N_ = aux[:, 3:4]
    imin = aux[:, 4:5]
    invN = pl.reciprocal(N_, approx=False)
    # NOTE: no guard for i_max == i_min (matches torch reference)
    inv_rng = pl.reciprocal(aux[:, 5:6] - imin, approx=False)
    cols = [heads[:, 2:2 + P]]                                       # final_res (W, P)
    for _ in range(P):
        dI = (beta * Scur * invN - gama) * Icur
        dR = gama * Icur
        Icur = Icur + dI
        Rcur = Rcur + dR
        Scur = N_ - Icur - Rcur
        cols.append((Icur - imin) * inv_rng)                         # pred_phy column
    out_ref[...] = jnp.concatenate(cols, axis=-1)                    # (W, 2P), one store


# ------------------------------------- host-side parameter packing ------------------------------
def pack_params(params):
    """Pack all parameters into a single (PACK_ROWS, 128) f32 buffer (one DMA)."""
    T, O = HISTORY_WINDOW, OUT_DIM_GCN
    C1, C2 = NUM_CHANNELS_GRAPH

    gw = np.asarray(params['gcn1_w'], np.float32)                    # (T, E, O)
    hw = np.concatenate([np.asarray(params['intra_w'], np.float32),
                         np.asarray(params['result_w'], np.float32)], axis=1)   # (T*O, 2+P)
    fused = np.concatenate(
        [gw[t] @ hw[t * O:(t + 1) * O] for t in range(T)], axis=0)   # (T*E, 2+P)

    mats = {
        'fc_I_w': params['fc_I_w'], 'fc_I_b': params['fc_I_b'],
        'fc_I_res_w': params['fc_I_res_w'], 'fc_I_res_b': params['fc_I_res_b'],
        'fc_I_trend_w': params['fc_I_trend_w'], 'fc_I_trend_b': params['fc_I_trend_b'],
        'nodevec1': params['nodevec1'],
        't0_c1_w': np.asarray(params['t0_c1_w']).reshape(-1, C1), 't0_c1_b': params['t0_c1_b'],
        't0_c2_w': np.asarray(params['t0_c2_w']).reshape(-1, C1), 't0_c2_b': params['t0_c2_b'],
        't0_ds_w': params['t0_ds_w'], 't0_ds_b': params['t0_ds_b'],
        't1_c1_w': np.asarray(params['t1_c1_w']).reshape(-1, C2), 't1_c1_b': params['t1_c1_b'],
        't1_c2_w': np.asarray(params['t1_c2_w']).reshape(-1, C2), 't1_c2_b': params['t1_c2_b'],
        'fused_heads_w': fused,
        'heads_b': np.concatenate([np.asarray(params['intra_b']),
                                   np.asarray(params['result_b'])], axis=1),
    }
    buf = np.zeros((PACK_ROWS, PACK_COLS), np.float32)
    for name, (off, r, c) in PACK_LAYOUT.items():
        m = np.asarray(mats[name], np.float32)
        assert m.shape == (r, c), (name, m.shape, (r, c))
        buf[off:off + r, :c] = m
    return jnp.asarray(buf)


# ------------------------------------- wrappers (glue) -------------------------------------------
def bdstgnn_forward_batched(packed_params, x, data_true, s_min, s_max,
                            i_min, i_max, r_min, r_max, N):
    """Batched forward: all data inputs carry a leading batch dim B (grid over samples)."""
    del s_min, s_max, r_min, r_max      # unused in the torch forward as well
    W, T, P = NUM_NODES, HISTORY_WINDOW, PRED_WINDOW
    B = x.shape[0]

    x_tm = jnp.transpose(x, (0, 2, 1, 3)).astype(jnp.float32)        # (B, T, W, 3) time-major
    aux = jnp.concatenate(
        [data_true[:, :, -1, :],                                     # I, R, S at last history step
         N.reshape(B, W, 1), i_min.reshape(B, W, 1), i_max.reshape(B, W, 1)],
        axis=-1).astype(jnp.float32)                                 # (B, W, 6)

    fused = pl.pallas_call(
        bdstgnn_kernel,
        out_shape=jax.ShapeDtypeStruct((B, W, 2 * P), jnp.float32),
        grid=(B,),
        in_specs=[
            pl.BlockSpec((None, T, W, 3), lambda b: (b, 0, 0, 0)),
            pl.BlockSpec((None, W, 6), lambda b: (b, 0, 0)),
            # constant block index -> parameter slab stays resident in VMEM across grid steps
            pl.BlockSpec((PACK_ROWS, PACK_COLS), lambda b: (0, 0)),
        ],
        out_specs=pl.BlockSpec((None, W, 2 * P), lambda b: (b, 0, 0)),
        compiler_params=pltpu.CompilerParams(dimension_semantics=("parallel",)),
    )(x_tm, aux, packed_params)
    return fused[..., :P], fused[..., P:]                            # (final_res, pred_phy_I_res)


def bdstgnn_forward(packed_params, x, data_true, s_min, s_max, i_min, i_max, r_min, r_max, N):
    """Single-sample forward matching the torch module signature (device arg dropped)."""
    fr, pp = bdstgnn_forward_batched(
        packed_params, x[None], data_true[None],
        s_min[None], s_max[None], i_min[None], i_max[None],
        r_min[None], r_max[None], N[None])
    return fr[0], pp[0]


# ------------------------------------- deterministic params --------------------------------------
def init_params(key):
    E, O, T, P, W = NODE_EMBED, OUT_DIM_GCN, HISTORY_WINDOW, PRED_WINDOW, NUM_NODES
    Kg = KERNEL_SIZE_GRAPH
    C1, C2 = NUM_CHANNELS_GRAPH
    keys = iter(jax.random.split(key, 32))

    def nrm(shape, scale):
        return (scale * jax.random.normal(next(keys), shape)).astype(jnp.float32)

    return {
        # Linear weights stored pre-transposed: (in, out); biases as (1, out).
        'fc_I_w': nrm((3, E), 0.3), 'fc_I_b': nrm((1, E), 0.1),
        'fc_I_res_w': nrm((E, E), 0.1), 'fc_I_res_b': nrm((1, E), 0.1),
        'fc_I_trend_w': nrm((E, E), 0.1), 'fc_I_trend_b': nrm((1, E), 0.1),
        'nodevec1': nrm((W, NODEVEC_DIM), 0.3),
        # Conv weights as (K, Cin, Cout) = transposed torch (Cout, Cin, K); weight_norm pre-applied.
        't0_c1_w': nrm((Kg, E, C1), 0.01), 't0_c1_b': nrm((1, C1), 0.01),
        't0_c2_w': nrm((Kg, C1, C1), 0.01), 't0_c2_b': nrm((1, C1), 0.01),
        't0_ds_w': nrm((E, C1), 0.01), 't0_ds_b': nrm((1, C1), 0.01),
        't1_c1_w': nrm((Kg, C1, C2), 0.01), 't1_c1_b': nrm((1, C2), 0.01),
        't1_c2_w': nrm((Kg, C2, C2), 0.01), 't1_c2_b': nrm((1, C2), 0.01),
        'gcn1_w': nrm((T, E, O), 0.2),                               # GCN_layer weight (5, in, out)
        'intra_w': nrm((T * O, 2), 0.1), 'intra_b': nrm((1, 2), 0.1),
        'result_w': nrm((T * O, P), 0.1), 'result_b': nrm((1, P), 0.1),
    }


if __name__ == "__main__":
    key = jax.random.PRNGKey(0)
    kp, kx, kd = jax.random.split(key, 3)
    params = init_params(kp)
    packed = pack_params(params)                                     # one-time host-side packing

    x = jax.random.normal(kx, (NUM_NODES, HISTORY_WINDOW, 3), jnp.float32)
    data_true = jax.random.uniform(kd, (NUM_NODES, HISTORY_WINDOW, 3), jnp.float32,
                                   minval=1.0, maxval=100.0)         # [:, -1, :] = (I, R, S) init
    N = jnp.full((NUM_NODES,), 1000.0, jnp.float32)
    i_min = jnp.zeros((NUM_NODES,), jnp.float32)
    i_max = jnp.full((NUM_NODES,), 200.0, jnp.float32)
    s_min = s_max = r_min = r_max = jnp.zeros((NUM_NODES,), jnp.float32)

    # single-sample forward (semantics parity with the torch module)
    fwd = jax.jit(functools.partial(bdstgnn_forward, packed))
    final_res, pred_phy = fwd(x, data_true, s_min, s_max, i_min, i_max, r_min, r_max, N)
    jax.block_until_ready((final_res, pred_phy))

    assert final_res.shape == (NUM_NODES, PRED_WINDOW)
    assert pred_phy.shape == (NUM_NODES, PRED_WINDOW)
    assert bool(jnp.all(jnp.isfinite(final_res))) and bool(jnp.all(jnp.isfinite(pred_phy)))

    # batched throughput path: grid over samples, params resident in VMEM across grid steps,
    # batch axis "parallel" (sharded across both TensorCores on v7x).
    B = 4
    xb = jnp.broadcast_to(x[None], (B,) + x.shape)
    db = jnp.broadcast_to(data_true[None], (B,) + data_true.shape)
    zb = jnp.zeros((B, NUM_NODES), jnp.float32)
    Nb = jnp.broadcast_to(N[None], (B, NUM_NODES))
    ib = jnp.broadcast_to(i_min[None], (B, NUM_NODES))
    xab = jnp.broadcast_to(i_max[None], (B, NUM_NODES))
    fwd_b = jax.jit(functools.partial(bdstgnn_forward_batched, packed))
    fr_b, pp_b = fwd_b(xb, db, zb, zb, ib, xab, zb, zb, Nb)
    jax.block_until_ready((fr_b, pp_b))
    assert fr_b.shape == (B, NUM_NODES, PRED_WINDOW) and pp_b.shape == (B, NUM_NODES, PRED_WINDOW)
    assert bool(jnp.allclose(fr_b[0], final_res, atol=1e-5))
    assert bool(jnp.allclose(pp_b[0], pred_phy, atol=1e-5))

    print("KERNEL_OK")
</pallas_src>

<mosaic_0001>
module attributes {stable_mosaic.version = 11 : i64} {
  func.func @bdstgnn_kernel(%arg0: i32, %arg1: memref<1x5x16x3xf32, #tpu.memory_space<vmem>>, %arg2: memref<1x16x6xf32, #tpu.memory_space<vmem>>, %arg3: memref<592x128xf32, #tpu.memory_space<vmem>>, %arg4: memref<1x16x8xf32, #tpu.memory_space<vmem>>) attributes {dimension_semantics = [#tpu.dimension_semantics<parallel>], iteration_bounds = array<i64: 1>, scalar_prefetch = 0 : i64, scratch_operands = 0 : i64, tpu.core_type = #tpu.core_type<tc>, window_params = [{transform_indices = @transform_0, window_bounds = array<i64: 1, 5, 16, 3>}, {transform_indices = @transform_1, window_bounds = array<i64: 1, 16, 6>}, {pipeline_mode = #tpu.pipeline_mode<synchronous>, transform_indices = @transform_2, window_bounds = array<i64: 592, 128>}, {transform_indices = @transform_3, window_bounds = array<i64: 1, 16, 8>}]} {
    %c0 = arith.constant 0 : index
    %c0_0 = arith.constant 0 : index
    %c0_1 = arith.constant 0 : index
    %c0_2 = arith.constant 0 : index
    %0 = vector.load %arg1[%c0, %c0_0, %c0_1, %c0_2] : memref<1x5x16x3xf32, #tpu.memory_space<vmem>>, vector<1x5x16x3xf32>
    %1 = vector.shape_cast %0 : vector<1x5x16x3xf32> to vector<5x16x3xf32>
    %2 = vector.shape_cast %1 : vector<5x16x3xf32> to vector<80x3xf32>
    %c0_3 = arith.constant 0 : index
    %c0_4 = arith.constant 0 : index
    %3 = vector.load %arg3[%c0_3, %c0_4] : memref<592x128xf32, #tpu.memory_space<vmem>>, vector<3x32xf32>
    %cst = arith.constant dense<0.000000e+00> : vector<80x32xf32>
    %4 = tpu.matmul %2, %3, %cst {dimension_numbers = #tpu.dot_dimension_numbers<[1], [0], [0], [1], [0, 0, 1, 1], [], []>} : vector<80x3xf32>, vector<3x32xf32>, vector<80x32xf32> -> vector<80x32xf32>
    %c8 = arith.constant 8 : index
    %c0_5 = arith.constant 0 : index
    %5 = vector.load %arg3[%c8, %c0_5] : memref<592x128xf32, #tpu.memory_space<vmem>>, vector<1x32xf32>
    %6 = vector.broadcast %5 : vector<1x32xf32> to vector<80x32xf32>
    %7 = arith.addf %4, %6 : vector<80x32xf32>
    %8 = vector.shape_cast %7 : vector<80x32xf32> to vector<5x16x32xf32>
    %9 = vector.extract_strided_slice %8 {offsets = [0, 0, 0], sizes = [1, 16, 32], strides = [1, 1, 1]} : vector<5x16x32xf32> to vector<1x16x32xf32>
    %10 = vector.extract_strided_slice %8 {offsets = [0, 0, 0], sizes = [4, 16, 32], strides = [1, 1, 1]} : vector<5x16x32xf32> to vector<4x16x32xf32>
    %11 = tpu.concatenate %9, %10 in 0 : vector<1x16x32xf32>, vector<4x16x32xf32> -> vector<5x16x32xf32>
    %12 = vector.extract_strided_slice %8 {offsets = [1, 0, 0], sizes = [4, 16, 32], strides = [1, 1, 1]} : vector<5x16x32xf32> to vector<4x16x32xf32>
    %13 = vector.extract_strided_slice %8 {offsets = [4, 0, 0], sizes = [1, 16, 32], strides = [1, 1, 1]} : vector<5x16x32xf32> to vector<1x16x32xf32>
    %14 = tpu.concatenate %12, %13 in 0 : vector<4x16x32xf32>, vector<1x16x32xf32> -> vector<5x16x32xf32>
    %15 = arith.addf %11, %8 : vector<5x16x32xf32>
    %16 = arith.addf %15, %14 : vector<5x16x32xf32>
    %cst_6 = arith.constant 0.333333343 : f32
    %17 = vector.broadcast %cst_6 : f32 to vector<5x16x32xf32>
    %18 = arith.mulf %16, %17 : vector<5x16x32xf32>
    %19 = arith.subf %8, %18 : vector<5x16x32xf32>
    %20 = vector.shape_cast %19 : vector<5x16x32xf32> to vector<80x32xf32>
    %c16 = arith.constant 16 : index
    %c0_7 = arith.constant 0 : index
    %21 = vector.load %arg3[%c16, %c0_7] : memref<592x128xf32, #tpu.memory_space<vmem>>, vector<32x32xf32>
    %cst_8 = arith.constant dense<0.000000e+00> : vector<80x32xf32>
    %22 = tpu.matmul %20, %21, %cst_8 {dimension_numbers = #tpu.dot_dimension_numbers<[1], [0], [0], [1], [0, 0, 1, 1], [], []>} : vector<80x32xf32>, vector<32x32xf32>, vector<80x32xf32> -> vector<80x32xf32>
    %c48 = arith.constant 48 : index
    %c0_9 = arith.constant 0 : index
    %23 = vector.load %arg3[%c48, %c0_9] : memref<592x128xf32, #tpu.memory_space<vmem>>, vector<1x32xf32>
    %24 = vector.broadcast %23 : vector<1x32xf32> to vector<80x32xf32>
    %25 = arith.addf %22, %24 : vector<80x32xf32>
    %26 = vector.shape_cast %18 : vector<5x16x32xf32> to vector<80x32xf32>
    %c56 = arith.constant 56 : index
    %c0_10 = arith.constant 0 : index
    %27 = vector.load %arg3[%c56, %c0_10] : memref<592x128xf32, #tpu.memory_space<vmem>>, vector<32x32xf32>
    %cst_11 = arith.constant dense<0.000000e+00> : vector<80x32xf32>
    %28 = tpu.matmul %26, %27, %cst_11 {dimension_numbers = #tpu.dot_dimension_numbers<[1], [0], [0], [1], [0, 0, 1, 1], [], []>} : vector<80x32xf32>, vector<32x32xf32>, vector<80x32xf32> -> vector<80x32xf32>
    %29 = arith.addf %25, %28 : vector<80x32xf32>
    %c88 = arith.constant 88 : index
    %c0_12 = arith.constant 0 : index
    %30 = vector.load %arg3[%c88, %c0_12] : memref<592x128xf32, #tpu.memory_space<vmem>>, vector<1x32xf32>
    %31 = vector.broadcast %30 : vector<1x32xf32> to vector<80x32xf32>
    %32 = arith.addf %29, %31 : vector<80x32xf32>
    %33 = vector.shape_cast %32 : vector<80x32xf32> to vector<5x16x32xf32>
    %c96 = arith.constant 96 : index
    %c0_13 = arith.constant 0 : index
    %34 = vector.load %arg3[%c96, %c0_13] : memref<592x128xf32, #tpu.memory_space<vmem>>, vector<16x10xf32>
    "tpu.trace_start"() <{level = 10 : i32, message = "ik,jk->ij"}> : () -> ()
    %cst_14 = arith.constant dense<0.000000e+00> : vector<16x16xf32>
    %35 = tpu.matmul %34, %34, %cst_14 {dimension_numbers = #tpu.dot_dimension_numbers<[1], [1], [0], [0], [0, 0, 1, 0], [], []>} : vector<16x10xf32>, vector<16x10xf32>, vector<16x16xf32> -> vector<16x16xf32>
    "tpu.trace_stop"() : () -> ()
    %cst_15 = arith.constant 0.000000e+00 : f32
    %36 = vector.broadcast %cst_15 : f32 to vector<16x16xf32>
    %37 = arith.maximumf %35, %36 : vector<16x16xf32>
    %cst_16 = arith.constant dense<0xFF800000> : vector<16xf32>
    %38 = vector.multi_reduction <maximumf>, %37, %cst_16 [1] : vector<16x16xf32> to vector<16xf32>
    %39 = vector.shape_cast %38 : vector<16xf32> to vector<16x1xf32>
    %40 = vector.broadcast %39 : vector<16x1xf32> to vector<16x16xf32>
    %41 = arith.subf %37, %40 : vector<16x16xf32>
    %42 = math.exp %41 : vector<16x16xf32>
    %cst_17 = arith.constant dense<0.000000e+00> : vector<16xf32>
    %43 = vector.multi_reduction <add>, %42, %cst_17 [1] : vector<16x16xf32> to vector<16xf32>
    %44 = vector.shape_cast %43 : vector<16xf32> to vector<16x1xf32>
    %45 = tpu.reciprocal %44 {approx = true} : vector<16x1xf32> -> vector<16x1xf32>
    %46 = vector.broadcast %45 : vector<16x1xf32> to vector<16x16xf32>
    %47 = arith.mulf %42, %46 : vector<16x16xf32>
    %cst_18 = arith.constant 0.000000e+00 : f32
    %48 = vector.broadcast %cst_18 : f32 to vector<80x16xf32>
    %c112 = arith.constant 112 : index
    %c0_19 = arith.constant 0 : index
    %49 = vector.load %arg3[%c112, %c0_19] : memref<592x128xf32, #tpu.memory_space<vmem>>, vector<32x16xf32>
    %cst_20 = arith.constant 0.000000e+00 : f32
    %50 = vector.broadcast %cst_20 : f32 to vector<2x16x32xf32>
    %51 = vector.extract_strided_slice %8 {offsets = [0, 0, 0], sizes = [3, 16, 32], strides = [1, 1, 1]} : vector<5x16x32xf32> to vector<3x16x32xf32>
    %52 = tpu.concatenate %50, %51 in 0 : vector<2x16x32xf32>, vector<3x16x32xf32> -> vector<5x16x32xf32>
    %53 = vector.shape_cast %52 : vector<5x16x32xf32> to vector<80x32xf32>
    %cst_21 = arith.constant dense<0.000000e+00> : vector<80x16xf32>
    %54 = tpu.matmul %53, %49, %cst_21 {dimension_numbers = #tpu.dot_dimension_numbers<[1], [0], [0], [1], [0, 0, 1, 1], [], []>} : vector<80x32xf32>, vector<32x16xf32>, vector<80x16xf32> -> vector<80x16xf32>
    %55 = arith.addf %48, %54 : vector<80x16xf32>
    %c144 = arith.constant 144 : index
    %c0_22 = arith.constant 0 : index
    %56 = vector.load %arg3[%c144, %c0_22] : memref<592x128xf32, #tpu.memory_space<vmem>>, vector<32x16xf32>
    %cst_23 = arith.constant 0.000000e+00 : f32
    %57 = vector.broadcast %cst_23 : f32 to vector<1x16x32xf32>
    %58 = vector.extract_strided_slice %8 {offsets = [0, 0, 0], sizes = [4, 16, 32], strides = [1, 1, 1]} : vector<5x16x32xf32> to vector<4x16x32xf32>
    %59 = tpu.concatenate %57, %58 in 0 : vector<1x16x32xf32>, vector<4x16x32xf32> -> vector<5x16x32xf32>
    %60 = vector.shape_cast %59 : vector<5x16x32xf32> to vector<80x32xf32>
    %cst_24 = arith.constant dense<0.000000e+00> : vector<80x16xf32>
    %61 = tpu.matmul %60, %56, %cst_24 {dimension_numbers = #tpu.dot_dimension_numbers<[1], [0], [0], [1], [0, 0, 1, 1], [], []>} : vector<80x32xf32>, vector<32x16xf32>, vector<80x16xf32> -> vector<80x16xf32>
    %62 = arith.addf %55, %61 : vector<80x16xf32>
    %c176 = arith.constant 176 : index
    %c0_25 = arith.constant 0 : index
    %63 = vector.load %arg3[%c176, %c0_25] : memref<592x128xf32, #tpu.memory_space<vmem>>, vector<32x16xf32>
    %64 = vector.shape_cast %8 : vector<5x16x32xf32> to vector<80x32xf32>
    %cst_26 = arith.constant dense<0.000000e+00> : vector<80x16xf32>
    %65 = tpu.matmul %64, %63, %cst_26 {dimension_numbers = #tpu.dot_dimension_numbers<[1], [0], [0], [1], [0, 0, 1, 1], [], []>} : vector<80x32xf32>, vector<32x16xf32>, vector<80x16xf32> -> vector<80x16xf32>
    %66 = arith.addf %62, %65 : vector<80x16xf32>
    %c208 = arith.constant 208 : index
    %c0_27 = arith.constant 0 : index
    %67 = vector.load %arg3[%c208, %c0_27] : memref<592x128xf32, #tpu.memory_space<vmem>>, vector<1x16xf32>
    %68 = vector.broadcast %67 : vector<1x16xf32> to vector<80x16xf32>
    %69 = arith.addf %66, %68 : vector<80x16xf32>
    %70 = vector.shape_cast %69 : vector<80x16xf32> to vector<5x16x16xf32>
    %cst_28 = arith.constant 0.000000e+00 : f32
    %71 = vector.broadcast %cst_28 : f32 to vector<5x16x16xf32>
    %72 = arith.maximumf %70, %71 : vector<5x16x16xf32>
    %cst_29 = arith.constant 0.000000e+00 : f32
    %73 = vector.broadcast %cst_29 : f32 to vector<80x16xf32>
    %c216 = arith.constant 216 : index
    %c0_30 = arith.constant 0 : index
    %74 = vector.load %arg3[%c216, %c0_30] : memref<592x128xf32, #tpu.memory_space<vmem>>, vector<16x16xf32>
    %cst_31 = arith.constant 0.000000e+00 : f32
    %75 = vector.broadcast %cst_31 : f32 to vector<2x16x16xf32>
    %76 = vector.extract_strided_slice %72 {offsets = [0, 0, 0], sizes = [3, 16, 16], strides = [1, 1, 1]} : vector<5x16x16xf32> to vector<3x16x16xf32>
    %77 = tpu.concatenate %75, %76 in 0 : vector<2x16x16xf32>, vector<3x16x16xf32> -> vector<5x16x16xf32>
    %78 = vector.shape_cast %77 : vector<5x16x16xf32> to vector<80x16xf32>
    %cst_32 = arith.constant dense<0.000000e+00> : vector<80x16xf32>
    %79 = tpu.matmul %78, %74, %cst_32 {dimension_numbers = #tpu.dot_dimension_numbers<[1], [0], [0], [1], [0, 0, 1, 1], [], []>} : vector<80x16xf32>, vector<16x16xf32>, vector<80x16xf32> -> vector<80x16xf32>
    %80 = arith.addf %73, %79 : vector<80x16xf32>
    %c232 = arith.constant 232 : index
    %c0_33 = arith.constant 0 : index
    %81 = vector.load %arg3[%c232, %c0_33] : memref<592x128xf32, #tpu.memory_space<vmem>>, vector<16x16xf32>
    %cst_34 = arith.constant 0.000000e+00 : f32
    %82 = vector.broadcast %cst_34 : f32 to vector<1x16x16xf32>
    %83 = vector.extract_strided_slice %72 {offsets = [0, 0, 0], sizes = [4, 16, 16], strides = [1, 1, 1]} : vector<5x16x16xf32> to vector<4x16x16xf32>
    %84 = tpu.concatenate %82, %83 in 0 : vector<1x16x16xf32>, vector<4x16x16xf32> -> vector<5x16x16xf32>
    %85 = vector.shape_cast %84 : vector<5x16x16xf32> to vector<80x16xf32>
    %cst_35 = arith.constant dense<0.000000e+00> : vector<80x16xf32>
    %86 = tpu.matmul %85, %81, %cst_35 {dimension_numbers = #tpu.dot_dimension_numbers<[1], [0], [0], [1], [0, 0, 1, 1], [], []>} : vector<80x16xf32>, vector<16x16xf32>, vector<80x16xf32> -> vector<80x16xf32>
    %87 = arith.addf %80, %86 : vector<80x16xf32>
    %c248 = arith.constant 248 : index
    %c0_36 = arith.constant 0 : index
    %88 = vector.load %arg3[%c248, %c0_36] : memref<592x128xf32, #tpu.memory_space<vmem>>, vector<16x16xf32>
    %89 = vector.shape_cast %72 : vector<5x16x16xf32> to vector<80x16xf32>
    %cst_37 = arith.constant dense<0.000000e+00> : vector<80x16xf32>
    %90 = tpu.matmul %89, %88, %cst_37 {dimension_numbers = #tpu.dot_dimension_numbers<[1], [0], [0], [1], [0, 0, 1, 1], [], []>} : vector<80x16xf32>, vector<16x16xf32>, vector<80x16xf32> -> vector<80x16xf32>
    %91 = arith.addf %87, %90 : vector<80x16xf32>
    %c264 = arith.constant 264 : index
    %c0_38 = arith.constant 0 : index
    %92 = vector.load %arg3[%c264, %c0_38] : memref<592x128xf32, #tpu.memory_space<vmem>>, vector<1x16xf32>
    %93 = vector.broadcast %92 : vector<1x16xf32> to vector<80x16xf32>
    %94 = arith.addf %91, %93 : vector<80x16xf32>
    %95 = vector.shape_cast %94 : vector<80x16xf32> to vector<5x16x16xf32>
    %cst_39 = arith.constant 0.000000e+00 : f32
    %96 = vector.broadcast %cst_39 : f32 to vector<5x16x16xf32>
    %97 = arith.maximumf %95, %96 : vector<5x16x16xf32>
    %98 = vector.shape_cast %8 : vector<5x16x32xf32> to vector<80x32xf32>
    %c272 = arith.constant 272 : index
    %c0_40 = arith.constant 0 : index
    %99 = vector.load %arg3[%c272, %c0_40] : memref<592x128xf32, #tpu.memory_space<vmem>>, vector<32x16xf32>
    %cst_41 = arith.constant dense<0.000000e+00> : vector<80x16xf32>
    %100 = tpu.matmul %98, %99, %cst_41 {dimension_numbers = #tpu.dot_dimension_numbers<[1], [0], [0], [1], [0, 0, 1, 1], [], []>} : vector<80x32xf32>, vector<32x16xf32>, vector<80x16xf32> -> vector<80x16xf32>
    %c304 = arith.constant 304 : index
    %c0_42 = arith.constant 0 : index
    %101 = vector.load %arg3[%c304, %c0_42] : memref<592x128xf32, #tpu.memory_space<vmem>>, vector<1x16xf32>
    %102 = vector.broadcast %101 : vector<1x16xf32> to vector<80x16xf32>
    %103 = arith.addf %100, %102 : vector<80x16xf32>
    %104 = vector.shape_cast %103 : vector<80x16xf32> to vector<5x16x16xf32>
    %105 = arith.addf %97, %104 : vector<5x16x16xf32>
    %cst_43 = arith.constant 0.000000e+00 : f32
    %106 = vector.broadcast %cst_43 : f32 to vector<5x16x16xf32>
    %107 = arith.maximumf %105, %106 : vector<5x16x16xf32>
    %cst_44 = arith.constant 0.000000e+00 : f32
    %108 = vector.broadcast %cst_44 : f32 to vector<80x16xf32>
    %c312 = arith.constant 312 : index
    %c0_45 = arith.constant 0 : index
    %109 = vector.load %arg3[%c312, %c0_45] : memref<592x128xf32, #tpu.memory_space<vmem>>, vector<16x16xf32>
    %cst_46 = arith.constant 0.000000e+00 : f32
    %110 = vector.broadcast %cst_46 : f32 to vector<4x16x16xf32>
    %111 = vector.extract_strided_slice %107 {offsets = [0, 0, 0], sizes = [1, 16, 16], strides = [1, 1, 1]} : vector<5x16x16xf32> to vector<1x16x16xf32>
    %112 = tpu.concatenate %110, %111 in 0 : vector<4x16x16xf32>, vector<1x16x16xf32> -> vector<5x16x16xf32>
    %113 = vector.shape_cast %112 : vector<5x16x16xf32> to vector<80x16xf32>
    %cst_47 = arith.constant dense<0.000000e+00> : vector<80x16xf32>
    %114 = tpu.matmul %113, %109, %cst_47 {dimension_numbers = #tpu.dot_dimension_numbers<[1], [0], [0], [1], [0, 0, 1, 1], [], []>} : vector<80x16xf32>, vector<16x16xf32>, vector<80x16xf32> -> vector<80x16xf32>
    %115 = arith.addf %108, %114 : vector<80x16xf32>
    %c328 = arith.constant 328 : index
    %c0_48 = arith.constant 0 : index
    %116 = vector.load %arg3[%c328, %c0_48] : memref<592x128xf32, #tpu.memory_space<vmem>>, vector<16x16xf32>
    %cst_49 = arith.constant 0.000000e+00 : f32
    %117 = vector.broadcast %cst_49 : f32 to vector<2x16x16xf32>
    %118 = vector.extract_strided_slice %107 {offsets = [0, 0, 0], sizes = [3, 16, 16], strides = [1, 1, 1]} : vector<5x16x16xf32> to vector<3x16x16xf32>
    %119 = tpu.concatenate %117, %118 in 0 : vector<2x16x16xf32>, vector<3x16x16xf32> -> vector<5x16x16xf32>
    %120 = vector.shape_cast %119 : vector<5x16x16xf32> to vector<80x16xf32>
    %cst_50 = arith.constant dense<0.000000e+00> : vector<80x16xf32>
    %121 = tpu.matmul %120, %116, %cst_50 {dimension_numbers = #tpu.dot_dimension_numbers<[1], [0], [0], [1], [0, 0, 1, 1], [], []>} : vector<80x16xf32>, vector<16x16xf32>, vector<80x16xf32> -> vector<80x16xf32>
    %122 = arith.addf %115, %121 : vector<80x16xf32>
    %c344 = arith.constant 344 : index
    %c0_51 = arith.constant 0 : index
    %123 = vector.load %arg3[%c344, %c0_51] : memref<592x128xf32, #tpu.memory_space<vmem>>, vector<16x16xf32>
    %124 = vector.shape_cast %107 : vector<5x16x16xf32> to vector<80x16xf32>
    %cst_52 = arith.constant dense<0.000000e+00> : vector<80x16xf32>
    %125 = tpu.matmul %124, %123, %cst_52 {dimension_numbers = #tpu.dot_dimension_numbers<[1], [0], [0], [1], [0, 0, 1, 1], [], []>} : vector<80x16xf32>, vector<16x16xf32>, vector<80x16xf32> -> vector<80x16xf32>
    %126 = arith.addf %122, %125 : vector<80x16xf32>
    %c360 = arith.constant 360 : index
    %c0_53 = arith.constant 0 : index
    %127 = vector.load %arg3[%c360, %c0_53] : memref<592x128xf32, #tpu.memory_space<vmem>>, vector<1x16xf32>
    %128 = vector.broadcast %127 : vector<1x16xf32> to vector<80x16xf32>
    %129 = arith.addf %126, %128 : vector<80x16xf32>
    %130 = vector.shape_cast %129 : vector<80x16xf32> to vector<5x16x16xf32>
    %cst_54 = arith.constant 0.000000e+00 : f32
    %131 = vector.broadcast %cst_54 : f32 to vector<5x16x16xf32>
    %132 = arith.maximumf %130, %131 : vector<5x16x16xf32>
    %cst_55 = arith.constant 0.000000e+00 : f32
    %133 = vector.broadcast %cst_55 : f32 to vector<80x16xf32>
    %c368 = arith.constant 368 : index
    %c0_56 = arith.constant 0 : index
    %134 = vector.load %arg3[%c368, %c0_56] : memref<592x128xf32, #tpu.memory_space<vmem>>, vector<16x16xf32>
    %cst_57 = arith.constant 0.000000e+00 : f32
    %135 = vector.broadcast %cst_57 : f32 to vector<4x16x16xf32>
    %136 = vector.extract_strided_slice %132 {offsets = [0, 0, 0], sizes = [1, 16, 16], strides = [1, 1, 1]} : vector<5x16x16xf32> to vector<1x16x16xf32>
    %137 = tpu.concatenate %135, %136 in 0 : vector<4x16x16xf32>, vector<1x16x16xf32> -> vector<5x16x16xf32>
    %138 = vector.shape_cast %137 : vector<5x16x16xf32> to vector<80x16xf32>
    %cst_58 = arith.constant dense<0.000000e+00> : vector<80x16xf32>
    %139 = tpu.matmul %138, %134, %cst_58 {dimension_numbers = #tpu.dot_dimension_numbers<[1], [0], [0], [1], [0, 0, 1, 1], [], []>} : vector<80x16xf32>, vector<16x16xf32>, vector<80x16xf32> -> vector<80x16xf32>
    %140 = arith.addf %133, %139 : vector<80x16xf32>
    %c384 = arith.constant 384 : index
    %c0_59 = arith.constant 0 : index
    %141 = vector.load %arg3[%c384, %c0_59] : memref<592x128xf32, #tpu.memory_space<vmem>>, vector<16x16xf32>
    %cst_60 = arith.constant 0.000000e+00 : f32
    %142 = vector.broadcast %cst_60 : f32 to vector<2x16x16xf32>
    %143 = vector.extract_strided_slice %132 {offsets = [0, 0, 0], sizes = [3, 16, 16], strides = [1, 1, 1]} : vector<5x16x16xf32> to vector<3x16x16xf32>
    %144 = tpu.concatenate %142, %143 in 0 : vector<2x16x16xf32>, vector<3x16x16xf32> -> vector<5x16x16xf32>
    %145 = vector.shape_cast %144 : vector<5x16x16xf32> to vector<80x16xf32>
    %cst_61 = arith.constant dense<0.000000e+00> : vector<80x16xf32>
    %146 = tpu.matmul %145, %141, %cst_61 {dimension_numbers = #tpu.dot_dimension_numbers<[1], [0], [0], [1], [0, 0, 1, 1], [], []>} : vector<80x16xf32>, vector<16x16xf32>, vector<80x16xf32> -> vector<80x16xf32>
    %147 = arith.addf %140, %146 : vector<80x16xf32>
    %c400 = arith.constant 400 : index
    %c0_62 = arith.constant 0 : index
    %148 = vector.load %arg3[%c400, %c0_62] : memref<592x128xf32, #tpu.memory_space<vmem>>, vector<16x16xf32>
    %149 = vector.shape_cast %132 : vector<5x16x16xf32> to vector<80x16xf32>
    %cst_63 = arith.constant dense<0.000000e+00> : vector<80x16xf32>
    %150 = tpu.matmul %149, %148, %cst_63 {dimension_numbers = #tpu.dot_dimension_numbers<[1], [0], [0], [1], [0, 0, 1, 1], [], []>} : vector<80x16xf32>, vector<16x16xf32>, vector<80x16xf32> -> vector<80x16xf32>
    %151 = arith.addf %147, %150 : vector<80x16xf32>
    %c416 = arith.constant 416 : index
    %c0_64 = arith.constant 0 : index
    %152 = vector.load %arg3[%c416, %c0_64] : memref<592x128xf32, #tpu.memory_space<vmem>>, vector<1x16xf32>
    %153 = vector.broadcast %152 : vector<1x16xf32> to vector<80x16xf32>
    %154 = arith.addf %151, %153 : vector<80x16xf32>
    %155 = vector.shape_cast %154 : vector<80x16xf32> to vector<5x16x16xf32>
    %cst_65 = arith.constant 0.000000e+00 : f32
    %156 = vector.broadcast %cst_65 : f32 to vector<5x16x16xf32>
    %157 = arith.maximumf %155, %156 : vector<5x16x16xf32>
    %158 = arith.addf %157, %107 : vector<5x16x16xf32>
    %cst_66 = arith.constant 0.000000e+00 : f32
    %159 = vector.broadcast %cst_66 : f32 to vector<5x16x16xf32>
    %160 = arith.maximumf %158, %159 : vector<5x16x16xf32>
    "tpu.trace_start"() <{level = 10 : i32, message = "twc,tvc->twv"}> : () -> ()
    %cst_67 = arith.constant dense<0.000000e+00> : vector<5x16x16xf32>
    %161 = tpu.matmul %160, %160, %cst_67 {dimension_numbers = #tpu.dot_dimension_numbers<[2], [2], [1], [1], [0, 0, 0, 1, 1, 1], [0], [0]>} : vector<5x16x16xf32>, vector<5x16x16xf32>, vector<5x16x16xf32> -> vector<5x16x16xf32>
    "tpu.trace_stop"() : () -> ()
    %cst_68 = arith.constant 0.000000e+00 : f32
    %162 = vector.broadcast %cst_68 : f32 to vector<5x16x16xf32>
    %163 = arith.maximumf %161, %162 : vector<5x16x16xf32>
    %cst_69 = arith.constant dense<0xFF800000> : vector<5x16xf32>
    %164 = vector.multi_reduction <maximumf>, %163, %cst_69 [2] : vector<5x16x16xf32> to vector<5x16xf32>
    %165 = vector.shape_cast %164 : vector<5x16xf32> to vector<5x16x1xf32>
    %166 = vector.broadcast %165 : vector<5x16x1xf32> to vector<5x16x16xf32>
    %167 = arith.subf %163, %166 : vector<5x16x16xf32>
    %168 = math.exp %167 : vector<5x16x16xf32>
    %cst_70 = arith.constant dense<0.000000e+00> : vector<5x16xf32>
    %169 = vector.multi_reduction <add>, %168, %cst_70 [2] : vector<5x16x16xf32> to vector<5x16xf32>
    %170 = vector.shape_cast %169 : vector<5x16xf32> to vector<5x16x1xf32>
    %171 = tpu.reciprocal %170 {approx = true} : vector<5x16x1xf32> -> vector<5x16x1xf32>
    %172 = vector.broadcast %171 : vector<5x16x1xf32> to vector<5x16x16xf32>
    %173 = arith.mulf %168, %172 : vector<5x16x16xf32>
    %174 = vector.shape_cast %47 : vector<16x16xf32> to vector<1x16x16xf32>
    %175 = vector.broadcast %174 : vector<1x16x16xf32> to vector<5x16x16xf32>
    %176 = arith.addf %173, %175 : vector<5x16x16xf32>
    %cst_71 = arith.constant 0.000000e+00 : f32
    %177 = vector.broadcast %cst_71 : f32 to vector<5x16x16xf32>
    %178 = arith.maximumf %176, %177 : vector<5x16x16xf32>
    %cst_72 = arith.constant dense<0xFF800000> : vector<5x16xf32>
    %179 = vector.multi_reduction <maximumf>, %178, %cst_72 [2] : vector<5x16x16xf32> to vector<5x16xf32>
    %180 = vector.shape_cast %179 : vector<5x16xf32> to vector<5x16x1xf32>
    %181 = vector.broadcast %180 : vector<5x16x1xf32> to vector<5x16x16xf32>
    %182 = arith.subf %178, %181 : vector<5x16x16xf32>
    %183 = math.exp %182 : vector<5x16x16xf32>
    %cst_73 = arith.constant dense<0.000000e+00> : vector<5x16xf32>
    %184 = vector.multi_reduction <add>, %183, %cst_73 [2] : vector<5x16x16xf32> to vector<5x16xf32>
    %185 = vector.shape_cast %184 : vector<5x16xf32> to vector<5x16x1xf32>
    %186 = tpu.reciprocal %185 {approx = true} : vector<5x16x1xf32> -> vector<5x16x1xf32>
    %187 = vector.broadcast %186 : vector<5x16x1xf32> to vector<5x16x16xf32>
    %188 = arith.mulf %183, %187 : vector<5x16x16xf32>
    %cst_74 = arith.constant dense<0.000000e+00> : vector<5x16xf32>
    %189 = vector.multi_reduction <add>, %188, %cst_74 [1] : vector<5x16x16xf32> to vector<5x16xf32>
    %190 = vector.shape_cast %189 : vector<5x16xf32> to vector<5x16x1xf32>
    %191 = vector.broadcast %190 : vector<5x16x1xf32> to vector<5x16x32xf32>
    %192 = arith.mulf %33, %191 : vector<5x16x32xf32>
    %cst_75 = arith.constant 0.000000e+00 : f32
    %193 = vector.broadcast %cst_75 : f32 to vector<16x6xf32>
    %c424 = arith.constant 424 : index
    %c0_76 = arith.constant 0 : index
    %194 = vector.load %arg3[%c424, %c0_76] : memref<592x128xf32, #tpu.memory_space<vmem>>, vector<32x6xf32>
    %195 = vector.extract_strided_slice %192 {offsets = [0, 0, 0], sizes = [1, 16, 32], strides = [1, 1, 1]} : vector<5x16x32xf32> to vector<1x16x32xf32>
    %196 = vector.shape_cast %195 : vector<1x16x32xf32> to vector<16x32xf32>
    %cst_77 = arith.constant dense<0.000000e+00> : vector<16x6xf32>
    %197 = tpu.matmul %196, %194, %cst_77 {dimension_numbers = #tpu.dot_dimension_numbers<[1], [0], [0], [1], [0, 0, 1, 1], [], []>} : vector<16x32xf32>, vector<32x6xf32>, vector<16x6xf32> -> vector<16x6xf32>
    %198 = arith.addf %193, %197 : vector<16x6xf32>
    %c456 = arith.constant 456 : index
    %c0_78 = arith.constant 0 : index
    %199 = vector.load %arg3[%c456, %c0_78] : memref<592x128xf32, #tpu.memory_space<vmem>>, vector<32x6xf32>
    %200 = vector.extract_strided_slice %192 {offsets = [1, 0, 0], sizes = [1, 16, 32], strides = [1, 1, 1]} : vector<5x16x32xf32> to vector<1x16x32xf32>
    %201 = vector.shape_cast %200 : vector<1x16x32xf32> to vector<16x32xf32>
    %cst_79 = arith.constant dense<0.000000e+00> : vector<16x6xf32>
    %202 = tpu.matmul %201, %199, %cst_79 {dimension_numbers = #tpu.dot_dimension_numbers<[1], [0], [0], [1], [0, 0, 1, 1], [], []>} : vector<16x32xf32>, vector<32x6xf32>, vector<16x6xf32> -> vector<16x6xf32>
    %203 = arith.addf %198, %202 : vector<16x6xf32>
    %c488 = arith.constant 488 : index
    %c0_80 = arith.constant 0 : index
    %204 = vector.load %arg3[%c488, %c0_80] : memref<592x128xf32, #tpu.memory_space<vmem>>, vector<32x6xf32>
    %205 = vector.extract_strided_slice %192 {offsets = [2, 0, 0], sizes = [1, 16, 32], strides = [1, 1, 1]} : vector<5x16x32xf32> to vector<1x16x32xf32>
    %206 = vector.shape_cast %205 : vector<1x16x32xf32> to vector<16x32xf32>
    %cst_81 = arith.constant dense<0.000000e+00> : vector<16x6xf32>
    %207 = tpu.matmul %206, %204, %cst_81 {dimension_numbers = #tpu.dot_dimension_numbers<[1], [0], [0], [1], [0, 0, 1, 1], [], []>} : vector<16x32xf32>, vector<32x6xf32>, vector<16x6xf32> -> vector<16x6xf32>
    %208 = arith.addf %203, %207 : vector<16x6xf32>
    %c520 = arith.constant 520 : index
    %c0_82 = arith.constant 0 : index
    %209 = vector.load %arg3[%c520, %c0_82] : memref<592x128xf32, #tpu.memory_space<vmem>>, vector<32x6xf32>
    %210 = vector.extract_strided_slice %192 {offsets = [3, 0, 0], sizes = [1, 16, 32], strides = [1, 1, 1]} : vector<5x16x32xf32> to vector<1x16x32xf32>
    %211 = vector.shape_cast %210 : vector<1x16x32xf32> to vector<16x32xf32>
    %cst_83 = arith.constant dense<0.000000e+00> : vector<16x6xf32>
    %212 = tpu.matmul %211, %209, %cst_83 {dimension_numbers = #tpu.dot_dimension_numbers<[1], [0], [0], [1], [0, 0, 1, 1], [], []>} : vector<16x32xf32>, vector<32x6xf32>, vector<16x6xf32> -> vector<16x6xf32>
    %213 = arith.addf %208, %212 : vector<16x6xf32>
    %c552 = arith.constant 552 : index
    %c0_84 = arith.constant 0 : index
    %214 = vector.load %arg3[%c552, %c0_84] : memref<592x128xf32, #tpu.memory_space<vmem>>, vector<32x6xf32>
    %215 = vector.extract_strided_slice %192 {offsets = [4, 0, 0], sizes = [1, 16, 32], strides = [1, 1, 1]} : vector<5x16x32xf32> to vector<1x16x32xf32>
    %216 = vector.shape_cast %215 : vector<1x16x32xf32> to vector<16x32xf32>
    %cst_85 = arith.constant dense<0.000000e+00> : vector<16x6xf32>
    %217 = tpu.matmul %216, %214, %cst_85 {dimension_numbers = #tpu.dot_dimension_numbers<[1], [0], [0], [1], [0, 0, 1, 1], [], []>} : vector<16x32xf32>, vector<32x6xf32>, vector<16x6xf32> -> vector<16x6xf32>
    %218 = arith.addf %213, %217 : vector<16x6xf32>
    %c584 = arith.constant 584 : index
    %c0_86 = arith.constant 0 : index
    %219 = vector.load %arg3[%c584, %c0_86] : memref<592x128xf32, #tpu.memory_space<vmem>>, vector<1x6xf32>
    %220 = vector.broadcast %219 : vector<1x6xf32> to vector<16x6xf32>
    %221 = arith.addf %218, %220 : vector<16x6xf32>
    %222 = vector.extract_strided_slice %221 {offsets = [0, 0], sizes = [16, 1], strides = [1, 1]} : vector<16x6xf32> to vector<16x1xf32>
    %223 = arith.negf %222 : vector<16x1xf32>
    %224 = math.exp %223 : vector<16x1xf32>
    %cst_87 = arith.constant 1.000000e+00 : f32
    %225 = vector.broadcast %cst_87 : f32 to vector<16x1xf32>
    %226 = arith.addf %225, %224 : vector<16x1xf32>
    %227 = arith.divf %225, %226 : vector<16x1xf32>
    %228 = vector.extract_strided_slice %221 {offsets = [0, 1], sizes = [16, 1], strides = [1, 1]} : vector<16x6xf32> to vector<16x1xf32>
    %229 = arith.negf %228 : vector<16x1xf32>
    %230 = math.exp %229 : vector<16x1xf32>
    %cst_88 = arith.constant 1.000000e+00 : f32
    %231 = vector.broadcast %cst_88 : f32 to vector<16x1xf32>
    %232 = arith.addf %231, %230 : vector<16x1xf32>
    %233 = arith.divf %231, %232 : vector<16x1xf32>
    %c0_89 = arith.constant 0 : index
    %c0_90 = arith.constant 0 : index
    %c0_91 = arith.constant 0 : index
    %234 = vector.load %arg2[%c0_89, %c0_90, %c0_91] : memref<1x16x6xf32, #tpu.memory_space<vmem>>, vector<1x16x6xf32>
    %235 = vector.shape_cast %234 : vector<1x16x6xf32> to vector<16x6xf32>
    %236 = vector.extract_strided_slice %235 {offsets = [0, 0], sizes = [16, 1], strides = [1, 1]} : vector<16x6xf32> to vector<16x1xf32>
    %237 = vector.extract_strided_slice %235 {offsets = [0, 1], sizes = [16, 1], strides = [1, 1]} : vector<16x6xf32> to vector<16x1xf32>
    %238 = vector.extract_strided_slice %235 {offsets = [0, 2], sizes = [16, 1], strides = [1, 1]} : vector<16x6xf32> to vector<16x1xf32>
    %239 = vector.extract_strided_slice %235 {offsets = [0, 3], sizes = [16, 1], strides = [1, 1]} : vector<16x6xf32> to vector<16x1xf32>
    %240 = vector.extract_strided_slice %235 {offsets = [0, 4], sizes = [16, 1], strides = [1, 1]} : vector<16x6xf32> to vector<16x1xf32>
    %241 = tpu.reciprocal %239 : vector<16x1xf32> -> vector<16x1xf32>
    %242 = vector.extract_strided_slice %235 {offsets = [0, 5], sizes = [16, 1], strides = [1, 1]} : vector<16x6xf32> to vector<16x1xf32>
    %243 = arith.subf %242, %240 : vector<16x1xf32>
    %244 = tpu.reciprocal %243 : vector<16x1xf32> -> vector<16x1xf32>
    %245 = vector.extract_strided_slice %221 {offsets = [0, 2], sizes = [16, 4], strides = [1, 1]} : vector<16x6xf32> to vector<16x4xf32>
    %246 = arith.mulf %227, %238 : vector<16x1xf32>
    %247 = arith.mulf %246, %241 : vector<16x1xf32>
    %248 = arith.subf %247, %233 : vector<16x1xf32>
    %249 = arith.mulf %248, %236 : vector<16x1xf32>
    %250 = arith.mulf %233, %236 : vector<16x1xf32>
    %251 = arith.addf %236, %249 : vector<16x1xf32>
    %252 = arith.addf %237, %250 : vector<16x1xf32>
    %253 = arith.subf %239, %251 : vector<16x1xf32>
    %254 = arith.subf %253, %252 : vector<16x1xf32>
    %255 = arith.subf %251, %240 : vector<16x1xf32>
    %256 = arith.mulf %255, %244 : vector<16x1xf32>
    %257 = arith.mulf %227, %254 : vector<16x1xf32>
    %258 = arith.mulf %257, %241 : vector<16x1xf32>
    %259 = arith.subf %258, %233 : vector<16x1xf32>
    %260 = arith.mulf %259, %251 : vector<16x1xf32>
    %261 = arith.mulf %233, %251 : vector<16x1xf32>
    %262 = arith.addf %251, %260 : vector<16x1xf32>
    %263 = arith.addf %252, %261 : vector<16x1xf32>
    %264 = arith.subf %239, %262 : vector<16x1xf32>
    %265 = arith.subf %264, %263 : vector<16x1xf32>
    %266 = arith.subf %262, %240 : vector<16x1xf32>
    %267 = arith.mulf %266, %244 : vector<16x1xf32>
    %268 = arith.mulf %227, %265 : vector<16x1xf32>
    %269 = arith.mulf %268, %241 : vector<16x1xf32>
    %270 = arith.subf %269, %233 : vector<16x1xf32>
    %271 = arith.mulf %270, %262 : vector<16x1xf32>
    %272 = arith.mulf %233, %262 : vector<16x1xf32>
    %273 = arith.addf %262, %271 : vector<16x1xf32>
    %274 = arith.addf %263, %272 : vector<16x1xf32>
    %275 = arith.subf %239, %273 : vector<16x1xf32>
    %276 = arith.subf %275, %274 : vector<16x1xf32>
    %277 = arith.subf %273, %240 : vector<16x1xf32>
    %278 = arith.mulf %277, %244 : vector<16x1xf32>
    %279 = arith.mulf %227, %276 : vector<16x1xf32>
    %280 = arith.mulf %279, %241 : vector<16x1xf32>
    %281 = arith.subf %280, %233 : vector<16x1xf32>
    %282 = arith.mulf %281, %273 : vector<16x1xf32>
    %283 = arith.addf %273, %282 : vector<16x1xf32>
    %284 = arith.subf %283, %240 : vector<16x1xf32>
    %285 = arith.mulf %284, %244 : vector<16x1xf32>
    %286 = tpu.concatenate %245, %256, %267, %278, %285 in 1 : vector<16x4xf32>, vector<16x1xf32>, vector<16x1xf32>, vector<16x1xf32>, vector<16x1xf32> -> vector<16x8xf32>
    %c0_92 = arith.constant 0 : index
    %c0_93 = arith.constant 0 : index
    %c0_94 = arith.constant 0 : index
    %287 = vector.load %arg4[%c0_92, %c0_93, %c0_94] : memref<1x16x8xf32, #tpu.memory_space<vmem>>, vector<1x16x8xf32>
    %288 = vector.shape_cast %287 : vector<1x16x8xf32> to vector<16x8xf32>
    %289 = vector.shape_cast %286 : vector<16x8xf32> to vector<1x16x8xf32>
    tpu.vector_store %arg4[%c0_92, %c0_93, %c0_94], %289 {strides = array<i32>} : memref<1x16x8xf32, #tpu.memory_space<vmem>>, vector<1x16x8xf32>,
    return
  }
  func.func @transform_0(%arg0: i32) -> (i32, i32, i32, i32) {
    %c0_i32 = arith.constant 0 : i32
    %c0_i32_0 = arith.constant 0 : i32
    %c0_i32_1 = arith.constant 0 : i32
    %c0_i32_2 = arith.constant 0 : i32
    return %arg0, %c0_i32, %c0_i32_0, %c0_i32_1 : i32, i32, i32, i32
  }
  func.func @transform_1(%arg0: i32) -> (i32, i32, i32) {
    %c0_i32 = arith.constant 0 : i32
    %c0_i32_0 = arith.constant 0 : i32
    %c0_i32_1 = arith.constant 0 : i32
    return %arg0, %c0_i32, %c0_i32_0 : i32, i32, i32
  }
  func.func @transform_2(%arg0: i32) -> (i32, i32) {
    %c0_i32 = arith.constant 0 : i32
    %c0_i32_0 = arith.constant 0 : i32
    %c0_i32_1 = arith.constant 0 : i32
    return %c0_i32, %c0_i32_0 : i32, i32
  }
  func.func @transform_3(%arg0: i32) -> (i32, i32, i32) {
    %c0_i32 = arith.constant 0 : i32
    %c0_i32_0 = arith.constant 0 : i32
    %c0_i32_1 = arith.constant 0 : i32
    return %arg0, %c0_i32, %c0_i32_0 : i32, i32, i32
  }
}

</mosaic_0001>

<bundles_post_ra>
// kernel: bdstgnn_forward.1
= control target key start
LH: loop header
LB: loop body
LE: loop exit
PB: predicated region body
PF: predicated region fallthrough
CT: control target
= control target key end

     0   :  { %8 = vsyncpa [#allocation3], 0  ;;  %s4974_s12 = smov [#allocation2]   ;;  %s5837_s0 = inlined_call_operand.vmem [shape: f32[1,5,16,3], index: 0, kind: input, shape index: {}]   ;;  %s5838_s1 = inlined_call_operand.vmem [shape: f32[1,16,6], index: 1, kind: input, shape index: {}]   ;;  %s5839_s2 = inlined_call_operand.hbm [shape: f32[592,128], index: 2, kind: input, shape index: {}]   ;;  %s5840_s3 = inlined_call_operand.vmem [shape: f32[1,16,8], index: 3, kind: output, shape index: {}]  }
   0x1   :  { %s18_s13 = sshll.u32 %s4974_s12, 4  ;;  %s19_s13 = int_to_ptr.vmem [resolvable:$true] %s18_s13 }
   0x2   :  { %s4960_s14 = scalar_lea.vmem %s19_s13, 9472  ;;  %p4965_p1 = scmp.lt.s32.totalorder %s19_s13, %s19_s13 }
   0x3   :  { %p4961_p0 = scmp.ne.s32.totalorder %s19_s13, %s4960_s14  ;;  %p4966_p2 = scmp.lt.s32.totalorder %s4960_s14, %s4960_s14 }
   0x5   :  { %p4967_p3 = por %p4966_p2, %p4965_p1 }
   0x7   :  { %p4968_p4 = pnand %p4967_p3, %p4961_p0 }
   0x9   :  { %4971 = shalt.err (!%p4968_p4)
}
   0xa   :  { %s4975_s15 = smov 128   ;;  %s4976_s16 = smov 8  }
   0xb   :  { %24 = dma.hbm_to_vmem [thread:$0]  %s5839_s2, 9472, %s19_s13, [#allocation3], %s4975_s15, %s4975_s15, %s4976_s16  }
   0xc   :  { %4972 = dma.done.wait [#allocation3], 9472  }
   0xd   :  { %4973 = vsyncadd [#allocation3], 4294957824  ;;  %vm75_vm0 = vcmask 1042432   ;;  %vm44_vm1 = vcmask 23552   ;;  %v38_v0 = vld [vmem:[#allocation2] sm:$0x7] }
   0xe   :  { %v28_v1 = vld [vmem:[%s5837_s0] sm:$0xff]  ;;  %v29_v2 = vld [vmem:[%s5837_s0 + $0x8] sm:$0xff]  ;;  %4409 = vmatprep.subr.msk.mxu0 %vm75_vm0, %v38_v0  ;;  %v30_v3 = vld [vmem:[%s5837_s0 + $0x10] sm:$0xff]  ;;  %vm565_vm2 = vcmask 80896   ;;  %vm243_vm3 = vcmask 261120   ;;  %vm649_vm4 = vcmask 130048  }
   0xf   :  { %4411 = vmatprep.mubr.msk.f32.mxu0 %vm44_vm1, %v28_v1  ;;  %4410 = vmatpush3.msk.msra.mxu0 %vm75_vm0, %v38_v0  ;;  %v31_v4 = vld [vmem:[%s5837_s0 + $0x18] sm:$0xff]  ;;  %v32_v5 = vld [vmem:[%s5837_s0 + $0x20] sm:$0xff]  ;;  %v33_v6 = vld [vmem:[%s5837_s0 + $0x28] sm:$0xff]  ;;  %s4978_s14 = smov 126   ;;  %s4979_s15 = smov 125   ;;  %vm3962_vm5 = vcmask 31744  }
  0x10   :  { %4412 = vmatmul.mubr.msk.f32.vlgmr.msra.gmra.mxu0 %vm44_vm1, %v29_v2  ;;  %v34_v7 = vld [vmem:[%s5837_s0 + $0x30] sm:$0xff]  ;;  %v35_v8 = vld [vmem:[%s5837_s0 + $0x38] sm:$0xff]  ;;  %v36_v9 = vld [vmem:[%s5837_s0 + $0x40] sm:$0xff]  ;;  %s4981_s16 = smov 1   ;;  %s4982_s17 = smov 3   ;;  %vm3965_vm6 = vcmask 39936  }
  0x11   :  { %4414 = vmatprep.mubr.msk.f32.mxu0 %vm44_vm1, %v30_v3  ;;  %v37_v10 = vld [vmem:[%s5837_s0 + $0x48] sm:$0xff]  ;;  %v392_v11 = vld [vmem:[#allocation2 + $0x50] sm:$0xff]  ;;  %v236_v14 = vld [vmem:[#allocation2 + $0x20] sm:$0xff]  ;;  %s4983_s18 = smov 2   ;;  %s4984_s19 = smov 124   ;;  %vm3968_vm7 = vcmask 48128  }
  0x12   :  { %4449 = vmatprep.subr.mxu0 %v392_v11  ;;  %v237_v12 = vld [vmem:[#allocation2 + $0x28] sm:$0xff]  ;;  %v390_v15 = vld [vmem:[#allocation2 + $0x40] sm:$0xff]  ;;  %v235_v16 = vld [vmem:[#allocation2 + $0x18] sm:$0xff]  ;;  %s4985_s20 = smov 123   ;;  %s4986_s21 = smov 4   ;;  %vm3971_vm8 = vcmask 56320  }
  0x13   :  { %4450 = vmatpush3.msra.mxu0 %v392_v11  ;;  %v391_v13 = vld [vmem:[#allocation2 + $0x48] sm:$0xff]  ;;  %4426 = vmatprep.subr.mxu1 %v237_v12  ;;  %v389_v17 = vld [vmem:[#allocation2 + $0x38] sm:$0xff]  ;;  %v234_v18 = vld [vmem:[#allocation2 + $0x10] sm:$0xff]  ;;  %s4987_s22 = smov 5   ;;  %s4988_s23 = smov 6   ;;  %vm3974_vm9 = vcmask 64512  }
  0x14   :  { %4415 = vmatmul.mubr.msk.f32.gmra.mxu0 %vm44_vm1, %v31_v4  ;;  %4451 = vmatprep.subr.mxu0 %v391_v13  ;;  %v675_v19 = vld [vmem:[#allocation2 + $0x88] sm:$0xff]  ;;  %v674_v48 = vld [vmem:[#allocation2 + $0x80] sm:$0xff]  ;;  %v673_v62 = vld [vmem:[#allocation2 + $0x78] sm:$0xff]  ;;  %s4989_s24 = smov 7  }
  0x15   :  { %4417 = vmatprep.mubr.msk.f32.mxu0 %vm44_vm1, %v32_v5  ;;  %4427 = vmatpush3.msra.mxu1 %v237_v12  ;;  %v5053_v20 = vld [vmem:[#allocation2 + $0x68] sm:$0xff]  ;;  %v563_v56 = vld [vmem:[#allocation2 + $0x60] sm:$0xff] }
  0x16   :  { %4452 = vmatpush3.msra.mxu0 %v391_v13  ;;  %4428 = vmatprep.subr.mxu1 %v236_v14  ;;  %v3982_v21 = vld [vmem:[#allocation2 + $0x8] ss:$0 sm:$0xff] }
  0x17   :  { %4453 = vmatprep.subr.mxu0 %v390_v15  ;;  %4429 = vmatpush3.msra.mxu1 %v236_v14  ;;  %v679_v14 = vld [vmem:[#allocation2 + $0xa8] sm:$0xff] }
  0x18   :  { %4418 = vmatmul.mubr.msk.f32.gmra.mxu0 %vm44_vm1, %v33_v6  ;;  %4430 = vmatprep.subr.mxu1 %v235_v16 }
  0x19   :  { %4420 = vmatprep.mubr.msk.f32.mxu0 %vm44_vm1, %v34_v7  ;;  %4454 = vmatpush3.msra.mxu0 %v390_v15  ;;  %v672_v7 = vld [vmem:[#allocation2 + $0x70] sm:$0xff] }
  0x1a   :  { %4455 = vmatprep.subr.mxu0 %v389_v17  ;;  %4431 = vmatpush3.msra.mxu1 %v235_v16 }
  0x1b   :  { %4456 = vmatpush3.msra.mxu0 %v389_v17  ;;  %4432 = vmatprep.subr.mxu1 %v234_v18 }
  0x1c   :  { %4421 = vmatmul.mubr.msk.f32.gmra.mxu0 %vm44_vm1, %v35_v8  ;;  %4433 = vmatpush3.msra.mxu1 %v234_v18 }
  0x1d   :  { %4423 = vmatprep.mubr.msk.f32.mxu0 %vm44_vm1, %v36_v9  ;;  %4502 = vmatprep.subr.mxu0 %v675_v19 }
  0x1e   :  { %4472 = vmatprep.subr.msk.mxu1 %vm565_vm2, %v5053_v20 }
  0x20   :  { %4424 = vmatmul.mubr.msk.f32.gmra.mxu0 %vm44_vm1, %v37_v10 }
  0xd0   :  { %v4413_v22 = vpop.f32.mrf.mxu0 }
  0xd1   :  { %v5057_v23 = vadd.f32 %v4413_v22, %v3982_v21 }
  0xd2   :  { %v145_v24 = vpop.f32.mrf.mxu0 }
  0xd3   :  { %v5059_v25 = vadd.f32 %v3982_v21, %v145_v24  ;;  %v195_v28 = vadd.f32 %v5057_v23, %v5057_v23 }
  0xd4   :  { %v4416_v26 = vpop.f32.mrf.mxu0 }
  0xd5   :  { %v5061_v27 = vadd.f32 %v4416_v26, %v3982_v21  ;;  %v194_v31 = vadd.f32 %v5059_v25, %v5059_v25  ;;  %v4977_v26 = vmov 0.0  }
  0xd6   :  { %v155_v29 = vpop.f32.mrf.mxu0 }
  0xd7   :  { %v5065_v30 = vadd.f32 %v3982_v21, %v155_v29  ;;  %v205_v32 = vadd.f32 %v195_v28, %v5061_v27  ;;  %v197_v36 = vadd.f32 %v5061_v27, %v5057_v23  ;;  %v678_v28 = vld [vmem:[#allocation2 + $0xa0] sm:$0xff]  ;;  %v677_v29 = vld [vmem:[#allocation2 + $0x98] sm:$0xff] }
  0xd8   :  { %v4419_v33 = vpop.f32.mrf.mxu0 }
  0xd9   :  { %v5070_v34 = vadd.f32 %v4419_v33, %v3982_v21  ;;  %v204_v35 = vadd.f32 %v194_v31, %v5065_v30  ;;  %v215_v38 = vmul.f32 0.33333334, %v205_v32  ;;  %v196_v41 = vadd.f32 %v5065_v30, %v5059_v25  ;;  %v676_v31 = vld [vmem:[#allocation2 + $0x90] sm:$0xff]  ;;  %v940_v32 = vld [vmem:[#allocation2 + $0xc8] sm:$0xff]  ;;  %v938_v33 = vld [vmem:[#allocation2 + $0xb8] sm:$0xff] }
  0xda   :  { %v165_v37 = vpop.f32.mrf.mxu0 }
  0xdb   :  { %v5075_v39 = vadd.f32 %v3982_v21, %v165_v37  ;;  %v214_v40 = vmul.f32 0.33333334, %v204_v35  ;;  %v207_v42 = vadd.f32 %v197_v36, %v5070_v34  ;;  %v199_v47 = vadd.f32 %v5070_v34, %v5061_v27  ;;  %v937_v35 = vld [vmem:[#allocation2 + $0xb0] sm:$0xff]  ;;  %v1098_v37 = vld [vmem:[#allocation2 + $0xe0] sm:$0xff] }
  0xdc   :  { %v4422_v43 = vpop.f32.mrf.mxu0  ;;  %v225_v50 = vsub.f32 %v5057_v23, %v215_v38  ;;  %v1100_v36 = vld [vmem:[#allocation2 + $0xf0] sm:$0xff] }
  0xdd   :  { %v5080_v44 = vadd.f32 %v4422_v43, %v3982_v21  ;;  %4457 = vmatprep.mubr.msk.f32.mxu0 %vm243_vm3, %v214_v40  ;;  %v224_v45 = vsub.f32 %v5059_v25, %v214_v40  ;;  %v206_v46 = vadd.f32 %v196_v41, %v5075_v39  ;;  %v217_v51 = vmul.f32 0.33333334, %v207_v42  ;;  %v1099_v40 = vld [vmem:[#allocation2 + $0xe8] sm:$0xff]  ;;  %v1517_v42 = vld [vmem:[#allocation2 + $0x120] sm:$0xff]  ;;  %v1516_v43 = vld [vmem:[#allocation2 + $0x118] sm:$0xff] }
  0xde   :  { %v175_v49 = vpop.f32.mrf.mxu0  ;;  %4458 = vmatmul.mubr.msk.f32.vlgmr.msra.gmra.mxu0 %vm243_vm3, %v215_v38  ;;  %v198_v54 = vadd.f32 %v5075_v39, %v5065_v30  ;;  %v1097_v38 = vld [vmem:[#allocation2 + $0xd8] sm:$0xff]  ;;  %v1518_v41 = vld [vmem:[#allocation2 + $0x128] sm:$0xff] }
  0xdf   :  { %v5089_v52 = vadd.f32 %v3982_v21, %v175_v49  ;;  %4434 = vmatprep.mubr.msk.f32.mxu1 %vm243_vm3, %v224_v45  ;;  %v216_v53 = vmul.f32 0.33333334, %v206_v46  ;;  %v209_v55 = vadd.f32 %v199_v47, %v5080_v44  ;;  %4503 = vmatpush3.msra.mxu0 %v675_v19  ;;  %v201_v58 = vadd.f32 %v5080_v44, %v5070_v34  ;;  %v1515_v45 = vld [vmem:[#allocation2 + $0x110] sm:$0xff]  ;;  %v1358_v46 = vld [vmem:[#allocation2 + $0x100] sm:$0xff]  ;;  %v1357_v47 = vld [vmem:[#allocation2 + $0xf8] sm:$0xff] }
  0xe0   :  { %v4425_v57 = vpop.f32.mrf.mxu0  ;;  %4435 = vmatmul.mubr.msk.f32.vlgmr.msra.gmra.mxu1 %vm243_vm3, %v225_v50  ;;  %4504 = vmatprep.subr.mxu0 %v674_v48  ;;  %v227_v0 = vsub.f32 %v5061_v27, %v217_v51  ;;  %v3994_v49 = vld [vmem:[#allocation2 + $0x30] ss:$0 sm:$0xff] }
  0xe1   :  { %v5098_v59 = vadd.f32 %v4425_v57, %v3982_v21  ;;  %4460 = vmatprep.mubr.msk.f32.mxu0 %vm243_vm3, %v216_v53  ;;  %v226_v60 = vsub.f32 %v5065_v30, %v216_v53  ;;  %v208_v61 = vadd.f32 %v198_v54, %v5089_v52  ;;  %4473 = vmatpush3.xpose.msk.msra.mxu1 %vm565_vm2, %v5053_v20  ;;  %v219_v1 = vmul.f32 0.33333334, %v209_v55 }
  0xe2   :  { %v185_v63 = vpop.f32.mrf.mxu0  ;;  %4461 = vmatmul.mubr.msk.f32.gmra.mxu0 %vm243_vm3, %v217_v51  ;;  %4474 = vmatprep.subr.msk.mxu1 %vm565_vm2, %v563_v56  ;;  %v200_v4 = vadd.f32 %v5089_v52, %v5075_v39 }
  0xe3   :  { %v5108_v2 = vadd.f32 %v3982_v21, %v185_v63  ;;  %4437 = vmatprep.mubr.msk.f32.mxu1 %vm243_vm3, %v226_v60  ;;  %v218_v3 = vmul.f32 0.33333334, %v208_v61  ;;  %v211_v5 = vadd.f32 %v201_v58, %v5098_v59  ;;  %4505 = vmatpush3.msra.mxu0 %v674_v48  ;;  %v203_v6 = vadd.f32 %v5098_v59, %v5080_v44 }
  0xe4   :  { %4438 = vmatmul.mubr.msk.f32.gmra.mxu1 %vm243_vm3, %v227_v0  ;;  %4506 = vmatprep.subr.mxu0 %v673_v62  ;;  %v229_v11 = vsub.f32 %v5070_v34, %v219_v1 }
  0xe5   :  { %4463 = vmatprep.mubr.msk.f32.mxu0 %vm243_vm3, %v218_v3  ;;  %v228_v8 = vsub.f32 %v5075_v39, %v218_v3  ;;  %v210_v9 = vadd.f32 %v200_v4, %v5108_v2  ;;  %v202_v10 = vadd.f32 %v5108_v2, %v5089_v52  ;;  %4507 = vmatpush3.msra.mxu0 %v673_v62  ;;  %v221_v12 = vmul.f32 0.33333334, %v211_v5 }
  0xe6   :  { %4464 = vmatmul.mubr.msk.f32.gmra.mxu0 %vm243_vm3, %v219_v1  ;;  %v213_v13 = vadd.f32 %v203_v6, %v5098_v59  ;;  %4475 = vmatpush3.xpose.msk.msra.mxu1 %vm565_vm2, %v563_v56 }
  0xe7   :  { %4440 = vmatprep.mubr.msk.f32.mxu1 %vm243_vm3, %v228_v8  ;;  %v220_v15 = vmul.f32 0.33333334, %v210_v9  ;;  %v212_v16 = vadd.f32 %v202_v10, %v5108_v2  ;;  %4508 = vmatprep.subr.mxu0 %v672_v7  ;;  %v231_v19 = vsub.f32 %v5080_v44, %v221_v12 }
  0xe8   :  { %4441 = vmatmul.mubr.msk.f32.gmra.mxu1 %vm243_vm3, %v229_v11  ;;  %4509 = vmatpush3.msra.mxu0 %v672_v7  ;;  %v223_v21 = vmul.f32 0.33333334, %v213_v13 }
  0xe9   :  { %4466 = vmatprep.mubr.msk.f32.mxu0 %vm243_vm3, %v220_v15  ;;  %v230_v17 = vsub.f32 %v5089_v52, %v220_v15  ;;  %v222_v18 = vmul.f32 0.33333334, %v212_v16  ;;  %4479 = vmatprep.subr.mxu1 %v679_v14 }
  0xea   :  { %4467 = vmatmul.mubr.msk.f32.gmra.mxu0 %vm243_vm3, %v221_v12  ;;  %v233_v24 = vsub.f32 %v5098_v59, %v223_v21  ;;  %4548 = vmatprep.subr.mxu0 %v1100_v36 }
  0xeb   :  { %4443 = vmatprep.mubr.msk.f32.mxu1 %vm243_vm3, %v230_v17  ;;  %4469 = vmatprep.mubr.msk.f32.mxu0 %vm243_vm3, %v222_v18  ;;  %v232_v22 = vsub.f32 %v5108_v2, %v222_v18 }
  0xec   :  { %4444 = vmatmul.mubr.msk.f32.gmra.mxu1 %vm243_vm3, %v231_v19 }
  0xed   :  { %4446 = vmatprep.mubr.msk.f32.mxu1 %vm243_vm3, %v232_v22 }
  0xee   :  { %4470 = vmatmul.mubr.msk.f32.gmra.mxu0 %vm243_vm3, %v223_v21 }
  0xef   :  { %4510 = vmatprep.mubr.f32.mxu0 %v4977_v26 }
  0xf0   :  { %4447 = vmatmul.mubr.msk.f32.gmra.mxu1 %vm243_vm3, %v233_v24 }
  0xf1   :  { %4476 = vmatprep.mubr.msk.f32.mxu1 %vm565_vm2, %v563_v56 }
  0xf2   :  { %4511 = vmatmul.mubr.f32.vlgmr.msra.gmra.mxu0 %v4977_v26 }
  0xf3   :  { %4513 = vmatprep.mubr.f32.mxu0 %v4977_v26  ;;  %4549 = vmatpush3.msra.mxu0 %v1100_v36 }
  0xf4   :  { %4477 = vmatmul.mubr.msk.f32.vlgmr.msra.gmra.mxu1 %vm565_vm2, %v5053_v20  ;;  %v939_v20 = vld [vmem:[#allocation2 + $0xc0] sm:$0xff]  ;;  %4550 = vmatprep.subr.mxu0 %v1099_v40 }
  0xf5   :  { %4480 = vmatpush3.msra.mxu1 %v679_v14  ;;  %4487 = vmatprep.mubr.f32.mxu1 %v4977_v26 }
  0xf6   :  { %4481 = vmatprep.subr.mxu1 %v678_v28  ;;  %4514 = vmatmul.mubr.f32.gmra.mxu0 %v4977_v26 }
  0xf7   :  { %4482 = vmatpush3.msra.mxu1 %v678_v28  ;;  %4516 = vmatprep.mubr.msk.f32.mxu0 %vm243_vm3, %v5059_v25 }
  0xf8   :  { %4483 = vmatprep.subr.mxu1 %v677_v29  ;;  %4551 = vmatpush3.msra.mxu0 %v1099_v40 }
  0xf9   :  { %4484 = vmatpush3.msra.mxu1 %v677_v29  ;;  %4586 = vmatprep.subr.mxu0 %v1358_v46 }
  0xfa   :  { %4485 = vmatprep.subr.mxu1 %v676_v31  ;;  %4517 = vmatmul.mubr.msk.f32.gmra.mxu0 %vm243_vm3, %v5057_v23 }
  0xfb   :  { %4486 = vmatpush3.msra.mxu1 %v676_v31  ;;  %4519 = vmatprep.mubr.msk.f32.mxu0 %vm243_vm3, %v5065_v30 }
  0xfc   :  { %4488 = vmatmul.mubr.f32.vlgmr.msra.gmra.mxu1 %v4977_v26  ;;  %4525 = vmatprep.subr.mxu1 %v940_v32 }
  0xfd   :  { %4490 = vmatprep.mubr.msk.f32.mxu1 %vm243_vm3, %v5059_v25  ;;  %4526 = vmatpush3.msra.mxu1 %v940_v32 }
  0xfe   :  { %4520 = vmatmul.mubr.msk.f32.gmra.mxu0 %vm243_vm3, %v5061_v27  ;;  %4527 = vmatprep.subr.mxu1 %v939_v20 }
  0xff   :  { %4522 = vmatprep.mubr.msk.f32.mxu0 %vm243_vm3, %v5075_v39  ;;  %4528 = vmatpush3.msra.mxu1 %v939_v20 }
 0x100   :  { %4491 = vmatmul.mubr.msk.f32.gmra.mxu1 %vm243_vm3, %v5057_v23  ;;  %4529 = vmatprep.subr.mxu1 %v938_v33 }
 0x101   :  { %4493 = vmatprep.mubr.msk.f32.mxu1 %vm243_vm3, %v5065_v30  ;;  %4530 = vmatpush3.msra.mxu1 %v938_v33 }
 0x102   :  { %4523 = vmatmul.mubr.msk.f32.gmra.mxu0 %vm243_vm3, %v5070_v34  ;;  %4531 = vmatprep.subr.mxu1 %v937_v35 }
 0x103   :  { %4532 = vmatpush3.msra.mxu1 %v937_v35  ;;  %4552 = vmatprep.mubr.f32.mxu0 %v4977_v26 }
 0x104   :  { %4494 = vmatmul.mubr.msk.f32.gmra.mxu1 %vm243_vm3, %v5061_v27  ;;  %4567 = vmatprep.subr.mxu1 %v1098_v37 }
 0x105   :  { %4496 = vmatprep.mubr.msk.f32.mxu1 %vm243_vm3, %v5075_v39 }
 0x106   :  { %4553 = vmatmul.mubr.f32.vlgmr.msra.gmra.mxu0 %v4977_v26 }
 0x107   :  { %4587 = vmatpush3.msra.mxu0 %v1358_v46 }
 0x108   :  { %4497 = vmatmul.mubr.msk.f32.gmra.mxu1 %vm243_vm3, %v5070_v34  ;;  %4588 = vmatprep.subr.mxu0 %v1357_v47 }
 0x109   :  { %4499 = vmatprep.mubr.msk.f32.mxu1 %vm243_vm3, %v5089_v52  ;;  %4589 = vmatpush3.msra.mxu0 %v1357_v47 }
 0x10c   :  { %4500 = vmatmul.mubr.msk.f32.gmra.mxu1 %vm243_vm3, %v5080_v44 }
 0x10d   :  { %4533 = vmatprep.mubr.msk.f32.mxu1 %vm243_vm3, %v5059_v25 }
 0x110   :  { %4534 = vmatmul.mubr.msk.f32.vlgmr.msra.gmra.mxu1 %vm243_vm3, %v5057_v23 }
 0x111   :  { %4536 = vmatprep.mubr.msk.f32.mxu1 %vm243_vm3, %v5065_v30  ;;  %4568 = vmatpush3.msra.mxu1 %v1098_v37 }
 0x112   :  { %4569 = vmatprep.subr.mxu1 %v1097_v38 }
 0x113   :  { %4570 = vmatpush3.msra.mxu1 %v1097_v38 }
 0x114   :  { %4537 = vmatmul.mubr.msk.f32.gmra.mxu1 %vm243_vm3, %v5061_v27  ;;  %4605 = vmatprep.subr.mxu1 %v1518_v41 }
 0x115   :  { %4539 = vmatprep.mubr.msk.f32.mxu1 %vm243_vm3, %v5075_v39 }
 0x118   :  { %4540 = vmatmul.mubr.msk.f32.gmra.mxu1 %vm243_vm3, %v5070_v34 }
 0x119   :  { %4542 = vmatprep.mubr.msk.f32.mxu1 %vm243_vm3, %v5089_v52 }
 0x11c   :  { %4543 = vmatmul.mubr.msk.f32.gmra.mxu1 %vm243_vm3, %v5080_v44 }
 0x11d   :  { %4545 = vmatprep.mubr.msk.f32.mxu1 %vm243_vm3, %v5108_v2 }
 0x120   :  { %4546 = vmatmul.mubr.msk.f32.gmra.mxu1 %vm243_vm3, %v5098_v59 }
 0x121   :  { %4571 = vmatprep.mubr.f32.mxu1 %v4977_v26 }
 0x124   :  { %4572 = vmatmul.mubr.f32.vlgmr.msra.gmra.mxu1 %v4977_v26 }
 0x125   :  { %4574 = vmatprep.mubr.f32.mxu1 %v4977_v26  ;;  %4606 = vmatpush3.msra.mxu1 %v1518_v41 }
 0x126   :  { %4607 = vmatprep.subr.mxu1 %v1517_v42 }
 0x127   :  { %4608 = vmatpush3.msra.mxu1 %v1517_v42 }
 0x128   :  { %4575 = vmatmul.mubr.f32.gmra.mxu1 %v4977_v26  ;;  %4609 = vmatprep.subr.mxu1 %v1516_v43 }
 0x129   :  { %4610 = vmatpush3.msra.mxu1 %v1516_v43 }
 0x12a   :  { %4611 = vmatprep.subr.mxu1 %v1515_v45 }
 0x12b   :  { %4612 = vmatpush3.msra.mxu1 %v1515_v45 }
 0x19e   :  { %v4459_v48 = vpop.f32.mrf.mxu0 }
 0x1a0   :  { %v4436_v50 = vpop.f32.mrf.mxu1  ;;  %v489_v51 = vpop.f32.mrf.mxu0 }
 0x1a1   :  { %v346_v53 = vadd.f32 %v4436_v50, %v3994_v49 }
 0x1a2   :  { %v340_v54 = vpop.f32.mrf.mxu1  ;;  %v4462_v55 = vpop.f32.mrf.mxu0 }
 0x1a3   :  { %v5204_v56 = vadd.f32 %v4459_v48, %v346_v53  ;;  %v341_v57 = vadd.f32 %v3994_v49, %v340_v54 }
 0x1a4   :  { %v4439_v58 = vpop.f32.mrf.mxu1  ;;  %v499_v60 = vpop.f32.mrf.mxu0 }
 0x1a5   :  { %v5206_v61 = vadd.f32 %v489_v51, %v341_v57  ;;  %v356_v62 = vadd.f32 %v4439_v58, %v3994_v49 }
 0x1a6   :  { %v350_v63 = vpop.f32.mrf.mxu1  ;;  %v4465_v0 = vpop.f32.mrf.mxu0 }
 0x1a7   :  { %v5208_v1 = vadd.f32 %v4462_v55, %v356_v62  ;;  %v351_v3 = vadd.f32 %v3994_v49, %v350_v63 }
 0x1a8   :  { %v4442_v4 = vpop.f32.mrf.mxu1  ;;  %v509_v5 = vpop.f32.mrf.mxu0 }
 0x1a9   :  { %v5210_v6 = vadd.f32 %v499_v60, %v351_v3  ;;  %v366_v7 = vadd.f32 %v4442_v4, %v3994_v49  ;;  %v5240_v3 = vld [vmem:[#allocation2 + $0xd0] ss:$0 sm:$0xff] }
 0x1aa   :  { %v360_v8 = vpop.f32.mrf.mxu1  ;;  %v4468_v9 = vpop.f32.mrf.mxu0 }
 0x1ab   :  { %v5212_v10 = vadd.f32 %v4465_v0, %v366_v7  ;;  %v361_v11 = vadd.f32 %v3994_v49, %v360_v8 }
 0x1ac   :  { %v4445_v12 = vpop.f32.mrf.mxu1  ;;  %v519_v13 = vpop.f32.mrf.mxu0 }
 0x1ad   :  { %v5214_v14 = vadd.f32 %v509_v5, %v361_v11  ;;  %v376_v15 = vadd.f32 %v4445_v12, %v3994_v49 }
 0x1ae   :  { %v370_v16 = vpop.f32.mrf.mxu1  ;;  %v4471_v19 = vpop.f32.mrf.mxu0 }
 0x1af   :  { %v5216_v17 = vadd.f32 %v4468_v9, %v376_v15  ;;  %v371_v18 = vadd.f32 %v3994_v49, %v370_v16 }
 0x1b0   :  { %v4448_v21 = vpop.f32.mrf.mxu1  ;;  %v529_v32 = vpop.f32.mrf.mxu0 }
 0x1b1   :  { %v5218_v22 = vadd.f32 %v519_v13, %v371_v18  ;;  %v386_v24 = vadd.f32 %v4448_v21, %v3994_v49 }
 0x1b2   :  { %v380_v28 = vpop.f32.mrf.mxu1  ;;  %v4512_v43 = vpop.f32.mrf.mxu0 }
 0x1b3   :  { %v5220_v29 = vadd.f32 %v4471_v19, %v386_v24  ;;  %v381_v31 = vadd.f32 %v3994_v49, %v380_v28 }
 0x1b4   :  { %v5222_v20 = vpop.f32.mrf.mxu1  ;;  %v888_v47 = vpop.f32.mrf.mxu0 }
 0x1b5   :  { %v5224_v33 = vadd.f32 %v529_v32, %v381_v31  ;;  %v648_v35 = vmax.f32 %v5222_v20, 0.0 }
 0x1b6   :  { %v5227_v36 = vpop.f32.mrf.mxu1  ;;  %v4515_v50 = vpop.f32.mrf.mxu0 }
 0x1b7   :  { %v647_v37 = vmax.f32 %v5227_v36, 0.0  ;;  %v653_v38 = vsel %vm649_vm4, %v648_v35, -inf }
 0x1b8   :  { %654 = vmax.xlane.f32.xlu0 %v653_v38  ;;  %v898_v54 = vpop.f32.mrf.mxu0 }
 0x1b9   :  { %v650_v40 = vsel %vm649_vm4, %v647_v37, -inf }
 0x1ba   :  { %v4518_v60 = vpop.f32.mrf.mxu0 }
 0x1bc   :  { %v4489_v41 = vpop.f32.mrf.mxu1  ;;  %651 = vmax.xlane.f32.xlu0 %v650_v40  ;;  %v908_v8 = vpop.f32.mrf.mxu0 }
 0x1bd   :  { %v894_v58 = vadd.f32 %v4512_v43, %v4489_v41 }
 0x1be   :  { %v773_v42 = vpop.f32.mrf.mxu1  ;;  %v4521_v24 = vpop.f32.mrf.mxu0 }
 0x1bf   :  { %v889_v63 = vadd.f32 %v888_v47, %v773_v42 }
 0x1c0   :  { %v4492_v45 = vpop.f32.mrf.mxu1  ;;  %v918_v47 = vpop.f32.mrf.mxu0 }
 0x1c1   :  { %v904_v5 = vadd.f32 %v4515_v50, %v4492_v45 }
 0x1c2   :  { %v783_v46 = vpop.f32.mrf.mxu1 }
 0x1c3   :  { %v899_v12 = vadd.f32 %v898_v54, %v783_v46 }
 0x1c4   :  { %v4495_v48 = vpop.f32.mrf.mxu1 }
 0x1c5   :  { %v914_v18 = vadd.f32 %v4518_v60, %v4495_v48 }
 0x1c6   :  { %v793_v49 = vpop.f32.mrf.mxu1 }
 0x1c7   :  { %v909_v38 = vadd.f32 %v908_v8, %v793_v49  ;;  %v4524_v8 = vpop.f32.mrf.mxu0 }
 0x1c8   :  { %v4498_v51 = vpop.f32.mrf.mxu1 }
 0x1c9   :  { %v924_v43 = vadd.f32 %v4521_v24, %v4498_v51 }
 0x1ca   :  { %v803_v53 = vpop.f32.mrf.mxu1 }
 0x1cb   :  { %v919_v54 = vadd.f32 %v918_v47, %v803_v53 }
 0x1cc   :  { %v5236_v55 = vpop.f32.mrf.mxu1 }
 0x1ce   :  { %v5238_v57 = vpop.f32.mrf.mxu1 }
 0x1d0   :  { %v4535_v62 = vpop.f32.mrf.mxu1 }
 0x1d1   :  { %v1063_v0 = vadd.f32 %v4535_v62, %v894_v58 }
 0x1d2   :  { %v1013_v4 = vpop.f32.mrf.mxu1 }
 0x1d3   :  { %v1062_v7 = vadd.f32 %v1013_v4, %v889_v63  ;;  %v1078_v9 = vadd.f32 %v5240_v3, %v1063_v0 }
 0x1d4   :  { %v4538_v11 = vpop.f32.mrf.mxu1 }
 0x1d5   :  { %v1077_v13 = vadd.f32 %v5240_v3, %v1062_v7  ;;  %v1065_v15 = vadd.f32 %v4538_v11, %v904_v5  ;;  %v1088_v28 = vmax.f32 %v1078_v9, 0.0  ;;  %v928_v11 = vpop.f32.mrf.mxu0 }
 0x1d6   :  { %v1023_v16 = vpop.f32.mrf.mxu1 }
 0x1d7   :  { %v1087_v19 = vmax.f32 %v1077_v13, 0.0  ;;  %v1064_v21 = vadd.f32 %v1023_v16, %v899_v12  ;;  %v1080_v31 = vadd.f32 %v5240_v3, %v1065_v15  ;;  %v934_v13 = vadd.f32 %v4524_v8, %v5236_v55  ;;  %v1662_v55 = vld [vmem:[#allocation2 + $0x150] sm:$0xff] }
 0x1d8   :  { %v4541_v32 = vpop.f32.mrf.mxu1  ;;  %4628 = vmatprep.subr.mxu0 %v1662_v55 }
 0x1d9   :  { %v1079_v40 = vadd.f32 %v5240_v3, %v1064_v21  ;;  %v1067_v41 = vadd.f32 %v4541_v32, %v914_v18  ;;  %4555 = vmatprep.mubr.msk.f32.mxu0 %vm649_vm4, %v1087_v19  ;;  %4577 = vmatprep.mubr.msk.f32.mxu1 %vm649_vm4, %v1087_v19  ;;  %v1090_v48 = vmax.f32 %v1080_v31, 0.0 }
 0x1da   :  { %v1033_v42 = vpop.f32.mrf.mxu1  ;;  %4556 = vmatmul.mubr.msk.f32.gmra.mxu0 %vm649_vm4, %v1088_v28  ;;  %4578 = vmatmul.mubr.msk.f32.gmra.mxu1 %vm649_vm4, %v1088_v28 }
 0x1db   :  { %v1089_v45 = vmax.f32 %v1079_v40, 0.0  ;;  %v1066_v46 = vadd.f32 %v1033_v42, %v909_v38  ;;  %v1082_v50 = vadd.f32 %v5240_v3, %v1067_v41 }
 0x1dc   :  { %v4544_v49 = vpop.f32.mrf.mxu1 }
 0x1dd   :  { %v1081_v58 = vadd.f32 %v5240_v3, %v1066_v46  ;;  %v1069_v60 = vadd.f32 %v4544_v49, %v924_v43  ;;  %4558 = vmatprep.mubr.msk.f32.mxu0 %vm649_vm4, %v1089_v45  ;;  %4580 = vmatprep.mubr.msk.f32.mxu1 %vm649_vm4, %v1089_v45  ;;  %v1092_v0 = vmax.f32 %v1082_v50, 0.0 }
 0x1de   :  { %v1043_v62 = vpop.f32.mrf.mxu1  ;;  %4559 = vmatmul.mubr.msk.f32.gmra.mxu0 %vm649_vm4, %v1090_v48  ;;  %4581 = vmatmul.mubr.msk.f32.gmra.mxu1 %vm649_vm4, %v1090_v48 }
 0x1df   :  { %v1091_v51 = vmax.f32 %v1081_v58, 0.0  ;;  %v1068_v63 = vadd.f32 %v1043_v62, %v919_v54  ;;  %v1084_v4 = vadd.f32 %v5240_v3, %v1069_v60 }
 0x1e0   :  { %v4547_v9 = vpop.f32.mrf.mxu1 }
 0x1e1   :  { %v1083_v5 = vadd.f32 %v5240_v3, %v1068_v63  ;;  %4561 = vmatprep.mubr.msk.f32.mxu0 %vm649_vm4, %v1091_v51  ;;  %4583 = vmatprep.mubr.msk.f32.mxu1 %vm649_vm4, %v1091_v51  ;;  %v1094_v7 = vmax.f32 %v1084_v4, 0.0 }
 0x1e2   :  { %4562 = vmatmul.mubr.msk.f32.gmra.mxu0 %vm649_vm4, %v1092_v0  ;;  %4584 = vmatmul.mubr.msk.f32.gmra.mxu1 %vm649_vm4, %v1092_v0  ;;  %v1053_v12 = vpop.f32.mrf.mxu1 }
 0x1e3   :  { %v1093_v53 = vmax.f32 %v1083_v5, 0.0  ;;  %4613 = vmatprep.mubr.msk.f32.mxu1 %vm243_vm3, %v5059_v25  ;;  %v929_v25 = vadd.f32 %v928_v11, %v5238_v57  ;;  %v1912_v57 = vld [vmem:[#allocation2 + $0x160] sm:$0xff] }
 0x1e4   :  { %v4573_v15 = vpop.f32.mrf.mxu1 }
 0x1e5   :  { %4564 = vmatprep.mubr.msk.f32.mxu0 %vm649_vm4, %v1093_v53 }
 0x1e6   :  { %4565 = vmatmul.mubr.msk.f32.gmra.mxu0 %vm649_vm4, %v1094_v7  ;;  %4614 = vmatmul.mubr.msk.f32.vlgmr.msra.gmra.mxu1 %vm243_vm3, %v5057_v23  ;;  %v1070_v23 = vadd.f32 %v1053_v12, %v929_v25  ;;  %v1308_v16 = vpop.f32.mrf.mxu1 }
 0x1e7   :  { %4590 = vmatprep.mubr.msk.f32.mxu0 %vm649_vm4, %v1087_v19  ;;  %4616 = vmatprep.mubr.msk.f32.mxu1 %vm243_vm3, %v5065_v30  ;;  %v4554_v19 = vpop.f32.mrf.mxu0 }
 0x1e8   :  { %v1085_v30 = vadd.f32 %v5240_v3, %v1070_v23  ;;  %v4576_v18 = vpop.f32.mrf.mxu1  ;;  %v1314_v60 = vadd.f32 %v4573_v15, %v4554_v19 }
 0x1e9   :  { %v1193_v24 = vpop.f32.mrf.mxu0 }
 0x1ea   :  { %4591 = vmatmul.mubr.msk.f32.vlgmr.msra.gmra.mxu0 %vm649_vm4, %v1088_v28  ;;  %4617 = vmatmul.mubr.msk.f32.gmra.mxu1 %vm243_vm3, %v5061_v27  ;;  %v1071_v27 = vadd.f32 %v4547_v9, %v934_v13  ;;  %v1318_v21 = vpop.f32.mrf.mxu1 }
 0x1eb   :  { %4593 = vmatprep.mubr.msk.f32.mxu0 %vm649_vm4, %v1089_v45  ;;  %4619 = vmatprep.mubr.msk.f32.mxu1 %vm243_vm3, %v5075_v39  ;;  %v1095_v39 = vmax.f32 %v1085_v30, 0.0 }
 0x1ec   :  { %4629 = vmatpush3.msra.mxu0 %v1662_v55 }
 0x1ee   :  { %4594 = vmatmul.mubr.msk.f32.gmra.mxu0 %vm649_vm4, %v1090_v48  ;;  %4620 = vmatmul.mubr.msk.f32.gmra.mxu1 %vm243_vm3, %v5070_v34  ;;  %v1086_v34 = vadd.f32 %v5240_v3, %v1071_v27  ;;  %v1911_v3 = vld [vmem:[#allocation2 + $0x158] sm:$0xff] }
 0x1ef   :  { %4596 = vmatprep.mubr.msk.f32.mxu0 %vm649_vm4, %v1091_v51  ;;  %4622 = vmatprep.mubr.msk.f32.mxu1 %vm243_vm3, %v5089_v52  ;;  %v5322_v51 = vld [vmem:[#allocation2 + $0x108] ss:$0 sm:$0xff] }
 0x1f0   :  { %v1096_v52 = vmax.f32 %v1086_v34, 0.0 }
 0x1f2   :  { %4597 = vmatmul.mubr.msk.f32.gmra.mxu0 %vm649_vm4, %v1092_v0  ;;  %4623 = vmatmul.mubr.msk.f32.gmra.mxu1 %vm243_vm3, %v5080_v44  ;;  %v1660_v44 = vld [vmem:[#allocation2 + $0x140] sm:$0xff]  ;;  %v1309_v0 = vadd.f32 %v1308_v16, %v1193_v24 }
 0x1f3   :  { %4599 = vmatprep.mubr.msk.f32.mxu0 %vm649_vm4, %v1093_v53  ;;  %4625 = vmatprep.mubr.msk.f32.mxu1 %vm243_vm3, %v5108_v2  ;;  %v1659_v2 = vld [vmem:[#allocation2 + $0x138] sm:$0xff] }
 0x1f4   :  { %4647 = vmatprep.subr.mxu1 %v1660_v44 }
 0x1f5   :  { %4648 = vmatpush3.msra.mxu1 %v1660_v44 }
 0x1f6   :  { %4600 = vmatmul.mubr.msk.f32.gmra.mxu0 %vm649_vm4, %v1094_v7  ;;  %4626 = vmatmul.mubr.msk.f32.gmra.mxu1 %vm243_vm3, %v5098_v59  ;;  %v1661_v59 = vld [vmem:[#allocation2 + $0x148] sm:$0xff]  ;;  %v5324_v7 = vld [vmem:[#allocation2 + $0x130] ss:$0 sm:$0xff] }
 0x1f7   :  { %4602 = vmatprep.mubr.msk.f32.mxu0 %vm649_vm4, %v1095_v39  ;;  %4651 = vmatprep.mubr.f32.mxu1 %v4977_v26 }
 0x1f8   :  { %4649 = vmatprep.subr.mxu1 %v1659_v2  ;;  %4630 = vmatprep.subr.mxu0 %v1661_v59 }
 0x1f9   :  { %4650 = vmatpush3.msra.mxu1 %v1659_v2  ;;  %4631 = vmatpush3.msra.mxu0 %v1661_v59 }
 0x1fa   :  { %4603 = vmatmul.mubr.msk.f32.gmra.mxu0 %vm649_vm4, %v1096_v52  ;;  %4652 = vmatmul.mubr.f32.vlgmr.msra.gmra.mxu1 %v4977_v26 }
 0x1fb   :  { %4632 = vmatprep.mubr.f32.mxu0 %v4977_v26  ;;  %4654 = vmatprep.mubr.f32.mxu1 %v4977_v26 }
 0x1fc   :  { %4666 = vmatprep.subr.mxu0 %v1912_v57 }
 0x1fe   :  { %4655 = vmatmul.mubr.f32.gmra.mxu1 %v4977_v26  ;;  %4633 = vmatmul.mubr.f32.vlgmr.msra.gmra.mxu0 %v4977_v26 }
 0x1ff   :  { %4657 = vmatprep.mubr.f32.mxu1 %v4977_v26  ;;  %4635 = vmatprep.mubr.f32.mxu0 %v4977_v26 }
 0x200   :  { %4667 = vmatpush3.msra.mxu0 %v1912_v57 }
 0x201   :  { %4668 = vmatprep.subr.mxu0 %v1911_v3 }
 0x202   :  { %4658 = vmatmul.mubr.f32.gmra.mxu1 %v4977_v26  ;;  %4636 = vmatmul.mubr.f32.gmra.mxu0 %v4977_v26 }
 0x203   :  { %4660 = vmatprep.mubr.f32.mxu1 %v4977_v26  ;;  %4669 = vmatpush3.msra.mxu0 %v1911_v3 }
 0x206   :  { %4661 = vmatmul.mubr.f32.gmra.mxu1 %v4977_v26 }
 0x29a   :  { %v4557_v28 = vpop.f32.mrf.mxu0  ;;  %v4579_v31 = vpop.f32.mrf.mxu1 }
 0x29b   :  { %v1324_v53 = vadd.f32 %v4576_v18, %v4557_v28 }
 0x29c   :  { %v1203_v32 = vpop.f32.mrf.mxu0  ;;  %v1328_v38 = vpop.f32.mrf.mxu1 }
 0x29d   :  { %v1319_v25 = vadd.f32 %v1318_v21, %v1203_v32 }
 0x29e   :  { %v4560_v40 = vpop.f32.mrf.mxu0  ;;  %v5310_v41 = vpop.f32.mrf.mxu1 }
 0x29f   :  { %v1334_v55 = vadd.f32 %v4579_v31, %v4560_v40 }
 0x2a0   :  { %v1213_v42 = vpop.f32.mrf.mxu0  ;;  %v1338_v43 = vpop.f32.mrf.mxu1 }
 0x2a1   :  { %v1329_v15 = vadd.f32 %v1328_v38, %v1213_v42 }
 0x2a2   :  { %v5312_v45 = vpop.f32.mrf.mxu0  ;;  %v5314_v46 = vpop.f32.mrf.mxu1 }
 0x2a4   :  { %v1223_v47 = vpop.f32.mrf.mxu0  ;;  %v5316_v48 = vpop.f32.mrf.mxu1 }
 0x2a6   :  { %v5318_v50 = vpop.f32.mrf.mxu0  ;;  %v4615_v49 = vpop.f32.mrf.mxu1 }
 0x2a7   :  { %v1596_v30 = vadd.f32 %v4615_v49, %v5324_v7 }
 0x2a8   :  { %v5320_v54 = vpop.f32.mrf.mxu0  ;;  %v1590_v58 = vpop.f32.mrf.mxu1 }
 0x2a9   :  { %v1591_v39 = vadd.f32 %v5324_v7, %v1590_v58 }
 0x2aa   :  { %v4592_v62 = vpop.f32.mrf.mxu0  ;;  %v4618_v63 = vpop.f32.mrf.mxu1 }
 0x2ab   :  { %v1481_v4 = vadd.f32 %v4592_v62, %v1314_v60  ;;  %v1606_v21 = vadd.f32 %v4618_v63, %v5324_v7 }
 0x2ac   :  { %v1431_v5 = vpop.f32.mrf.mxu0  ;;  %v1600_v11 = vpop.f32.mrf.mxu1 }
 0x2ad   :  { %v1496_v8 = vadd.f32 %v5322_v51, %v1481_v4  ;;  %v1480_v9 = vadd.f32 %v1431_v5, %v1309_v0  ;;  %v1601_v49 = vadd.f32 %v5324_v7, %v1600_v11 }
 0x2ae   :  { %v4595_v12 = vpop.f32.mrf.mxu0  ;;  %v4621_v57 = vpop.f32.mrf.mxu1 }
 0x2af   :  { %v1506_v23 = vmax.f32 %v1496_v8, 0.0  ;;  %v1495_v13 = vadd.f32 %v5322_v51, %v1480_v9  ;;  %v1483_v27 = vadd.f32 %v4595_v12, %v1324_v53  ;;  %v1616_v63 = vadd.f32 %v4621_v57, %v5324_v7 }
 0x2b0   :  { %v1441_v34 = vpop.f32.mrf.mxu0  ;;  %v1610_v40 = vpop.f32.mrf.mxu1  ;;  %v1339_v8 = vadd.f32 %v1338_v43, %v1223_v47  ;;  %v1344_v43 = vadd.f32 %v5310_v41, %v5312_v45  ;;  %v1354_v41 = vadd.f32 %v5314_v46, %v5318_v50 }
 0x2b1   :  { %v1505_v52 = vmax.f32 %v1495_v13, 0.0  ;;  %v1498_v44 = vadd.f32 %v5322_v51, %v1483_v27  ;;  %v1482_v2 = vadd.f32 %v1441_v34, %v1319_v25  ;;  %v1640_v59 = vadd.f32 %v1596_v30, %v1506_v23 }
 0x2b2   :  { %v4598_v3 = vpop.f32.mrf.mxu0  ;;  %v1611_v11 = vadd.f32 %v5324_v7, %v1610_v40  ;;  %v4624_v13 = vpop.f32.mrf.mxu1 }
 0x2b3   :  { %v1639_v16 = vadd.f32 %v1591_v39, %v1505_v52  ;;  %v1508_v18 = vmax.f32 %v1498_v44, 0.0  ;;  %v1497_v19 = vadd.f32 %v5322_v51, %v1482_v2  ;;  %v1485_v24 = vadd.f32 %v4598_v3, %v1334_v55 }
 0x2b4   :  { %v1451_v28 = vpop.f32.mrf.mxu0  ;;  %v5336_v62 = vmax.f32 %v1640_v59, 0.0  ;;  %v1349_v39 = vadd.f32 %v5316_v48, %v5320_v54  ;;  %v1620_v2 = vpop.f32.mrf.mxu1 }
 0x2b5   :  { %v5333_v32 = vmax.f32 %v1639_v16, 0.0  ;;  %v1507_v58 = vmax.f32 %v1497_v19, 0.0  ;;  %v1484_v60 = vadd.f32 %v1451_v28, %v1329_v15  ;;  %v1642_v31 = vadd.f32 %v1606_v21, %v1508_v18 }
 0x2b6   :  { %v1500_v38 = vadd.f32 %v5322_v51, %v1485_v24  ;;  %v4601_v42 = vpop.f32.mrf.mxu0  ;;  %v4627_v48 = vpop.f32.mrf.mxu1  ;;  %v1621_v16 = vadd.f32 %v5324_v7, %v1620_v2  ;;  %v1626_v24 = vadd.f32 %v4624_v13, %v5324_v7 }
 0x2b7   :  { %v1641_v0 = vadd.f32 %v1601_v49, %v1507_v58  ;;  %v1499_v4 = vadd.f32 %v5322_v51, %v1484_v60  ;;  %4638 = vmatprep.mubr.msk.f32.mxu0 %vm649_vm4, %v5333_v32  ;;  %4663 = vmatprep.mubr.msk.f32.mxu1 %vm649_vm4, %v5333_v32  ;;  %v5353_v25 = vmax.f32 %v1642_v31, 0.0  ;;  %v1487_v55 = vadd.f32 %v4601_v42, %v1344_v43 }
 0x2b8   :  { %v1510_v5 = vmax.f32 %v1500_v38, 0.0  ;;  %v1461_v53 = vpop.f32.mrf.mxu0  ;;  %4639 = vmatmul.mubr.msk.f32.gmra.mxu0 %vm649_vm4, %v5336_v62  ;;  %4664 = vmatmul.mubr.msk.f32.gmra.mxu1 %vm649_vm4, %v5336_v62  ;;  %v1630_v50 = vpop.f32.mrf.mxu1 }
 0x2b9   :  { %v5349_v9 = vmax.f32 %v1641_v0, 0.0  ;;  %v1509_v12 = vmax.f32 %v1499_v4, 0.0  ;;  %4689 = vmatprep.mubr.f32.mxu1 %v4977_v26  ;;  %v1486_v34 = vadd.f32 %v1461_v53, %v1339_v8  ;;  %v1502_v45 = vadd.f32 %v5322_v51, %v1487_v55  ;;  %v2076_v0 = vld [vmem:[#allocation2 + $0x178] sm:$0xff]  ;;  %v2075_v4 = vld [vmem:[#allocation2 + $0x170] sm:$0xff] }
 0x2ba   :  { %v1644_v23 = vadd.f32 %v1616_v63, %v1510_v5  ;;  %v4604_v27 = vpop.f32.mrf.mxu0  ;;  %v1631_v28 = vadd.f32 %v5324_v7, %v1630_v50  ;;  %4704 = vmatprep.subr.mxu0 %v2076_v0  ;;  %v2078_v63 = vld [vmem:[#allocation2 + $0x188] sm:$0xff]  ;;  %v2077_v5 = vld [vmem:[#allocation2 + $0x180] sm:$0xff]  ;;  %v2328_v53 = vld [vmem:[#allocation2 + $0x198] sm:$0xff]  ;;  %v4653_v13 = vpop.f32.mrf.mxu1 }
 0x2bb   :  { %v1643_v30 = vadd.f32 %v1611_v11, %v1509_v12  ;;  %4641 = vmatprep.mubr.msk.f32.mxu0 %vm649_vm4, %v5349_v9  ;;  %v1501_v59 = vadd.f32 %v5322_v51, %v1486_v34  ;;  %v1489_v54 = vadd.f32 %v4604_v27, %v1354_v41  ;;  %v1512_v46 = vmax.f32 %v1502_v45, 0.0  ;;  %4685 = vmatprep.subr.mxu1 %v2078_v63  ;;  %v2327_v8 = vld [vmem:[#allocation2 + $0x190] sm:$0xff] }
 0x2bc   :  { %v1471_v47 = vpop.f32.mrf.mxu0  ;;  %4642 = vmatmul.mubr.msk.f32.gmra.mxu0 %vm649_vm4, %v5353_v25  ;;  %v5365_v44 = vmax.f32 %v1644_v23, 0.0  ;;  %4686 = vmatpush3.msra.mxu1 %v2078_v63  ;;  %v1862_v34 = vpop.f32.mrf.mxu1 }
 0x2bd   :  { %v5363_v52 = vmax.f32 %v1643_v30, 0.0  ;;  %v1488_v57 = vadd.f32 %v1471_v47, %v1349_v39  ;;  %v1511_v3 = vmax.f32 %v1501_v59, 0.0  ;;  %v1504_v18 = vadd.f32 %v5322_v51, %v1489_v54  ;;  %4687 = vmatprep.subr.mxu1 %v2077_v5  ;;  %v5428_v54 = vld [vmem:[#allocation2 + $0x168] ss:$0 sm:$0xff] }
 0x2be   :  { %v5392_v49 = vadd.f32 %v1626_v24, %v1512_v46  ;;  %4688 = vmatpush3.msra.mxu1 %v2077_v5  ;;  %v4634_v11 = vpop.f32.mrf.mxu0  ;;  %v4656_v39 = vpop.f32.mrf.mxu1 }
 0x2bf   :  { %4644 = vmatprep.mubr.msk.f32.mxu0 %vm649_vm4, %v5363_v52  ;;  %v1503_v15 = vadd.f32 %v5322_v51, %v1488_v57  ;;  %v5384_v19 = vadd.f32 %v1621_v16, %v1511_v3  ;;  %v1514_v58 = vmax.f32 %v1504_v18, 0.0  ;;  %v1636_v51 = vadd.f32 %v4627_v48, %v5324_v7  ;;  %4690 = vmatmul.mubr.f32.vlgmr.msra.gmra.mxu1 %v4977_v26 }
 0x2c0   :  { %4645 = vmatmul.mubr.msk.f32.gmra.mxu0 %vm649_vm4, %v5365_v44  ;;  %v1656_v40 = vmax.f32 %v5392_v49, 0.0  ;;  %4692 = vmatprep.mubr.f32.mxu1 %v4977_v26  ;;  %v1747_v12 = vpop.f32.mrf.mxu0  ;;  %v1872_v59 = vpop.f32.mrf.mxu1  ;;  %v1868_v57 = vadd.f32 %v4653_v13, %v4634_v11 }
 0x2c1   :  { %4670 = vmatprep.mubr.msk.f32.mxu0 %vm649_vm4, %v5333_v32  ;;  %v1513_v21 = vmax.f32 %v1503_v15, 0.0  ;;  %v1655_v60 = vmax.f32 %v5384_v19, 0.0  ;;  %v5404_v38 = vadd.f32 %v1636_v51, %v1514_v58  ;;  %4723 = vmatprep.subr.mxu1 %v2328_v53  ;;  %v1863_v45 = vadd.f32 %v1862_v34, %v1747_v12 }
 0x2c2   :  { %4724 = vmatpush3.msra.mxu1 %v2328_v53  ;;  %v4637_v23 = vpop.f32.mrf.mxu0  ;;  %v4659_v3 = vpop.f32.mrf.mxu1 }
 0x2c3   :  { %v5395_v31 = vadd.f32 %v1631_v28, %v1513_v21  ;;  %v1658_v7 = vmax.f32 %v5404_v38, 0.0  ;;  %4693 = vmatmul.mubr.f32.gmra.mxu1 %v4977_v26  ;;  %4725 = vmatprep.subr.mxu1 %v2327_v8  ;;  %v1878_v16 = vadd.f32 %v4656_v39, %v4637_v23 }
 0x2c4   :  { %4671 = vmatmul.mubr.msk.f32.vlgmr.msra.gmra.mxu0 %vm649_vm4, %v5336_v62  ;;  %4726 = vmatpush3.msra.mxu1 %v2327_v8  ;;  %v1757_v27 = vpop.f32.mrf.mxu0  ;;  %v1882_v58 = vpop.f32.mrf.mxu1 }
 0x2c5   :  { %4673 = vmatprep.mubr.msk.f32.mxu0 %vm649_vm4, %v5349_v9  ;;  %v1657_v42 = vmax.f32 %v5395_v31, 0.0  ;;  %4705 = vmatpush3.msra.mxu0 %v2076_v0  ;;  %v1873_v21 = vadd.f32 %v1872_v59, %v1757_v27 }
 0x2c6   :  { %4706 = vmatprep.subr.mxu0 %v2075_v4  ;;  %v4662_v13 = vpop.f32.mrf.mxu1 }
 0x2c7   :  { %4707 = vmatpush3.msra.mxu0 %v2075_v4 }
 0x2c8   :  { %4674 = vmatmul.mubr.msk.f32.gmra.mxu0 %vm649_vm4, %v5353_v25 }
 0x2c9   :  { %4676 = vmatprep.mubr.msk.f32.mxu0 %vm649_vm4, %v5363_v52 }
 0x2cc   :  { %4677 = vmatmul.mubr.msk.f32.gmra.mxu0 %vm649_vm4, %v5365_v44 }
 0x2cd   :  { %4679 = vmatprep.mubr.msk.f32.mxu0 %vm649_vm4, %v1655_v60 }
 0x2d0   :  { %4680 = vmatmul.mubr.msk.f32.gmra.mxu0 %vm649_vm4, %v1656_v40 }
 0x2d1   :  { %4682 = vmatprep.mubr.msk.f32.mxu0 %vm649_vm4, %v1657_v42 }
 0x2d4   :  { %4683 = vmatmul.mubr.msk.f32.gmra.mxu0 %vm649_vm4, %v1658_v7 }
 0x2d5   :  { %4708 = vmatprep.mubr.f32.mxu0 %v4977_v26 }
 0x2d8   :  { %4709 = vmatmul.mubr.f32.vlgmr.msra.gmra.mxu0 %v4977_v26 }
 0x2d9   :  { %4711 = vmatprep.mubr.f32.mxu0 %v4977_v26 }
 0x2dc   :  { %4712 = vmatmul.mubr.f32.gmra.mxu0 %v4977_v26 }
 0x2dd   :  { %4714 = vmatprep.mubr.f32.mxu0 %v4977_v26 }
 0x2e0   :  { %4715 = vmatmul.mubr.f32.gmra.mxu0 %v4977_v26 }
 0x2e1   :  { %4717 = vmatprep.mubr.f32.mxu0 %v4977_v26 }
 0x2e4   :  { %4718 = vmatmul.mubr.f32.gmra.mxu0 %v4977_v26 }
 0x378   :  { %v4640_v30 = vpop.f32.mrf.mxu0 }
 0x379   :  { %v1888_v0 = vadd.f32 %v4659_v3, %v4640_v30 }
 0x37a   :  { %v1767_v43 = vpop.f32.mrf.mxu0 }
 0x37b   :  { %v1883_v11 = vadd.f32 %v1882_v58, %v1767_v43 }
 0x37c   :  { %v4643_v47 = vpop.f32.mrf.mxu0 }
 0x37e   :  { %v1777_v2 = vpop.f32.mrf.mxu0 }
 0x380   :  { %v4646_v55 = vpop.f32.mrf.mxu0 }
 0x382   :  { %v1787_v26 = vpop.f32.mrf.mxu0 }
 0x384   :  { %v4672_v41 = vpop.f32.mrf.mxu0 }
 0x385   :  { %v2041_v48 = vadd.f32 %v4672_v41, %v1868_v57  ;;  %v1892_v41 = vpop.f32.mrf.mxu1 }
 0x386   :  { %v1991_v15 = vpop.f32.mrf.mxu0 }
 0x387   :  { %v2040_v46 = vadd.f32 %v1991_v15, %v1863_v45  ;;  %v2056_v50 = vadd.f32 %v5428_v54, %v2041_v48  ;;  %v4665_v15 = vpop.f32.mrf.mxu1 }
 0x388   :  { %v4675_v18 = vpop.f32.mrf.mxu0 }
 0x389   :  { %v2055_v24 = vadd.f32 %v5428_v54, %v2040_v46  ;;  %v2043_v28 = vadd.f32 %v4675_v18, %v1878_v16  ;;  %v2066_v5 = vmax.f32 %v2056_v50, 0.0  ;;  %v1893_v46 = vadd.f32 %v1892_v41, %v1777_v2  ;;  %v1902_v18 = vpop.f32.mrf.mxu1 }
 0x38a   :  { %v2001_v51 = vpop.f32.mrf.mxu0 }
 0x38b   :  { %v2065_v4 = vmax.f32 %v2055_v24, 0.0  ;;  %v2042_v63 = vadd.f32 %v2001_v51, %v1873_v21  ;;  %v2058_v53 = vadd.f32 %v5428_v54, %v2043_v28  ;;  %v1898_v21 = vadd.f32 %v4662_v13, %v4643_v47 }
 0x38c   :  { %v4678_v8 = vpop.f32.mrf.mxu0  ;;  %v1903_v28 = vadd.f32 %v1902_v18, %v1787_v26 }
 0x38d   :  { %v2057_v12 = vadd.f32 %v5428_v54, %v2042_v63  ;;  %v2045_v23 = vadd.f32 %v4678_v8, %v1888_v0  ;;  %4695 = vmatprep.mubr.msk.f32.mxu1 %vm649_vm4, %v2065_v4  ;;  %4720 = vmatprep.mubr.msk.f32.mxu0 %vm649_vm4, %v2065_v4  ;;  %v2068_v39 = vmax.f32 %v2058_v53, 0.0  ;;  %v1908_v63 = vadd.f32 %v4665_v15, %v4646_v55 }
 0x38e   :  { %v2011_v27 = vpop.f32.mrf.mxu0  ;;  %4696 = vmatmul.mubr.msk.f32.gmra.mxu1 %vm649_vm4, %v2066_v5  ;;  %4721 = vmatmul.mubr.msk.f32.gmra.mxu0 %vm649_vm4, %v2066_v5 }
 0x38f   :  { %v2067_v30 = vmax.f32 %v2057_v12, 0.0  ;;  %v2044_v34 = vadd.f32 %v2011_v27, %v1883_v11  ;;  %v2060_v59 = vadd.f32 %v5428_v54, %v2045_v23  ;;  %v4691_v11 = vpop.f32.mrf.mxu1 }
 0x390   :  { %v4681_v57 = vpop.f32.mrf.mxu0 }
 0x391   :  { %v2059_v43 = vadd.f32 %v5428_v54, %v2044_v34  ;;  %4698 = vmatprep.mubr.msk.f32.mxu1 %vm649_vm4, %v2067_v30  ;;  %v2070_v3 = vmax.f32 %v2060_v59, 0.0  ;;  %v2047_v58 = vadd.f32 %v4681_v57, %v1898_v21  ;;  %v2163_v12 = vpop.f32.mrf.mxu1 }
 0x392   :  { %v2021_v45 = vpop.f32.mrf.mxu0  ;;  %4699 = vmatmul.mubr.msk.f32.gmra.mxu1 %vm649_vm4, %v2068_v39 }
 0x393   :  { %v2069_v48 = vmax.f32 %v2059_v43, 0.0  ;;  %v2046_v50 = vadd.f32 %v2021_v45, %v1893_v46  ;;  %v2062_v2 = vadd.f32 %v5428_v54, %v2047_v58  ;;  %v4694_v13 = vpop.f32.mrf.mxu1 }
 0x394   :  { %v4684_v16 = vpop.f32.mrf.mxu0 }
 0x395   :  { %4701 = vmatprep.mubr.msk.f32.mxu1 %vm649_vm4, %v2069_v48  ;;  %v2061_v51 = vadd.f32 %v5428_v54, %v2046_v50  ;;  %v2072_v26 = vmax.f32 %v2062_v2, 0.0 }
 0x396   :  { %4702 = vmatmul.mubr.msk.f32.gmra.mxu1 %vm649_vm4, %v2070_v3  ;;  %v2031_v24 = vpop.f32.mrf.mxu0 }
 0x397   :  { %4727 = vmatprep.mubr.msk.f32.mxu1 %vm649_vm4, %v2065_v4  ;;  %v2048_v0 = vadd.f32 %v2031_v24, %v1903_v28  ;;  %v2049_v4 = vadd.f32 %v4684_v16, %v1908_v63  ;;  %v2071_v53 = vmax.f32 %v2061_v51, 0.0  ;;  %v5460_v16 = vld [vmem:[#allocation2 + $0x1a0] ss:$0 sm:$0xff] }
 0x398   :  { %v4710_v23 = vpop.f32.mrf.mxu0 }
 0x399   :  { %v2063_v47 = vadd.f32 %v5428_v54, %v2048_v0 }
 0x39a   :  { %4728 = vmatmul.mubr.msk.f32.vlgmr.msra.gmra.mxu1 %vm649_vm4, %v2066_v5  ;;  %v2064_v5 = vadd.f32 %v5428_v54, %v2049_v4  ;;  %v2278_v27 = vpop.f32.mrf.mxu0 }
 0x39b   :  { %4730 = vmatprep.mubr.msk.f32.mxu1 %vm649_vm4, %v2067_v30  ;;  %v2073_v8 = vmax.f32 %v2063_v47, 0.0  ;;  %v2173_v30 = vpop.f32.mrf.mxu1  ;;  %v2279_v46 = vadd.f32 %v2278_v27, %v2163_v12 }
 0x39c   :  { %v2074_v55 = vmax.f32 %v2064_v5, 0.0 }
 0x39e   :  { %4731 = vmatmul.mubr.msk.f32.gmra.mxu1 %vm649_vm4, %v2068_v39  ;;  %v4713_v39 = vpop.f32.mrf.mxu0 }
 0x39f   :  { %4733 = vmatprep.mubr.msk.f32.mxu1 %vm649_vm4, %v2069_v48  ;;  %v2294_v24 = vadd.f32 %v4713_v39, %v4694_v13 }
 0x3a0   :  { %v2288_v43 = vpop.f32.mrf.mxu0 }
 0x3a1   :  { %v2289_v0 = vadd.f32 %v2288_v43, %v2173_v30 }
 0x3a2   :  { %4734 = vmatmul.mubr.msk.f32.gmra.mxu1 %vm649_vm4, %v2070_v3  ;;  %v4716_v45 = vpop.f32.mrf.mxu0  ;;  %v2284_v3 = vadd.f32 %v4710_v23, %v4691_v11 }
 0x3a3   :  { %4736 = vmatprep.mubr.msk.f32.mxu1 %vm649_vm4, %v2071_v53 }
 0x3a4   :  { %v2298_v50 = vpop.f32.mrf.mxu0 }
 0x3a6   :  { %4737 = vmatmul.mubr.msk.f32.gmra.mxu1 %vm649_vm4, %v2072_v26  ;;  %v4719_v63 = vpop.f32.mrf.mxu0 }
 0x3a7   :  { %4739 = vmatprep.mubr.msk.f32.mxu1 %vm649_vm4, %v2073_v8 }
 0x3a8   :  { %v2308_v13 = vpop.f32.mrf.mxu0 }
 0x3aa   :  { %4740 = vmatmul.mubr.msk.f32.gmra.mxu1 %vm649_vm4, %v2074_v55 }
 0x44e   :  { %v4697_v34 = vpop.f32.mrf.mxu1 }
 0x44f   :  { %v2304_v11 = vadd.f32 %v4716_v45, %v4697_v34  ;;  %v4722_v45 = vpop.f32.mrf.mxu0 }
 0x450   :  { %v2183_v59 = vpop.f32.mrf.mxu1 }
 0x451   :  { %v2299_v12 = vadd.f32 %v2298_v50, %v2183_v59 }
 0x452   :  { %v4700_v57 = vpop.f32.mrf.mxu1 }
 0x454   :  { %v2193_v54 = vpop.f32.mrf.mxu1 }
 0x456   :  { %v4703_v41 = vpop.f32.mrf.mxu1 }
 0x458   :  { %v5458_v48 = vpop.f32.mrf.mxu1 }
 0x45a   :  { %v4729_v15 = vpop.f32.mrf.mxu1 }
 0x45b   :  { %v2457_v18 = vadd.f32 %v4729_v15, %v2284_v3  ;;  %v2314_v3 = vadd.f32 %v4719_v63, %v4700_v57  ;;  %v2324_v57 = vadd.f32 %v4722_v45, %v4703_v41 }
 0x45c   :  { %v2407_v21 = vpop.f32.mrf.mxu1 }
 0x45d   :  { %v2472_v28 = vadd.f32 %v5460_v16, %v2457_v18  ;;  %v2456_v58 = vadd.f32 %v2407_v21, %v2279_v46 }
 0x45e   :  { %v4732_v51 = vpop.f32.mrf.mxu1 }
 0x45f   :  { %v2482_v2 = vmax.f32 %v2472_v28, 0.0  ;;  %v2471_v4 = vadd.f32 %v5460_v16, %v2456_v58  ;;  %v2459_v53 = vadd.f32 %v4732_v51, %v2294_v24 }
 0x460   :  { %v2417_v47 = vpop.f32.mrf.mxu1 }
 0x461   :  { %v2492_v26 = vadd.f32 %v2482_v2, %v5336_v62  ;;  %v2481_v5 = vmax.f32 %v2471_v4, 0.0  ;;  %v2474_v8 = vadd.f32 %v5460_v16, %v2459_v53  ;;  %v2458_v55 = vadd.f32 %v2417_v47, %v2289_v0  ;;  %v2318_v47 = vpop.f32.mrf.mxu0 }
 0x462   :  { %v4735_v23 = vpop.f32.mrf.mxu1 }
 0x463   :  { %v2502_v27 = vmax.f32 %v2492_v26, 0.0  ;;  %v2491_v39 = vadd.f32 %v2481_v5, %v5333_v32  ;;  %v2484_v30 = vmax.f32 %v2474_v8, 0.0  ;;  %v2473_v43 = vadd.f32 %v5460_v16, %v2458_v55 }
 0x464   :  { %v2461_v15 = vadd.f32 %v4735_v23, %v2304_v11  ;;  %v2427_v46 = vpop.f32.mrf.mxu1  ;;  %v2309_v32 = vadd.f32 %v2308_v13, %v2193_v54 }
 0x465   :  { %v2501_v18 = vmax.f32 %v2491_v39, 0.0  ;;  %v2494_v62 = vadd.f32 %v2484_v30, %v5353_v25  ;;  %v2483_v21 = vmax.f32 %v2473_v43, 0.0  ;;  %v2460_v24 = vadd.f32 %v2427_v46, %v2299_v12  ;;  %4742 = vmatprep.subr.msk.mxu0 %vm649_vm4, %v2502_v27 }
 0x466   :  { %v2476_v34 = vadd.f32 %v5460_v16, %v2461_v15  ;;  %v4738_v59 = vpop.f32.mrf.mxu1  ;;  %4743 = vmatpush3.xpose.msk.msra.mxu0 %vm649_vm4, %v2502_v27 }
 0x467   :  { %v2475_v50 = vadd.f32 %v5460_v16, %v2460_v24  ;;  %v2463_v28 = vadd.f32 %v4738_v59, %v2314_v3  ;;  %4744 = vmatprep.subr.msk.mxu0 %vm649_vm4, %v2501_v18  ;;  %4746 = vmatprep.mubr.msk.f32.mxu0 %vm649_vm4, %v2501_v18  ;;  %v2493_v25 = vadd.f32 %v2483_v21, %v5349_v9  ;;  %v2504_v0 = vmax.f32 %v2494_v62, 0.0 }
 0x468   :  { %v2486_v58 = vmax.f32 %v2476_v34, 0.0  ;;  %v2437_v51 = vpop.f32.mrf.mxu1  ;;  %v2319_v9 = vadd.f32 %v2318_v47, %v5458_v48 }
 0x469   :  { %v2485_v63 = vmax.f32 %v2475_v50, 0.0  ;;  %v2478_v2 = vadd.f32 %v5460_v16, %v2463_v28  ;;  %v2462_v4 = vadd.f32 %v2437_v51, %v2309_v32  ;;  %v2503_v55 = vmax.f32 %v2493_v25, 0.0 }
 0x46a   :  { %v2496_v53 = vadd.f32 %v2486_v58, %v5365_v44  ;;  %v4741_v54 = vpop.f32.mrf.mxu1  ;;  %4745 = vmatpush3.xpose.msk.msra.mxu0 %vm649_vm4, %v2501_v18 }
 0x46b   :  { %v2495_v26 = vadd.f32 %v2485_v63, %v5363_v52  ;;  %v2488_v5 = vmax.f32 %v2478_v2, 0.0  ;;  %v2477_v41 = vadd.f32 %v5460_v16, %v2462_v4  ;;  %v2465_v8 = vadd.f32 %v4741_v54, %v2324_v57  ;;  %4749 = vmatprep.subr.msk.mxu0 %vm649_vm4, %v2504_v0 }
 0x46c   :  { %v2506_v11 = vmax.f32 %v2496_v53, 0.0  ;;  %v2447_v12 = vpop.f32.mrf.mxu1 }
 0x46d   :  { %v2505_v23 = vmax.f32 %v2495_v26, 0.0  ;;  %v2498_v44 = vadd.f32 %v2488_v5, %v1656_v40  ;;  %v2487_v13 = vmax.f32 %v2477_v41, 0.0  ;;  %v2480_v39 = vadd.f32 %v5460_v16, %v2465_v8  ;;  %4747 = vmatmul.mubr.msk.f32.vlgmr.msra.gmra.mxu0 %vm649_vm4, %v2502_v27 }
 0x46e   :  { %v2464_v52 = vadd.f32 %v2447_v12, %v2319_v9  ;;  %4756 = vmatprep.subr.msk.mxu1 %vm649_vm4, %v2506_v11  ;;  %4750 = vmatpush3.xpose.msk.msra.mxu0 %vm649_vm4, %v2504_v0 }
 0x46f   :  { %v2490_v30 = vmax.f32 %v2480_v39, 0.0  ;;  %4753 = vmatprep.mubr.msk.f32.mxu0 %vm649_vm4, %v2503_v55  ;;  %4757 = vmatpush3.xpose.msk.msra.mxu1 %vm649_vm4, %v2506_v11  ;;  %v2508_v49 = vmax.f32 %v2498_v44, 0.0  ;;  %v2497_v40 = vadd.f32 %v2487_v13, %v1655_v60  ;;  %v655_v60 = vpop.xlane.xlu0 %654 }
 0x470   :  { %v2479_v48 = vadd.f32 %v5460_v16, %v2464_v52  ;;  %4751 = vmatprep.subr.msk.mxu0 %vm649_vm4, %v2503_v55  ;;  %4758 = vmatprep.subr.msk.mxu1 %vm649_vm4, %v2505_v23  ;;  %v657_v45 = vsub.f32 %v648_v35, %v655_v60 }
 0x471   :  { %v2500_v27 = vadd.f32 %v2490_v30, %v1658_v7  ;;  %4760 = vmatprep.mubr.msk.f32.mxu1 %vm649_vm4, %v2505_v23  ;;  %v2507_v15 = vmax.f32 %v2497_v40, 0.0 }
 0x472   :  { %v2489_v43 = vmax.f32 %v2479_v48, 0.0  ;;  %4752 = vmatpush3.xpose.msk.msra.mxu0 %vm649_vm4, %v2503_v55 }
 0x473   :  { %v2510_v3 = vmax.f32 %v2500_v27, 0.0  ;;  %4759 = vmatpush3.xpose.msk.msra.mxu1 %vm649_vm4, %v2505_v23  ;;  %4763 = vmatprep.subr.msk.mxu0 %vm649_vm4, %v2508_v49  ;;  %v652_v38 = vpop.xlane.xlu0 %651 }
 0x474   :  { %v2499_v16 = vadd.f32 %v2489_v43, %v1657_v42  ;;  %v656_v46 = vsub.f32 %v647_v37, %v652_v38  ;;  %v660_v37 = vmul.f32 1.442695, %v657_v45 }
 0x475   :  { %4754 = vmatmul.mubr.msk.f32.vlgmr.msra.gmra.mxu0 %vm649_vm4, %v2504_v0  ;;  %4770 = vmatprep.subr.msk.mxu1 %vm649_vm4, %v2510_v3 }
 0x476   :  { %v2509_v19 = vmax.f32 %v2499_v16, 0.0  ;;  %4761 = vmatmul.mubr.msk.f32.vlgmr.msra.gmra.mxu1 %vm649_vm4, %v2506_v11  ;;  %4764 = vmatpush3.xpose.msk.msra.mxu0 %vm649_vm4, %v2508_v49  ;;  %v658_v21 = vmul.f32 1.442695, %v656_v46 }
 0x477   :  { %4767 = vmatprep.mubr.msk.f32.mxu0 %vm649_vm4, %v2507_v15  ;;  %4771 = vmatpush3.xpose.msk.msra.mxu1 %vm649_vm4, %v2510_v3 }
 0x478   :  { %4765 = vmatprep.subr.msk.mxu0 %vm649_vm4, %v2507_v15  ;;  %4772 = vmatprep.subr.msk.mxu1 %vm649_vm4, %v2509_v19  ;;  %4848 = vpow2.f32 %v658_v21 }
 0x479   :  { %4774 = vmatprep.mubr.msk.f32.mxu1 %vm649_vm4, %v2509_v19  ;;  %4850 = vpow2.f32 %v660_v37 }
 0x47a   :  { %4766 = vmatpush3.xpose.msk.msra.mxu0 %vm649_vm4, %v2507_v15 }
 0x47b   :  { %4773 = vmatpush3.xpose.msk.msra.mxu1 %vm649_vm4, %v2509_v19 }
 0x47d   :  { %4768 = vmatmul.mubr.msk.f32.vlgmr.msra.gmra.mxu0 %vm649_vm4, %v2508_v49 }
 0x47e   :  { %4775 = vmatmul.mubr.msk.f32.vlgmr.msra.gmra.mxu1 %vm649_vm4, %v2510_v3 }
 0x485   :  { %v5537_v41 = vpop.eup %4848 }
 0x486   :  { %v662_v55 = vsel %vm649_vm4, %v5537_v41, 0.0  ;;  %v5544_v12 = vpop.eup %4850 }
 0x487   :  { %v665_v23 = vsel %vm649_vm4, %v5544_v12, 0.0 }
 0x52d   :  { %v5517_v31 = vpop.f32.mrf.mxu0 }
 0x52e   :  { %v2917_v25 = vmax.f32 %v5517_v31, 0.0 }
 0x52f   :  { %v2583_v42 = vpop.f32.mrf.mxu0 }
 0x530   :  { %v2916_v7 = vmax.f32 %v2583_v42, 0.0  ;;  %v2929_v4 = vsel %vm649_vm4, %v2917_v25, -inf }
 0x532   :  { %v2926_v18 = vsel %vm649_vm4, %v2916_v7, -inf }
 0x533   :  { %2927 = vmax.xlane.f32.xlu0 %v2926_v18 }
 0x535   :  { %v4755_v62 = vpop.f32.mrf.mxu0 }
 0x536   :  { %v2919_v24 = vmax.f32 %v4755_v62, 0.0  ;;  %v5522_v34 = vpop.f32.mrf.mxu1 }
 0x537   :  { %v2664_v59 = vpop.f32.mrf.mxu0  ;;  %v2921_v35 = vmax.f32 %v5522_v34, 0.0 }
 0x538   :  { %v2918_v32 = vmax.f32 %v2664_v59, 0.0  ;;  %v2745_v50 = vpop.f32.mrf.mxu1  ;;  %v2935_v28 = vsel %vm649_vm4, %v2919_v24, -inf }
 0x539   :  { %v2920_v57 = vmax.f32 %v2745_v50, 0.0  ;;  %2936 = vmax.xlane.f32.xlu1 %v2935_v28  ;;  %v2941_v26 = vsel %vm649_vm4, %v2921_v35, -inf }
 0x53a   :  { %v2932_v58 = vsel %vm649_vm4, %v2918_v32, -inf }
 0x53b   :  { %v2938_v36 = vsel %vm649_vm4, %v2920_v57, -inf }
 0x53c   :  { %2939 = vmax.xlane.f32.xlu0 %v2938_v36 }
 0x53d   :  { %2933 = vmax.xlane.f32.xlu1 %v2932_v58  ;;  %v4769_v51 = vpop.f32.mrf.mxu0 }
 0x53e   :  { %v5530_v0 = vpop.f32.mrf.mxu1  ;;  %v2923_v47 = vmax.f32 %v4769_v51, 0.0 }
 0x53f   :  { %v2826_v20 = vpop.f32.mrf.mxu0  ;;  %v2925_v8 = vmax.f32 %v5530_v0, 0.0 }
 0x540   :  { %v2922_v63 = vmax.f32 %v2826_v20, 0.0  ;;  %v2907_v2 = vpop.f32.mrf.mxu1  ;;  %v2947_v9 = vsel %vm649_vm4, %v2923_v47, -inf }
 0x541   :  { %2930 = vmax.xlane.f32.xlu1 %v2929_v4  ;;  %v2924_v53 = vmax.f32 %v2907_v2, 0.0  ;;  %v2953_v11 = vsel %vm649_vm4, %v2925_v8, -inf }
 0x542   :  { %v2944_v54 = vsel %vm649_vm4, %v2922_v63, -inf }
 0x543   :  { %2945 = vmax.xlane.f32.xlu0 %v2944_v54  ;;  %v2950_v5 = vsel %vm649_vm4, %v2924_v53, -inf }
 0x545   :  { %2942 = vmax.xlane.f32.xlu1 %v2941_v26 }
 0x547   :  { %2951 = vmax.xlane.f32.xlu0 %v2950_v5 }
 0x549   :  { %2948 = vmax.xlane.f32.xlu1 %v2947_v9 }
 0x54b   :  { %663 = vadd.xlane.f32.xlu0 %v662_v55 }
 0x54d   :  { %2954 = vmax.xlane.f32.xlu1 %v2953_v11 }
 0x551   :  { %666 = vadd.xlane.f32.xlu1 %v665_v23 }
 0x5bc   :  { %v2928_v44 = vpop.xlane.xlu0 %2927 }
 0x5bd   :  { %v2956_v52 = vsub.f32 %v2916_v7, %v2928_v44 }
 0x5bf   :  { %v2966_v27 = vmul.f32 1.442695, %v2956_v52 }
 0x5c2   :  { %v2937_v13 = vpop.xlane.xlu1 %2936 }
 0x5c3   :  { %v2959_v39 = vsub.f32 %v2919_v24, %v2937_v13 }
 0x5c5   :  { %v2972_v30 = vmul.f32 1.442695, %v2959_v39  ;;  %v2940_v48 = vpop.xlane.xlu0 %2939 }
 0x5c6   :  { %v2934_v49 = vpop.xlane.xlu1 %2933  ;;  %v2960_v43 = vsub.f32 %v2920_v57, %v2940_v48 }
 0x5c7   :  { %4852 = vpow2.f32 %v2972_v30  ;;  %v2958_v40 = vsub.f32 %v2918_v32, %v2934_v49 }
 0x5c8   :  { %v2974_v60 = vmul.f32 1.442695, %v2960_v43 }
 0x5c9   :  { %v2970_v3 = vmul.f32 1.442695, %v2958_v40 }
 0x5ca   :  { %v2931_v16 = vpop.xlane.xlu1 %2930 }
 0x5cb   :  { %4854 = vpow2.f32 %v2970_v3  ;;  %v2957_v15 = vsub.f32 %v2917_v25, %v2931_v16 }
 0x5cc   :  { %v2946_v19 = vpop.xlane.xlu0 %2945  ;;  %4856 = vpow2.f32 %v2966_v27 }
 0x5cd   :  { %v2968_v31 = vmul.f32 1.442695, %v2957_v15  ;;  %v2962_v38 = vsub.f32 %v2922_v63, %v2946_v19 }
 0x5ce   :  { %v2943_v42 = vpop.xlane.xlu1 %2942 }
 0x5cf   :  { %4858 = vpow2.f32 %v2968_v31  ;;  %v2961_v46 = vsub.f32 %v2921_v35, %v2943_v42  ;;  %v2978_v18 = vmul.f32 1.442695, %v2962_v38 }
 0x5d0   :  { %v2952_v7 = vpop.xlane.xlu0 %2951  ;;  %4860 = vpow2.f32 %v2974_v60 }
 0x5d1   :  { %v2976_v62 = vmul.f32 1.442695, %v2961_v46  ;;  %v2964_v21 = vsub.f32 %v2924_v53, %v2952_v7 }
 0x5d2   :  { %v2949_v24 = vpop.xlane.xlu1 %2948 }
 0x5d3   :  { %4862 = vpow2.f32 %v2976_v62  ;;  %v2963_v34 = vsub.f32 %v2923_v47, %v2949_v24  ;;  %v2982_v45 = vmul.f32 1.442695, %v2964_v21 }
 0x5d4   :  { %v4853_v59 = vpop.eup %4852  ;;  %4864 = vpow2.f32 %v2978_v18  ;;  %v664_v23 = vpop.xlane.xlu0 %663 }
 0x5d5   :  { %v2980_v32 = vmul.f32 1.442695, %v2963_v34  ;;  %v2995_v50 = vsel %vm649_vm4, %v4853_v59, 0.0 }
 0x5d6   :  { %2996 = vadd.xlane.f32.xlu1 %v2995_v50  ;;  %v2955_v28 = vpop.xlane.xlu1 %2954 }
 0x5d7   :  { %4866 = vpow2.f32 %v2980_v32  ;;  %v2965_v57 = vsub.f32 %v2925_v8, %v2955_v28 }
 0x5d8   :  { %v4855_v36 = vpop.eup %4854  ;;  %4868 = vpow2.f32 %v2982_v45 }
 0x5d9   :  { %v2984_v37 = vmul.f32 1.442695, %v2965_v57  ;;  %v2992_v25 = vsel %vm649_vm4, %v4855_v36, 0.0  ;;  %v5550_v58 = vpop.eup %4856 }
 0x5da   :  { %2993 = vadd.xlane.f32.xlu0 %v2992_v25  ;;  %v2986_v20 = vsel %vm649_vm4, %v5550_v58, 0.0  ;;  %v667_v11 = vpop.xlane.xlu1 %666 }
 0x5db   :  { %4870 = vpow2.f32 %v2984_v37 }
 0x5dc   :  { %v5552_v51 = vpop.eup %4858  ;;  %4872 = vrcp.f32 %v667_v11 }
 0x5dd   :  { %v2989_v0 = vsel %vm649_vm4, %v5552_v51, 0.0  ;;  %v5558_v35 = vpop.eup %4860 }
 0x5de   :  { %2990 = vadd.xlane.f32.xlu1 %v2989_v0  ;;  %2987 = vadd.xlane.f32.xlu0 %v2986_v20  ;;  %v2998_v4 = vsel %vm649_vm4, %v5558_v35, 0.0 }
 0x5e0   :  { %v5560_v63 = vpop.eup %4862 }
 0x5e1   :  { %v3001_v2 = vsel %vm649_vm4, %v5560_v63, 0.0  ;;  %v5566_v53 = vpop.eup %4864 }
 0x5e2   :  { %3002 = vadd.xlane.f32.xlu1 %v3001_v2  ;;  %2999 = vadd.xlane.f32.xlu0 %v2998_v4  ;;  %v3004_v26 = vsel %vm649_vm4, %v5566_v53, 0.0 }
 0x5e4   :  { %v5568_v54 = vpop.eup %4866 }
 0x5e5   :  { %v3007_v47 = vsel %vm649_vm4, %v5568_v54, 0.0  ;;  %v5574_v5 = vpop.eup %4868 }
 0x5e6   :  { %3008 = vadd.xlane.f32.xlu1 %v3007_v47  ;;  %3005 = vadd.xlane.f32.xlu0 %v3004_v26  ;;  %v3010_v55 = vsel %vm649_vm4, %v5574_v5, 0.0 }
 0x5e8   :  { %v5576_v8 = vpop.eup %4870 }
 0x5e9   :  { %v3013_v9 = vsel %vm649_vm4, %v5576_v8, 0.0  ;;  %v4873_v30 = vpop.eup %4872 }
 0x5ea   :  { %3014 = vadd.xlane.f32.xlu1 %v3013_v9  ;;  %3011 = vadd.xlane.f32.xlu0 %v3010_v55  ;;  %v671_v27 = vmul.f32 %v4873_v30, %v5544_v12 }
 0x65f   :  { %v2997_v44 = vpop.xlane.xlu1 %2996 }
 0x660   :  { %4874 = vrcp.f32 %v2997_v44 }
 0x661   :  { %4876 = vrcp.f32 %v664_v23 }
 0x663   :  { %v2994_v13 = vpop.xlane.xlu0 %2993 }
 0x664   :  { %4878 = vrcp.f32 %v2994_v13 }
 0x667   :  { %v2991_v39 = vpop.xlane.xlu1 %2990  ;;  %v2988_v52 = vpop.xlane.xlu0 %2987 }
 0x668   :  { %4880 = vrcp.f32 %v2991_v39 }
 0x669   :  { %4882 = vrcp.f32 %v2988_v52 }
 0x66b   :  { %v3003_v48 = vpop.xlane.xlu1 %3002  ;;  %v3000_v49 = vpop.xlane.xlu0 %2999 }
 0x66c   :  { %4884 = vrcp.f32 %v3003_v48 }
 0x66d   :  { %v4875_v40 = vpop.eup %4874  ;;  %4886 = vrcp.f32 %v3000_v49 }
 0x66e   :  { %v3029_v43 = vmul.f32 %v4875_v40, %v4853_v59  ;;  %v4877_v3 = vpop.eup %4876 }
 0x66f   :  { %v3009_v16 = vpop.xlane.xlu1 %3008  ;;  %v3006_v15 = vpop.xlane.xlu0 %3005  ;;  %v670_v31 = vmul.f32 %v4877_v3, %v5537_v41 }
 0x670   :  { %4888 = vrcp.f32 %v3009_v16  ;;  %v5583_v19 = vadd.f32 %v3029_v43, %v671_v27 }
 0x671   :  { %v4879_v60 = vpop.eup %4878  ;;  %4890 = vrcp.f32 %v3006_v15 }
 0x672   :  { %v3049_v38 = vmax.f32 %v5583_v19, 0.0  ;;  %v3028_v42 = vmul.f32 %v4879_v60, %v4855_v36 }
 0x673   :  { %v3015_v46 = vpop.xlane.xlu1 %3014  ;;  %v3012_v7 = vpop.xlane.xlu0 %3011 }
 0x674   :  { %4892 = vrcp.f32 %v3015_v46  ;;  %v3065_v18 = vsel %vm649_vm4, %v3049_v38, -inf  ;;  %v3038_v12 = vadd.f32 %v3028_v42, %v670_v31 }
 0x675   :  { %v4881_v62 = vpop.eup %4880  ;;  %4894 = vrcp.f32 %v3012_v7  ;;  %3066 = vmax.xlane.f32.xlu1 %v3065_v18 }
 0x676   :  { %v4883_v21 = vpop.eup %4882  ;;  %v3048_v24 = vmax.f32 %v3038_v12, 0.0  ;;  %v3027_v34 = vmul.f32 %v4881_v62, %v5552_v51 }
 0x677   :  { %v3026_v59 = vmul.f32 %v4883_v21, %v5550_v58 }
 0x678   :  { %v3062_v41 = vsel %vm649_vm4, %v3048_v24, -inf  ;;  %v3037_v45 = vadd.f32 %v3027_v34, %v671_v27 }
 0x679   :  { %v4885_v32 = vpop.eup %4884  ;;  %3063 = vmax.xlane.f32.xlu0 %v3062_v41  ;;  %v3036_v50 = vadd.f32 %v3026_v59, %v670_v31 }
 0x67a   :  { %v4887_v28 = vpop.eup %4886  ;;  %v3047_v57 = vmax.f32 %v3037_v45, 0.0  ;;  %v3031_v36 = vmul.f32 %v4885_v32, %v5560_v63 }
 0x67b   :  { %v3046_v37 = vmax.f32 %v3036_v50, 0.0  ;;  %v3030_v25 = vmul.f32 %v4887_v28, %v5558_v35 }
 0x67c   :  { %v3059_v0 = vsel %vm649_vm4, %v3047_v57, -inf  ;;  %v3041_v20 = vadd.f32 %v3031_v36, %v671_v27 }
 0x67d   :  { %v4889_v2 = vpop.eup %4888  ;;  %3060 = vmax.xlane.f32.xlu1 %v3059_v0  ;;  %v3056_v58 = vsel %vm649_vm4, %v3046_v37, -inf  ;;  %v3040_v51 = vadd.f32 %v3030_v25, %v670_v31 }
 0x67e   :  { %v4891_v4 = vpop.eup %4890  ;;  %3057 = vmax.xlane.f32.xlu0 %v3056_v58  ;;  %v3051_v47 = vmax.f32 %v3041_v20, 0.0  ;;  %v3033_v26 = vmul.f32 %v4889_v2, %v5568_v54 }
 0x67f   :  { %v3050_v9 = vmax.f32 %v3040_v51, 0.0  ;;  %v3032_v55 = vmul.f32 %v4891_v4, %v5566_v53 }
 0x680   :  { %v3071_v63 = vsel %vm649_vm4, %v3051_v47, -inf  ;;  %v3043_v11 = vadd.f32 %v3033_v26, %v671_v27 }
 0x681   :  { %v4893_v35 = vpop.eup %4892  ;;  %3072 = vmax.xlane.f32.xlu1 %v3071_v63  ;;  %v3068_v23 = vsel %vm649_vm4, %v3050_v9, -inf  ;;  %v3042_v44 = vadd.f32 %v3032_v55, %v670_v31 }
 0x682   :  { %v4895_v13 = vpop.eup %4894  ;;  %3069 = vmax.xlane.f32.xlu0 %v3068_v23  ;;  %v3053_v39 = vmax.f32 %v3043_v11, 0.0  ;;  %v3035_v52 = vmul.f32 %v4893_v35, %v5576_v8 }
 0x683   :  { %v3052_v30 = vmax.f32 %v3042_v44, 0.0  ;;  %v3034_v48 = vmul.f32 %v4895_v13, %v5574_v5 }
 0x684   :  { %v3077_v54 = vsel %vm649_vm4, %v3053_v39, -inf  ;;  %v3045_v49 = vadd.f32 %v3035_v52, %v671_v27 }
 0x685   :  { %3078 = vmax.xlane.f32.xlu1 %v3077_v54  ;;  %v3074_v53 = vsel %vm649_vm4, %v3052_v30, -inf  ;;  %v3044_v40 = vadd.f32 %v3034_v48, %v670_v31 }
 0x686   :  { %3075 = vmax.xlane.f32.xlu0 %v3074_v53  ;;  %v3055_v43 = vmax.f32 %v3045_v49, 0.0 }
 0x687   :  { %v3054_v3 = vmax.f32 %v3044_v40, 0.0 }
 0x688   :  { %v3083_v16 = vsel %vm649_vm4, %v3055_v43, -inf }
 0x689   :  { %3084 = vmax.xlane.f32.xlu1 %v3083_v16  ;;  %v3080_v15 = vsel %vm649_vm4, %v3054_v3, -inf }
 0x68a   :  { %3081 = vmax.xlane.f32.xlu0 %v3080_v15 }
 0x6fe   :  { %v3067_v8 = vpop.xlane.xlu1 %3066 }
 0x6ff   :  { %v3089_v19 = vsub.f32 %v3049_v38, %v3067_v8 }
 0x701   :  { %v3102_v60 = vmul.f32 1.442695, %v3089_v19 }
 0x702   :  { %v3064_v5 = vpop.xlane.xlu0 %3063 }
 0x703   :  { %4896 = vpow2.f32 %v3102_v60  ;;  %v3088_v42 = vsub.f32 %v3048_v24, %v3064_v5 }
 0x705   :  { %v3100_v27 = vmul.f32 1.442695, %v3088_v42 }
 0x706   :  { %v3061_v46 = vpop.xlane.xlu1 %3060 }
 0x707   :  { %4898 = vpow2.f32 %v3100_v27  ;;  %v3087_v7 = vsub.f32 %v3047_v57, %v3061_v46  ;;  %v3058_v31 = vpop.xlane.xlu0 %3057 }
 0x708   :  { %v3086_v18 = vsub.f32 %v3046_v37, %v3058_v31 }
 0x709   :  { %v3098_v12 = vmul.f32 1.442695, %v3087_v7 }
 0x70a   :  { %v3096_v62 = vmul.f32 1.442695, %v3086_v18  ;;  %v3073_v21 = vpop.xlane.xlu1 %3072 }
 0x70b   :  { %4900 = vpow2.f32 %v3098_v12  ;;  %v3091_v34 = vsub.f32 %v3051_v47, %v3073_v21  ;;  %v3070_v59 = vpop.xlane.xlu0 %3069 }
 0x70c   :  { %4902 = vpow2.f32 %v3096_v62  ;;  %v3090_v41 = vsub.f32 %v3050_v9, %v3070_v59 }
 0x70d   :  { %v3106_v45 = vmul.f32 1.442695, %v3091_v34 }
 0x70e   :  { %v3104_v38 = vmul.f32 1.442695, %v3090_v41  ;;  %v3079_v32 = vpop.xlane.xlu1 %3078 }
 0x70f   :  { %4904 = vpow2.f32 %v3106_v45  ;;  %v3093_v50 = vsub.f32 %v3053_v39, %v3079_v32  ;;  %v3076_v24 = vpop.xlane.xlu0 %3075  ;;  %v3263_v45 = vld [vmem:[#allocation2 + $0x1e0] sm:$0xff] }
 0x710   :  { %v4897_v28 = vpop.eup %4896  ;;  %4906 = vpow2.f32 %v3104_v38  ;;  %v3092_v36 = vsub.f32 %v3052_v30, %v3076_v24  ;;  %4777 = vmatprep.subr.mxu0 %v3263_v45 }
 0x711   :  { %v3110_v57 = vmul.f32 1.442695, %v3093_v50  ;;  %v3125_v37 = vsel %vm649_vm4, %v4897_v28, 0.0  ;;  %4778 = vmatpush3.msra.mxu0 %v3263_v45 }
 0x712   :  { %v3108_v25 = vmul.f32 1.442695, %v3092_v36  ;;  %3126 = vadd.xlane.f32.xlu1 %v3125_v37  ;;  %v3085_v0 = vpop.xlane.xlu1 %3084 }
 0x713   :  { %4908 = vpow2.f32 %v3110_v57  ;;  %v3095_v20 = vsub.f32 %v3055_v43, %v3085_v0  ;;  %v3082_v2 = vpop.xlane.xlu0 %3081 }
 0x714   :  { %v4899_v58 = vpop.eup %4898  ;;  %4910 = vpow2.f32 %v3108_v25  ;;  %v3094_v51 = vsub.f32 %v3054_v3, %v3082_v2  ;;  %v3262_v2 = vld [vmem:[#allocation2 + $0x1d8] sm:$0xff] }
 0x715   :  { %v3114_v4 = vmul.f32 1.442695, %v3095_v20  ;;  %v3122_v47 = vsel %vm649_vm4, %v4899_v58, 0.0  ;;  %4779 = vmatprep.subr.mxu0 %v3262_v2 }
 0x716   :  { %v3112_v26 = vmul.f32 1.442695, %v3094_v51  ;;  %3123 = vadd.xlane.f32.xlu0 %v3122_v47  ;;  %v3259_v51 = vld [vmem:[#allocation2 + $0x1c0] sm:$0xff]  ;;  %4780 = vmatpush3.msra.mxu0 %v3262_v2 }
 0x717   :  { %4912 = vpow2.f32 %v3114_v4  ;;  %4788 = vmatprep.subr.mxu1 %v3259_v51  ;;  %v5655_v2 = vld [vmem:[%s5838_s1] sm:$0xff] }
 0x718   :  { %v4901_v9 = vpop.eup %4900  ;;  %4914 = vpow2.f32 %v3112_v26  ;;  %4789 = vmatpush3.msra.mxu1 %v3259_v51 }
 0x719   :  { %v4903_v55 = vpop.eup %4902  ;;  %v3119_v63 = vsel %vm649_vm4, %v4901_v9, 0.0 }
 0x71a   :  { %3120 = vadd.xlane.f32.xlu1 %v3119_v63  ;;  %v3116_v11 = vsel %vm649_vm4, %v4903_v55, 0.0 }
 0x71b   :  { %3117 = vadd.xlane.f32.xlu0 %v3116_v11 }
 0x71c   :  { %v4905_v35 = vpop.eup %4904 }
 0x71d   :  { %v4907_v23 = vpop.eup %4906  ;;  %v3131_v44 = vsel %vm649_vm4, %v4905_v35, 0.0 }
 0x71e   :  { %3132 = vadd.xlane.f32.xlu1 %v3131_v44  ;;  %v3128_v13 = vsel %vm649_vm4, %v4907_v23, 0.0 }
 0x71f   :  { %3129 = vadd.xlane.f32.xlu0 %v3128_v13 }
 0x720   :  { %v5611_v39 = vpop.eup %4908 }
 0x721   :  { %v5613_v52 = vpop.eup %4910  ;;  %v3137_v30 = vsel %vm649_vm4, %v5611_v39, 0.0 }
 0x722   :  { %3138 = vadd.xlane.f32.xlu1 %v3137_v30  ;;  %v3134_v48 = vsel %vm649_vm4, %v5613_v52, 0.0  ;;  %v3260_v30 = vld [vmem:[#allocation2 + $0x1c8] sm:$0xff] }
 0x723   :  { %3135 = vadd.xlane.f32.xlu0 %v3134_v48  ;;  %v3258_v48 = vld [vmem:[#allocation2 + $0x1b8] sm:$0xff] }
 0x724   :  { %v5619_v54 = vpop.eup %4912  ;;  %4790 = vmatprep.subr.mxu1 %v3258_v48 }
 0x725   :  { %v5621_v49 = vpop.eup %4914  ;;  %v3143_v53 = vsel %vm649_vm4, %v5619_v54, 0.0  ;;  %4791 = vmatpush3.msra.mxu1 %v3258_v48 }
 0x726   :  { %3144 = vadd.xlane.f32.xlu1 %v3143_v53  ;;  %v3140_v40 = vsel %vm649_vm4, %v5621_v49, 0.0 }
 0x727   :  { %3141 = vadd.xlane.f32.xlu0 %v3140_v40 }
 0x79b   :  { %v3127_v43 = vpop.xlane.xlu1 %3126 }
 0x79c   :  { %4916 = vrcp.f32 %v3127_v43 }
 0x79f   :  { %v3124_v3 = vpop.xlane.xlu0 %3123 }
 0x7a0   :  { %4918 = vrcp.f32 %v3124_v3 }
 0x7a3   :  { %v3121_v16 = vpop.xlane.xlu1 %3120 }
 0x7a4   :  { %4920 = vrcp.f32 %v3121_v16  ;;  %v3118_v15 = vpop.xlane.xlu0 %3117 }
 0x7a5   :  { %4922 = vrcp.f32 %v3118_v15 }
 0x7a7   :  { %v3133_v8 = vpop.xlane.xlu1 %3132 }
 0x7a8   :  { %4924 = vrcp.f32 %v3133_v8  ;;  %v3130_v19 = vpop.xlane.xlu0 %3129  ;;  %v5637_v8 = vld [vmem:[#allocation2 + $0x200] sm:$0xff] }
 0x7a9   :  { %v4917_v60 = vpop.eup %4916  ;;  %4926 = vrcp.f32 %v3130_v19 }
 0x7aa   :  { %v3159_v27 = vmul.f32 %v4917_v60, %v4897_v28 }
 0x7ab   :  { %v3139_v5 = vpop.xlane.xlu1 %3138 }
 0x7ac   :  { %4928 = vrcp.f32 %v3139_v5  ;;  %v3136_v42 = vpop.xlane.xlu0 %3135  ;;  %v3176_v62 = vsel %vm649_vm4, %v3159_v27, 0.0 }
 0x7ad   :  { %v4919_v46 = vpop.eup %4918  ;;  %4930 = vrcp.f32 %v3136_v42 }
 0x7ae   :  { %v3158_v7 = vmul.f32 %v4919_v46, %v4899_v58  ;;  %v3261_v58 = vld [vmem:[#allocation2 + $0x1d0] sm:$0xff]  ;;  %v3256_v46 = vld [vmem:[#allocation2 + $0x1a8] sm:$0xff] }
 0x7af   :  { %v3145_v31 = vpop.xlane.xlu1 %3144  ;;  %4781 = vmatprep.subr.mxu0 %v3261_v58 }
 0x7b0   :  { %4932 = vrcp.f32 %v3145_v31  ;;  %v3142_v18 = vpop.xlane.xlu0 %3141  ;;  %v3175_v12 = vsel %vm649_vm4, %v3158_v7, 0.0  ;;  %4782 = vmatpush3.msra.mxu0 %v3261_v58 }
 0x7b1   :  { %v4921_v21 = vpop.eup %4920  ;;  %4934 = vrcp.f32 %v3142_v18  ;;  %v3177_v34 = vadd.f32 %v3176_v62, %v3175_v12  ;;  %4783 = vmatprep.subr.mxu0 %v3260_v30 }
 0x7b2   :  { %v4923_v59 = vpop.eup %4922  ;;  %v3157_v41 = vmul.f32 %v4921_v21, %v4901_v9  ;;  %4784 = vmatpush3.msra.mxu0 %v3260_v30  ;;  %v5644_v21 = vld [vmem:[#allocation2 + $0x220] sm:$0xff] }
 0x7b3   :  { %v3178_v38 = vrot.slane %v3177_v34, 4  ;;  %v3156_v32 = vmul.f32 %v4923_v59, %v4903_v55  ;;  %4799 = vmatprep.subr.mxu0 %v5637_v8 }
 0x7b4   :  { %v3167_v50 = vsel %vm649_vm4, %v3157_v41, 0.0 }
 0x7b5   :  { %v4925_v24 = vpop.eup %4924  ;;  %v3179_v28 = vadd.f32 %v3178_v38, %v3177_v34  ;;  %v3166_v36 = vsel %vm649_vm4, %v3156_v32, 0.0 }
 0x7b6   :  { %v4927_v57 = vpop.eup %4926  ;;  %v3168_v37 = vadd.f32 %v3167_v50, %v3166_v36  ;;  %v3161_v25 = vmul.f32 %v4925_v24, %v4905_v35 }
 0x7b7   :  { %v3180_v0 = vrot.slane %v3179_v28, 2  ;;  %v3160_v20 = vmul.f32 %v4927_v57, %v4907_v23 }
 0x7b8   :  { %v3169_v4 = vrot.slane %v3168_v37, 4  ;;  %v3185_v47 = vsel %vm649_vm4, %v3161_v25, 0.0 }
 0x7b9   :  { %v4929_v26 = vpop.eup %4928  ;;  %v3181_v9 = vadd.f32 %v3180_v0, %v3179_v28  ;;  %v3184_v55 = vsel %vm649_vm4, %v3160_v20, 0.0  ;;  %v5650_v20 = vld [vmem:[%s5838_s1 + $0x8] sm:$0xff]  ;;  %s4980_s1 = smov 127  }
 0x7ba   :  { %v4931_v63 = vpop.eup %4930  ;;  %v3170_v11 = vadd.f32 %v3169_v4, %v3168_v37  ;;  %v3186_v44 = vadd.f32 %v3185_v47, %v3184_v55  ;;  %v3163_v35 = vmul.f32 %v4929_v26, %v5611_v39  ;;  %v3257_v39 = vld [vmem:[#allocation2 + $0x1b0] sm:$0xff]  ;;  %4936 = vrcp.f32 %v5650_v20  ;;  %v4015_v4 = vld [vmem:[#allocation2 + $0x58] ss:$0 sm:$0xff] }
 0x7bb   :  { %v3182_v23 = vrot.slane %v3181_v9, 1  ;;  %v3162_v13 = vmul.f32 %v4931_v63, %v5613_v52  ;;  %4792 = vmatprep.subr.mxu1 %v3257_v39  ;;  %4938 = vrcp.f32 %v5655_v2  ;;  %v555_v47 = vadd.f32 %v4015_v4, %v5210_v6 }
 0x7bc   :  { %v3171_v53 = vrot.slane %v3170_v11, 2  ;;  %v3187_v40 = vrot.slane %v3186_v44, 4  ;;  %v3194_v43 = vsel %vm649_vm4, %v3163_v35, 0.0  ;;  %4793 = vmatpush3.msra.mxu1 %v3257_v39  ;;  %v553_v55 = vadd.f32 %v4015_v4, %v5206_v61 }
 0x7bd   :  { %v4933_v3 = vpop.eup %4932  ;;  %v3183_v16 = vadd.f32 %v3182_v23, %v3181_v9  ;;  %v3193_v15 = vsel %vm649_vm4, %v3162_v13, 0.0  ;;  %4794 = vmatprep.subr.mxu1 %v3256_v46  ;;  %v557_v35 = vadd.f32 %v4015_v4, %v5214_v14  ;;  %v554_v6 = vadd.f32 %v4015_v4, %v5204_v56  ;;  %v3515_v56 = vld [vmem:[#allocation2 + $0x218] sm:$0xff] }
 0x7be   :  { %v4935_v19 = vpop.eup %4934  ;;  %v3172_v52 = vadd.f32 %v3171_v53, %v3170_v11  ;;  %v3188_v60 = vadd.f32 %v3187_v40, %v3186_v44  ;;  %v3195_v5 = vadd.f32 %v3194_v43, %v3193_v15  ;;  %v3165_v42 = vmul.f32 %v4933_v3, %v5619_v54  ;;  %4795 = vmatpush3.msra.mxu1 %v3256_v46  ;;  %v3428_v53 = vld [vmem:[#allocation2 + $0x1f8] sm:$0xff] }
 0x7bf   :  { %3219 = vbcast.lane.b32.xlu0 %v3183_v16, 256  ;;  %v3164_v27 = vmul.f32 %v4935_v19, %v5621_v49  ;;  %4810 = vmatprep.subr.mxu1 %v5644_v21  ;;  %v556_v44 = vadd.f32 %v4015_v4, %v5208_v1  ;;  %v559_v40 = vadd.f32 %v4015_v4, %v5218_v22  ;;  %v3427_v1 = vld [vmem:[#allocation2 + $0x1f0] sm:$0xff] }
 0x7c0   :  { %v3173_v7 = vrot.slane %v3172_v52, 1  ;;  %v3189_v31 = vrot.slane %v3188_v60, 2  ;;  %v3196_v18 = vrot.slane %v3195_v5, 4  ;;  %v3203_v12 = vsel %vm649_vm4, %v3165_v42, 0.0  ;;  %v3513_v42 = vld [vmem:[#allocation2 + $0x208] sm:$0xff] }
 0x7c1   :  { %v3202_v62 = vsel %vm649_vm4, %v3164_v27, 0.0  ;;  %v558_v15 = vadd.f32 %v4015_v4, %v5212_v10  ;;  %v561_v19 = vadd.f32 %v4015_v4, %v5224_v33  ;;  %v560_v10 = vadd.f32 %v4015_v4, %v5216_v17  ;;  %v3602_v27 = vld [vmem:[#allocation2 + $0x238] sm:$0xff] }
 0x7c2   :  { %v3174_v34 = vadd.f32 %v3173_v7, %v3172_v52  ;;  %v3190_v54 = vadd.f32 %v3189_v31, %v3188_v60  ;;  %v3197_v59 = vadd.f32 %v3196_v18, %v3195_v5  ;;  %v3204_v41 = vadd.f32 %v3203_v12, %v3202_v62  ;;  %v3514_v52 = vld [vmem:[#allocation2 + $0x210] sm:$0xff]  ;;  %v3603_v60 = vld [vmem:[#allocation2 + $0x240] sm:$0xff]  ;;  %v3600_v18 = vld [vmem:[#allocation2 + $0x228] sm:$0xff] }
 0x7c3   :  { %v3601_v7 = vld [vmem:[#allocation2 + $0x230] sm:$0xff]  ;;  %v562_v31 = vadd.f32 %v4015_v4, %v5220_v29 }
 0x7c4   :  { %3212 = vbcast.lane.b32.xlu1 %v3174_v34, 256  ;;  %v3191_v49 = vrot.slane %v3190_v54, 1  ;;  %v3198_v45 = vrot.slane %v3197_v59, 2  ;;  %v3205_v38 = vrot.slane %v3204_v41, 4 }
 0x7c6   :  { %v3192_v32 = vadd.f32 %v3191_v49, %v3190_v54  ;;  %v3199_v50 = vadd.f32 %v3198_v45, %v3197_v59  ;;  %v3206_v24 = vadd.f32 %v3205_v38, %v3204_v41 }
 0x7c7   :  { %v4937_v58 = vpop.eup %4936 }
 0x7c8   :  { %3223 = vbcast.lane.b32.xlu1 %v3183_v16, 264  ;;  %3226 = vbcast.lane.b32.xlu0 %v3192_v32, 256  ;;  %v3200_v28 = vrot.slane %v3199_v50, 1  ;;  %v3207_v36 = vrot.slane %v3206_v24, 2  ;;  %v4939_v51 = vpop.eup %4938  ;;  %v3426_v16 = vld [vmem:[#allocation2 + $0x1e8] sm:$0xff] }
 0x7ca   :  { %v3201_v57 = vadd.f32 %v3200_v28, %v3199_v50  ;;  %v3208_v37 = vadd.f32 %v3207_v36, %v3206_v24  ;;  %v4149_v36 = vld [vmem:[#allocation2 + $0x248] ss:$0 sm:$0xff] }
 0x7cc   :  { %3216 = vbcast.lane.b32.xlu1 %v3174_v34, 264  ;;  %3233 = vbcast.lane.b32.xlu0 %v3201_v57, 256  ;;  %v3209_v25 = vrot.slane %v3208_v37, 1 }
 0x7ce   :  { %v3210_v0 = vadd.f32 %v3209_v25, %v3208_v37 }
 0x7d0   :  { %3230 = vbcast.lane.b32.xlu1 %v3192_v32, 264  ;;  %3240 = vbcast.lane.b32.xlu0 %v3210_v0, 256 }
 0x7d4   :  { %3237 = vbcast.lane.b32.xlu1 %v3201_v57, 264  ;;  %3722 = vrot.lane.b32.xlu0 %v5655_v2, %s4978_s14 }
 0x7d8   :  { %3244 = vbcast.lane.b32.xlu1 %v3210_v0, 264  ;;  %3732 = vrot.lane.b32.xlu0 %v4939_v51, %s4979_s15 }
 0x7dc   :  { %3724 = vrot.lane.b32.xlu1 %v5650_v20, %s4978_s14 }
 0x7e0   :  { %3734 = vrot.lane.b32.xlu1 %v4937_v58, %s4979_s15 }
 0x831   :  { %v3220_v26 = vpop.permute.xlu0 %3219 }
 0x832   :  { %v3248_v9 = vmul.f32 %v3220_v26, %v555_v47 }
 0x834   :  { %4785 = vmatprep.mubr.msk.f32.mxu0 %vm243_vm3, %v3248_v9 }
 0x836   :  { %v3213_v63 = vpop.permute.xlu1 %3212 }
 0x837   :  { %v3246_v11 = vmul.f32 %v3213_v63, %v553_v55 }
 0x839   :  { %4796 = vmatprep.mubr.msk.f32.mxu1 %vm243_vm3, %v3246_v11 }
 0x83a   :  { %v3224_v23 = vpop.permute.xlu1 %3223  ;;  %v3227_v13 = vpop.permute.xlu0 %3226 }
 0x83b   :  { %v3249_v30 = vmul.f32 %v3224_v23, %v556_v44  ;;  %v3250_v48 = vmul.f32 %v3227_v13, %v557_v35 }
 0x83d   :  { %4786 = vmatmul.mubr.msk.f32.vlgmr.msra.gmra.mxu0 %vm243_vm3, %v3249_v30 }
 0x83e   :  { %v3217_v61 = vpop.permute.xlu1 %3216  ;;  %v3234_v43 = vpop.permute.xlu0 %3233  ;;  %4800 = vmatpush3.msra.mxu0 %v5637_v8  ;;  %4807 = vmatprep.mubr.msk.f32.mxu0 %vm243_vm3, %v3250_v48 }
 0x83f   :  { %v3247_v3 = vmul.f32 %v3217_v61, %v554_v6  ;;  %v3252_v14 = vmul.f32 %v3234_v43, %v559_v40  ;;  %4801 = vmatprep.subr.mxu0 %v3428_v53 }
 0x840   :  { %4802 = vmatpush3.msra.mxu0 %v3428_v53 }
 0x841   :  { %4797 = vmatmul.mubr.msk.f32.vlgmr.msra.gmra.mxu1 %vm243_vm3, %v3247_v3  ;;  %4803 = vmatprep.subr.mxu0 %v3427_v1 }
 0x842   :  { %v3231_v39 = vpop.permute.xlu1 %3230  ;;  %v3241_v22 = vpop.permute.xlu0 %3240  ;;  %4804 = vmatpush3.msra.mxu0 %v3427_v1  ;;  %4811 = vmatpush3.msra.mxu1 %v5644_v21 }
 0x843   :  { %v3251_v8 = vmul.f32 %v3231_v39, %v558_v15  ;;  %4818 = vmatprep.mubr.msk.f32.mxu1 %vm243_vm3, %v3252_v14  ;;  %4805 = vmatprep.subr.mxu0 %v3426_v16  ;;  %v3254_v5 = vmul.f32 %v3241_v22, %v561_v19 }
 0x844   :  { %4812 = vmatprep.subr.mxu1 %v3515_v56  ;;  %4806 = vmatpush3.msra.mxu0 %v3426_v16 }
 0x845   :  { %4813 = vmatpush3.msra.mxu1 %v3515_v56  ;;  %4808 = vmatmul.mubr.msk.f32.vlgmr.msra.gmra.mxu0 %vm243_vm3, %v3251_v8 }
 0x846   :  { %4814 = vmatprep.subr.mxu1 %v3514_v52  ;;  %4821 = vmatprep.subr.mxu0 %v3603_v60  ;;  %v3238_v33 = vpop.permute.xlu1 %3237  ;;  %v3723_v23 = vpop.permute.xlu0 %3722 }
 0x847   :  { %v3253_v46 = vmul.f32 %v3238_v33, %v560_v10  ;;  %4815 = vmatpush3.msra.mxu1 %v3514_v52  ;;  %4822 = vmatpush3.msra.mxu0 %v3603_v60 }
 0x848   :  { %4829 = vmatprep.mubr.msk.f32.mxu0 %vm243_vm3, %v3254_v5  ;;  %4816 = vmatprep.subr.mxu1 %v3513_v42 }
 0x849   :  { %4823 = vmatprep.subr.mxu0 %v3602_v27  ;;  %4817 = vmatpush3.msra.mxu1 %v3513_v42 }
 0x84a   :  { %4824 = vmatpush3.msra.mxu0 %v3602_v27  ;;  %4819 = vmatmul.mubr.msk.f32.vlgmr.msra.gmra.mxu1 %vm243_vm3, %v3253_v46  ;;  %v3245_v17 = vpop.permute.xlu1 %3244  ;;  %v5707_v53 = vpop.permute.xlu0 %3732 }
 0x84b   :  { %4825 = vmatprep.subr.mxu0 %v3601_v7  ;;  %v3255_v12 = vmul.f32 %v3245_v17, %v562_v31 }
 0x84c   :  { %4826 = vmatpush3.msra.mxu0 %v3601_v7 }
 0x84d   :  { %4827 = vmatprep.subr.mxu0 %v3600_v18 }
 0x84e   :  { %4828 = vmatpush3.msra.mxu0 %v3600_v18  ;;  %v3725_v35 = vpop.permute.xlu1 %3724 }
 0x84f   :  { %4830 = vmatmul.mubr.msk.f32.vlgmr.msra.gmra.mxu0 %vm243_vm3, %v3255_v12 }
 0x852   :  { %v5704_v30 = vpop.permute.xlu1 %3734 }
 0x8fd   :  { %v4787_v62 = vpop.f32.mrf.mxu0 }
 0x8ff   :  { %v3336_v34 = vpop.f32.mrf.mxu0 }
 0x901   :  { %v4798_v21 = vpop.f32.mrf.mxu1 }
 0x902   :  { %v3423_v41 = vadd.f32 %v4798_v21, %v4787_v62 }
 0x903   :  { %v3417_v59 = vpop.f32.mrf.mxu1 }
 0x904   :  { %v3418_v45 = vadd.f32 %v3417_v59, %v3336_v34 }
 0x905   :  { %v4809_v54 = vpop.f32.mrf.mxu0 }
 0x906   :  { %v3512_v38 = vadd.f32 %v4809_v54, %v3423_v41 }
 0x907   :  { %v3502_v29 = vpop.f32.mrf.mxu0 }
 0x908   :  { %v3511_v50 = vadd.f32 %v3502_v29, %v3418_v45 }
 0x90a   :  { %v4820_v49 = vpop.f32.mrf.mxu1 }
 0x90b   :  { %v3599_v24 = vadd.f32 %v4820_v49, %v3512_v38 }
 0x90c   :  { %v3589_v32 = vpop.f32.mrf.mxu1 }
 0x90d   :  { %v3598_v57 = vadd.f32 %v3589_v32, %v3511_v50 }
 0x90f   :  { %v4831_v28 = vpop.f32.mrf.mxu0 }
 0x910   :  { %v3686_v37 = vadd.f32 %v4831_v28, %v3599_v24 }
 0x911   :  { %v3676_v25 = vpop.f32.mrf.mxu0 }
 0x912   :  { %v5687_v0 = vadd.f32 %v4149_v36, %v3686_v37  ;;  %v3685_v58 = vadd.f32 %v3676_v25, %v3598_v57 }
 0x914   :  { %v4151_v51 = vmul.f32 -1.442695, %v5687_v0  ;;  %v5690_v4 = vadd.f32 %v4149_v36, %v3685_v58 }
 0x916   :  { %4940 = vpow2.f32 %v4151_v51  ;;  %v4150_v47 = vmul.f32 -1.442695, %v5690_v4 }
 0x918   :  { %4942 = vpow2.f32 %v4150_v47 }
 0x923   :  { %v4941_v26 = vpop.eup %4940 }
 0x924   :  { %v3701_v9 = vadd.f32 1.0, %v4941_v26 }
 0x925   :  { %v4943_v55 = vpop.eup %4942 }
 0x926   :  { %4944 = vrcp.f32 %v3701_v9  ;;  %v3700_v63 = vadd.f32 1.0, %v4943_v55 }
 0x928   :  { %4946 = vrcp.f32 %v3700_v63 }
 0x933   :  { %v5693_v11 = vpop.eup %4944 }
 0x934   :  { %3744 = vrot.lane.b32.xlu1 %v5693_v11, %s4980_s1  ;;  %v3729_v13 = vmul.f32 %v5693_v11, %v3725_v35 }
 0x935   :  { %v5696_v44 = vpop.eup %4946 }
 0x936   :  { %3742 = vrot.lane.b32.xlu0 %v5696_v44, %s4980_s1  ;;  %v3728_v48 = vmul.f32 %v5696_v44, %v3723_v23  ;;  %v3739_v6 = vmul.f32 %v5704_v30, %v3729_v13 }
 0x938   :  { %3714 = vrot.lane.b32.xlu1 %v5650_v20, %s4981_s16  ;;  %v3738_v61 = vmul.f32 %v5707_v53, %v3728_v48 }
 0x93a   :  { %3712 = vrot.lane.b32.xlu0 %v5655_v2, %s4981_s16 }
 0x9a6   :  { %v5710_v40 = vpop.permute.xlu1 %3744 }
 0x9a7   :  { %v3749_v43 = vsub.f32 %v3739_v6, %v5710_v40 }
 0x9a8   :  { %v5714_v1 = vpop.permute.xlu0 %3742 }
 0x9a9   :  { %v3751_v3 = vmul.f32 %v3749_v43, %v5650_v20  ;;  %v3748_v14 = vsub.f32 %v3738_v61, %v5714_v1 }
 0x9aa   :  { %v5718_v16 = vpop.permute.xlu1 %3714 }
 0x9ab   :  { %v5721_v15 = vadd.f32 %v3751_v3, %v5650_v20  ;;  %v3750_v56 = vmul.f32 %v3748_v14, %v5655_v2  ;;  %v3753_v39 = vmul.f32 %v5693_v11, %v5718_v16 }
 0x9ac   :  { %v5726_v22 = vpop.permute.xlu0 %3712 }
 0x9ad   :  { %v5729_v19 = vadd.f32 %v3750_v56, %v5655_v2  ;;  %3762 = vrot.lane.b32.xlu1 %v5721_v15, %s4982_s17  ;;  %v3752_v8 = vmul.f32 %v5696_v44, %v5726_v22  ;;  %v3757_v52 = vadd.f32 %v3753_v39, %v5650_v20 }
 0x9af   :  { %3760 = vrot.lane.b32.xlu0 %v5729_v19, %s4982_s17  ;;  %v3756_v60 = vadd.f32 %v3752_v8, %v5655_v2 }
 0x9b1   :  { %3772 = vrot.lane.b32.xlu1 %v3757_v52, %s4983_s18 }
 0x9b3   :  { %3770 = vrot.lane.b32.xlu0 %v3756_v60, %s4983_s18 }
 0xa1f   :  { %v3763_v5 = vpop.permute.xlu1 %3762 }
 0xa20   :  { %v3767_v42 = vsub.f32 %v5650_v20, %v3763_v5 }
 0xa21   :  { %v3761_v10 = vpop.permute.xlu0 %3760 }
 0xa22   :  { %v3766_v27 = vsub.f32 %v5655_v2, %v3761_v10 }
 0xa23   :  { %v3773_v33 = vpop.permute.xlu1 %3772 }
 0xa24   :  { %v3777_v46 = vsub.f32 %v3767_v42, %v3773_v33  ;;  %v3719_v42 = vsub.f32 %v5650_v20, %v5718_v16  ;;  %v3718_v33 = vsub.f32 %v5655_v2, %v5726_v22 }
 0xa25   :  { %v3771_v7 = vpop.permute.xlu0 %3770 }
 0xa26   :  { %v3776_v31 = vsub.f32 %v3766_v27, %v3771_v7  ;;  %3800 = vrot.lane.b32.xlu1 %v3777_v46, %s4979_s15  ;;  %4948 = vrcp.f32 %v3719_v42 }
 0xa27   :  { %4950 = vrcp.f32 %v3718_v33 }
 0xa28   :  { %3798 = vrot.lane.b32.xlu0 %v3776_v31, %s4979_s15 }
 0xa2a   :  { %3814 = vrot.lane.b32.xlu1 %v5721_v15, %s4981_s16 }
 0xa2c   :  { %3812 = vrot.lane.b32.xlu0 %v5729_v19, %s4981_s16 }
 0xa33   :  { %v4949_v16 = vpop.eup %4948 }
 0xa34   :  { %v4951_v22 = vpop.eup %4950 }
 0xa98   :  { %v3801_v17 = vpop.permute.xlu1 %3800 }
 0xa99   :  { %v3805_v18 = vmul.f32 %v5693_v11, %v3801_v17 }
 0xa9a   :  { %v3799_v12 = vpop.permute.xlu0 %3798 }
 0xa9b   :  { %v3807_v62 = vmul.f32 %v3805_v18, %v5704_v30  ;;  %v3804_v21 = vmul.f32 %v5696_v44, %v3799_v12 }
 0xa9c   :  { %v3815_v59 = vpop.permute.xlu1 %3814 }
 0xa9d   :  { %v3809_v34 = vsub.f32 %v3807_v62, %v5710_v40  ;;  %v3806_v54 = vmul.f32 %v3804_v21, %v5707_v53  ;;  %v3819_v32 = vmul.f32 %v5693_v11, %v3815_v59 }
 0xa9e   :  { %v3813_v29 = vpop.permute.xlu0 %3812 }
 0xa9f   :  { %v3811_v41 = vmul.f32 %v3809_v34, %v5721_v15  ;;  %v3808_v49 = vsub.f32 %v3806_v54, %v5714_v1  ;;  %v3818_v24 = vmul.f32 %v5696_v44, %v3813_v29  ;;  %v3823_v28 = vadd.f32 %v3819_v32, %v3757_v52 }
 0xaa1   :  { %v5757_v45 = vadd.f32 %v3811_v41, %v5721_v15  ;;  %v3810_v38 = vmul.f32 %v3808_v49, %v5729_v19  ;;  %v3822_v36 = vadd.f32 %v3818_v24, %v3756_v60 }
 0xaa3   :  { %v5762_v50 = vadd.f32 %v3810_v38, %v5729_v19  ;;  %3828 = vrot.lane.b32.xlu1 %v5757_v45, %s4982_s17 }
 0xaa5   :  { %3826 = vrot.lane.b32.xlu0 %v5762_v50, %s4982_s17 }
 0xaa7   :  { %3838 = vrot.lane.b32.xlu1 %v3823_v28, %s4983_s18 }
 0xaa9   :  { %3836 = vrot.lane.b32.xlu0 %v3822_v36, %s4983_s18 }
 0xb15   :  { %v3829_v57 = vpop.permute.xlu1 %3828 }
 0xb16   :  { %v3833_v25 = vsub.f32 %v5650_v20, %v3829_v57 }
 0xb17   :  { %v3827_v37 = vpop.permute.xlu0 %3826 }
 0xb18   :  { %v3832_v51 = vsub.f32 %v5655_v2, %v3827_v37 }
 0xb19   :  { %v3839_v58 = vpop.permute.xlu1 %3838 }
 0xb1a   :  { %v3843_v47 = vsub.f32 %v3833_v25, %v3839_v58 }
 0xb1b   :  { %v3837_v26 = vpop.permute.xlu0 %3836 }
 0xb1c   :  { %v3842_v9 = vsub.f32 %v3832_v51, %v3837_v26  ;;  %3852 = vrot.lane.b32.xlu1 %v3843_v47, %s4979_s15 }
 0xb1e   :  { %3850 = vrot.lane.b32.xlu0 %v3842_v9, %s4979_s15 }
 0xb20   :  { %3866 = vrot.lane.b32.xlu1 %v5757_v45, %s4981_s16 }
 0xb22   :  { %3864 = vrot.lane.b32.xlu0 %v5762_v50, %s4981_s16 }
 0xb8e   :  { %v3853_v55 = vpop.permute.xlu1 %3852 }
 0xb8f   :  { %v3857_v63 = vmul.f32 %v5693_v11, %v3853_v55 }
 0xb90   :  { %v3851_v35 = vpop.permute.xlu0 %3850 }
 0xb91   :  { %v3859_v23 = vmul.f32 %v3857_v63, %v5704_v30  ;;  %v3856_v13 = vmul.f32 %v5696_v44, %v3851_v35 }
 0xb92   :  { %v3867_v61 = vpop.permute.xlu1 %3866 }
 0xb93   :  { %v3861_v48 = vsub.f32 %v3859_v23, %v5710_v40  ;;  %v3858_v6 = vmul.f32 %v3856_v13, %v5707_v53  ;;  %v3871_v39 = vmul.f32 %v5693_v11, %v3867_v61 }
 0xb94   :  { %v3865_v14 = vpop.permute.xlu0 %3864 }
 0xb95   :  { %v3863_v43 = vmul.f32 %v3861_v48, %v5757_v45  ;;  %v3860_v3 = vsub.f32 %v3858_v6, %v5714_v1  ;;  %v3870_v52 = vmul.f32 %v5696_v44, %v3865_v14  ;;  %v3875_v5 = vadd.f32 %v3871_v39, %v3823_v28 }
 0xb97   :  { %v3862_v56 = vmul.f32 %v3860_v3, %v5762_v50  ;;  %v5789_v8 = vadd.f32 %v3863_v43, %v5757_v45  ;;  %v3874_v10 = vadd.f32 %v3870_v52, %v3822_v36 }
 0xb99   :  { %3880 = vrot.lane.b32.xlu1 %v5789_v8, %s4982_s17  ;;  %v5795_v60 = vadd.f32 %v3862_v56, %v5762_v50 }
 0xb9b   :  { %3878 = vrot.lane.b32.xlu0 %v5795_v60, %s4982_s17 }
 0xb9d   :  { %3890 = vrot.lane.b32.xlu1 %v3875_v5, %s4983_s18 }
 0xb9f   :  { %3888 = vrot.lane.b32.xlu0 %v3874_v10, %s4983_s18 }
 0xc0b   :  { %v3881_v27 = vpop.permute.xlu1 %3880 }
 0xc0c   :  { %v3885_v7 = vsub.f32 %v5650_v20, %v3881_v27 }
 0xc0d   :  { %v3879_v46 = vpop.permute.xlu0 %3878 }
 0xc0e   :  { %v3884_v17 = vsub.f32 %v5655_v2, %v3879_v46 }
 0xc0f   :  { %v3891_v31 = vpop.permute.xlu1 %3890 }
 0xc10   :  { %v3895_v18 = vsub.f32 %v3885_v7, %v3891_v31 }
 0xc11   :  { %v3889_v12 = vpop.permute.xlu0 %3888 }
 0xc12   :  { %v3894_v62 = vsub.f32 %v3884_v17, %v3889_v12  ;;  %3904 = vrot.lane.b32.xlu1 %v3895_v18, %s4979_s15 }
 0xc14   :  { %3902 = vrot.lane.b32.xlu0 %v3894_v62, %s4979_s15 }
 0xc16   :  { %3780 = vrot.lane.b32.xlu1 %v5650_v20, %s4984_s19 }
 0xc18   :  { %3778 = vrot.lane.b32.xlu0 %v5655_v2, %s4984_s19 }
 0xc1a   :  { %3790 = vrot.lane.b32.xlu1 %v4949_v16, %s4985_s20 }
 0xc1c   :  { %3788 = vrot.lane.b32.xlu0 %v4951_v22, %s4985_s20 }
 0xc1e   :  { %3926 = vrot.lane.b32.xlu1 %v5687_v0, %s4978_s14 }
 0xc20   :  { %3924 = vrot.lane.b32.xlu0 %v5690_v4, %s4978_s14 }
 0xc84   :  { %v3905_v21 = vpop.permute.xlu1 %3904 }
 0xc85   :  { %v3909_v34 = vmul.f32 %v5693_v11, %v3905_v21 }
 0xc86   :  { %v3903_v54 = vpop.permute.xlu0 %3902 }
 0xc87   :  { %v3911_v59 = vmul.f32 %v3909_v34, %v5704_v30  ;;  %v3908_v20 = vmul.f32 %v5696_v44, %v3903_v54 }
 0xc88   :  { %v3781_v2 = vpop.permute.xlu1 %3780 }
 0xc89   :  { %v3913_v41 = vsub.f32 %v3911_v59, %v5710_v40  ;;  %v3910_v49 = vmul.f32 %v3908_v20, %v5707_v53  ;;  %v3785_v0 = vsub.f32 %v5721_v15, %v3781_v2  ;;  %v3845_v44 = vsub.f32 %v5757_v45, %v3781_v2 }
 0xc8a   :  { %v3779_v29 = vpop.permute.xlu0 %3778  ;;  %v3897_v36 = vsub.f32 %v5789_v8, %v3781_v2 }
 0xc8b   :  { %v3912_v38 = vsub.f32 %v3910_v49, %v5714_v1  ;;  %v3915_v4 = vmul.f32 %v3913_v41, %v5789_v8  ;;  %v3784_v11 = vsub.f32 %v5729_v19, %v3779_v29  ;;  %v3844_v1 = vsub.f32 %v5762_v50, %v3779_v29 }
 0xc8c   :  { %v3791_v32 = vpop.permute.xlu1 %3790  ;;  %v3896_v25 = vsub.f32 %v5795_v60, %v3779_v29 }
 0xc8d   :  { %v3795_v24 = vmul.f32 %v3791_v32, %v3785_v0  ;;  %v3914_v30 = vmul.f32 %v3912_v38, %v5795_v60  ;;  %v3917_v53 = vadd.f32 %v3915_v4, %v5789_v8  ;;  %v3847_v15 = vmul.f32 %v3845_v44, %v3791_v32 }
 0xc8e   :  { %v3789_v28 = vpop.permute.xlu0 %3788  ;;  %v3899_v45 = vmul.f32 %v3897_v36, %v3791_v32 }
 0xc8f   :  { %3934 = vrot.lane.b32.xlu1 %v3795_v24, %s4986_s21  ;;  %v3794_v40 = vmul.f32 %v3789_v28, %v3784_v11  ;;  %v3916_v57 = vadd.f32 %v3914_v30, %v5795_v60  ;;  %v3846_v19 = vmul.f32 %v3844_v1, %v3789_v28  ;;  %v3919_v37 = vsub.f32 %v3917_v53, %v3781_v2 }
 0xc90   :  { %v3898_v51 = vmul.f32 %v3896_v25, %v3789_v28  ;;  %v3927_v26 = vpop.permute.xlu1 %3926 }
 0xc91   :  { %3932 = vrot.lane.b32.xlu0 %v3794_v40, %s4986_s21  ;;  %v3918_v58 = vsub.f32 %v3916_v57, %v3779_v29  ;;  %v3921_v47 = vmul.f32 %v3919_v37, %v3791_v32 }
 0xc92   :  { %v3925_v9 = vpop.permute.xlu0 %3924 }
 0xc93   :  { %3942 = vrot.lane.b32.xlu1 %v3847_v15, %s4987_s22  ;;  %v3920_v50 = vmul.f32 %v3918_v58, %v3789_v28 }
 0xc95   :  { %3940 = vrot.lane.b32.xlu0 %v3846_v19, %s4987_s22 }
 0xc97   :  { %3950 = vrot.lane.b32.xlu1 %v3899_v45, %s4988_s23 }
 0xc99   :  { %3948 = vrot.lane.b32.xlu0 %v3898_v51, %s4988_s23 }
 0xc9b   :  { %3958 = vrot.lane.b32.xlu1 %v3921_v47, %s4989_s24 }
 0xc9d   :  { %3956 = vrot.lane.b32.xlu0 %v3920_v50, %s4989_s24 }
 0xd01   :  { %v3935_v55 = vpop.permute.xlu1 %3934 }
 0xd02   :  { %v3964_v48 = vsel %vm3962_vm5, %v3927_v26, %v3935_v55 }
 0xd03   :  { %v3933_v63 = vpop.permute.xlu0 %3932 }
 0xd04   :  { %v3963_v43 = vsel %vm3962_vm5, %v3925_v9, %v3933_v63 }
 0xd05   :  { %v3943_v35 = vpop.permute.xlu1 %3942 }
 0xd06   :  { %v3967_v61 = vsel %vm3965_vm6, %v3964_v48, %v3943_v35 }
 0xd07   :  { %v3941_v23 = vpop.permute.xlu0 %3940 }
 0xd08   :  { %v3966_v56 = vsel %vm3965_vm6, %v3963_v43, %v3941_v23 }
 0xd09   :  { %v3951_v13 = vpop.permute.xlu1 %3950 }
 0xd0a   :  { %v3970_v3 = vsel %vm3968_vm7, %v3967_v61, %v3951_v13 }
 0xd0b   :  { %v3949_v6 = vpop.permute.xlu0 %3948 }
 0xd0c   :  { %v3969_v8 = vsel %vm3968_vm7, %v3966_v56, %v3949_v6 }
 0xd0d   :  { %v3959_v14 = vpop.permute.xlu1 %3958 }
 0xd0e   :  { %v3973_v39 = vsel %vm3971_vm8, %v3970_v3, %v3959_v14 }
 0xd0f   :  { %3976 = vst.msk [vmem:[%s5840_s3 + $0x8] sm:$0xff] %vm3974_vm9, %v3973_v39  ;;  %v3957_v52 = vpop.permute.xlu0 %3956 }
 0xd10   :  { %v3972_v60 = vsel %vm3971_vm8, %v3969_v8, %v3957_v52 }
 0xd11   :  { %3975 = vst.msk [vmem:[%s5840_s3] sm:$0xff] %vm3974_vm9, %v3972_v60 }
 0xd12   :  { %3981 = vsyncpa [#allocation3], 1 }

</bundles_post_ra>
